<compile_context>
chip_gen: v7x
topology: tpu7x:2x2x1
jax: 0.10.0
libtpu: 0.0.40
codegen_flags: <defaults>
</compile_context>

<pallas_src>
import math
from functools import partial

import jax
import jax.numpy as jnp
from jax.experimental import pallas as pl
from jax.experimental.pallas import tpu as pltpu

_NEG_LARGE = -1e30                  # stand-in for -inf in masked log_softmax
_VMEM_CAP = 48 * 1024 * 1024        # stay below v7x's 64 MiB physical VMEM
_VMEM_FLOOR = 32 * 1024 * 1024


def _round_up(x, m):
    return (x + m - 1) // m * m


def _vmem_limit(need_bytes):
    """Actual per-call VMEM need + headroom, clamped to a v7x-safe cap."""
    return int(min(max(need_bytes + (8 << 20), _VMEM_FLOOR), _VMEM_CAP))


# -----------------------------------------------------------------------------
# Kernel 1: row-tiled "support" matmul  S1 = X @ W1  (bf16 in, f32 acc, bf16 out)
# -----------------------------------------------------------------------------
def _support_kernel(a_ref, w_ref, o_ref):
    o_ref[...] = jnp.dot(
        a_ref[...], w_ref[...], preferred_element_type=jnp.float32
    ).astype(o_ref.dtype)


def _support_matmul(a, w, *, tm):
    n, k = a.shape
    h = w.shape[1]
    need = 2 * (tm * k * 2) + 2 * (k * h * 2) + 2 * (tm * h * 2)
    return pl.pallas_call(
        _support_kernel,
        out_shape=jax.ShapeDtypeStruct((n, h), jnp.bfloat16),
        grid_spec=pltpu.PrefetchScalarGridSpec(
            num_scalar_prefetch=0,
            grid=(n // tm,),
            in_specs=[
                pl.BlockSpec((tm, k), lambda i: (i, 0)),
                pl.BlockSpec((k, h), lambda i: (0, 0)),
            ],
            out_specs=pl.BlockSpec((tm, h), lambda i: (i, 0)),
        ),
        compiler_params=pltpu.CompilerParams(
            dimension_semantics=("parallel",),
            vmem_limit_bytes=_vmem_limit(need),
        ),
    )(a, w)


# -----------------------------------------------------------------------------
# Kernel 2 (fused layer 1): sup2 = relu(adj @ S1 + b1) @ W2
#   grid = (rows//tm, N//tk); S1 and W2 are VMEM-resident; adj streams in
#   (tm, tk) tiles; f32 accumulator scratch; finalize fuses bias + relu + W2.
# -----------------------------------------------------------------------------
def _make_fused_agg_kernel(tk):
    def kernel(adj_ref, sup_ref, b1_ref, w2_ref, o_ref, acc_ref):
        k = pl.program_id(1)

        @pl.when(k == 0)
        def _():
            acc_ref[...] = jnp.zeros_like(acc_ref)

        start = pl.multiple_of(k * tk, tk)
        acc_ref[...] += jnp.dot(
            adj_ref[...],
            sup_ref[pl.ds(start, tk), :],          # resident S1, sliced in VMEM
            preferred_element_type=jnp.float32,
        )

        @pl.when(k == pl.num_programs(1) - 1)
        def _():
            h1 = jnp.maximum(acc_ref[...] + b1_ref[...], 0.0).astype(jnp.bfloat16)
            o_ref[...] = jnp.dot(
                h1, w2_ref[...], preferred_element_type=jnp.float32
            ).astype(o_ref.dtype)

    return kernel


def _fused_aggregate(adj, sup, b1, w2, *, tm, tk):
    n_rows, n_cols = adj.shape
    h1 = sup.shape[1]
    h2 = w2.shape[1]
    need = (
        2 * (tm * tk * 2)          # adj tiles (double-buffered)
        + 2 * (n_cols * h1 * 2)    # resident support matrix
        + 2 * (h1 * 4)             # bias
        + 2 * (h1 * h2 * 2)        # resident W2
        + 2 * (tm * h2 * 2)        # output tiles
        + tm * h1 * 4              # f32 accumulator scratch
    )
    return pl.pallas_call(
        _make_fused_agg_kernel(tk),
        out_shape=jax.ShapeDtypeStruct((n_rows, h2), jnp.bfloat16),
        grid_spec=pltpu.PrefetchScalarGridSpec(
            num_scalar_prefetch=0,
            grid=(n_rows // tm, n_cols // tk),
            in_specs=[
                pl.BlockSpec((tm, tk), lambda i, k: (i, k)),
                pl.BlockSpec((n_cols, h1), lambda i, k: (0, 0)),  # resident
                pl.BlockSpec((1, h1), lambda i, k: (0, 0)),
                pl.BlockSpec((h1, h2), lambda i, k: (0, 0)),      # resident
            ],
            out_specs=pl.BlockSpec((tm, h2), lambda i, k: (i, 0)),
            scratch_shapes=[pltpu.VMEM((tm, h1), jnp.float32)],
        ),
        compiler_params=pltpu.CompilerParams(
            dimension_semantics=("parallel", "arbitrary"),
            vmem_limit_bytes=_vmem_limit(need),
        ),
    )(adj, sup, b1, w2)


# -----------------------------------------------------------------------------
# Kernel 3 (layer 2): out = log_softmax(adj @ S2 + b2)  with padded-class mask
# -----------------------------------------------------------------------------
def _make_final_agg_kernel(tk, nclass):
    def kernel(adj_ref, sup_ref, b2_ref, o_ref, acc_ref):
        k = pl.program_id(1)

        @pl.when(k == 0)
        def _():
            acc_ref[...] = jnp.zeros_like(acc_ref)

        start = pl.multiple_of(k * tk, tk)
        acc_ref[...] += jnp.dot(
            adj_ref[...],
            sup_ref[pl.ds(start, tk), :],          # resident S2, sliced in VMEM
            preferred_element_type=jnp.float32,
        )

        @pl.when(k == pl.num_programs(1) - 1)
        def _():
            z = acc_ref[...] + b2_ref[...]
            col = jax.lax.broadcasted_iota(jnp.int32, z.shape, 1)
            z = jnp.where(col < nclass, z, _NEG_LARGE)     # mask padded classes
            m = jnp.max(z, axis=1, keepdims=True)
            shifted = z - m
            lse = jnp.log(jnp.sum(jnp.exp(shifted), axis=1, keepdims=True))
            o_ref[...] = (shifted - lse).astype(o_ref.dtype)

    return kernel


def _final_aggregate(adj, sup, b2, nclass, *, tm, tk):
    n_rows, n_cols = adj.shape
    h2 = sup.shape[1]
    need = (
        2 * (tm * tk * 2)
        + 2 * (n_cols * h2 * 2)
        + 2 * (h2 * 4)
        + 2 * (tm * h2 * 4)
        + tm * h2 * 4
    )
    return pl.pallas_call(
        _make_final_agg_kernel(tk, nclass),
        out_shape=jax.ShapeDtypeStruct((n_rows, h2), jnp.float32),
        grid_spec=pltpu.PrefetchScalarGridSpec(
            num_scalar_prefetch=0,
            grid=(n_rows // tm, n_cols // tk),
            in_specs=[
                pl.BlockSpec((tm, tk), lambda i, k: (i, k)),
                pl.BlockSpec((n_cols, h2), lambda i, k: (0, 0)),  # resident
                pl.BlockSpec((1, h2), lambda i, k: (0, 0)),
            ],
            out_specs=pl.BlockSpec((tm, h2), lambda i, k: (i, 0)),
            scratch_shapes=[pltpu.VMEM((tm, h2), jnp.float32)],
        ),
        compiler_params=pltpu.CompilerParams(
            dimension_semantics=("parallel", "arbitrary"),
            vmem_limit_bytes=_vmem_limit(need),
        ),
    )(adj, sup, b2)


# -----------------------------------------------------------------------------
# Full forward
# -----------------------------------------------------------------------------
@partial(jax.jit, static_argnames=("tm", "tk"))
def gcn_forward(x, adj, w1, b1, w2, b2, *, tm=512, tk=1024):
    n, nfeat = x.shape
    nhid = w1.shape[1]
    nclass = w2.shape[1]
    f32, bf16 = jnp.float32, jnp.bfloat16

    # Clamp tiles for small graphs so padding waste stays bounded; keep every
    # divisibility constraint (tiles are multiples of 256/512, tm_sup | tk).
    tm = min(tm, _round_up(n, 256))
    tk = min(tk, _round_up(n, 512))
    tm_sup = math.gcd(512, tk)            # row tile of the support matmul

    n_row_pad = _round_up(n, tm)          # adj rows / output rows
    n_col_pad = _round_up(n, tk)          # adj reduction axis (= S rows)
    nfeat_pad = _round_up(nfeat, 256)     # lane-dense x, full MXU K (v6e/v7x)
    h1_pad = _round_up(nhid, 128)
    h2_pad = _round_up(nclass, 128)

    # Independent zero-padding (no lcm-square inflation).
    x_p = jnp.pad(x, ((0, n_col_pad - n), (0, nfeat_pad - nfeat))).astype(bf16)
    adj_p = jnp.pad(adj, ((0, n_row_pad - n), (0, n_col_pad - n))).astype(bf16)
    w1_p = jnp.pad(w1, ((0, nfeat_pad - nfeat), (0, h1_pad - nhid))).astype(bf16)
    b1_p = jnp.pad(b1.reshape(1, -1).astype(f32), ((0, 0), (0, h1_pad - nhid)))
    w2_p = jnp.pad(w2, ((0, h1_pad - nhid), (0, h2_pad - nclass))).astype(bf16)
    b2_p = jnp.pad(b2.reshape(1, -1).astype(f32), ((0, 0), (0, h2_pad - nclass)))

    # Layer 1 support: S1 = x @ W1                        (n_col_pad, h1_pad) bf16
    sup1 = _support_matmul(x_p, w1_p, tm=tm_sup)

    # Fused layer 1 aggregation + layer 2 support:
    #   S2 = relu(adj @ S1 + b1) @ W2                     (n_row_pad, h2_pad) bf16
    sup2 = _fused_aggregate(adj_p, sup1, b1_p, w2_p, tm=tm, tk=tk)

    # Re-pad S2 rows to the reduction-axis padding of adj for layer 2.
    if n_col_pad > n_row_pad:
        sup2 = jnp.pad(sup2, ((0, n_col_pad - n_row_pad), (0, 0)))
    elif n_col_pad < n_row_pad:
        sup2 = sup2[:n_col_pad]

    # Layer 2 aggregation + masked log_softmax:
    #   out = log_softmax(adj @ S2 + b2)                  (n_row_pad, h2_pad) f32
    out = _final_aggregate(adj_p, sup2, b2_p, nclass, tm=tm, tk=tk)

    return out[:n, :nclass]


# -----------------------------------------------------------------------------
# Params / references
# -----------------------------------------------------------------------------
def init_gcn_params(key, nfeat, nhid, nclass):
    """Deterministic init mimicking pygcn's uniform(-stdv, stdv)."""
    k1, k2, k3, k4 = jax.random.split(key, 4)
    stdv1 = 1.0 / jnp.sqrt(nhid)
    stdv2 = 1.0 / jnp.sqrt(nclass)
    w1 = jax.random.uniform(k1, (nfeat, nhid), jnp.float32, -stdv1, stdv1)
    b1 = jax.random.uniform(k2, (1, nhid), jnp.float32, -stdv1, stdv1)
    w2 = jax.random.uniform(k3, (nhid, nclass), jnp.float32, -stdv2, stdv2)
    b2 = jax.random.uniform(k4, (1, nclass), jnp.float32, -stdv2, stdv2)
    return w1, b1, w2, b2


def reference_forward_f32(x, adj, w1, b1, w2, b2):
    h1 = jnp.maximum(adj @ (x @ w1) + b1, 0.0)
    h2 = adj @ (h1 @ w2) + b2
    return jax.nn.log_softmax(h2, axis=1)


def reference_forward_bf16(x, adj, w1, b1, w2, b2):
    """Mimics the kernel's bf16-input / f32-accumulate numerics."""
    bf, f32 = jnp.bfloat16, jnp.float32
    adj_bf = adj.astype(bf)
    s1 = jnp.dot(x.astype(bf), w1.astype(bf), preferred_element_type=f32).astype(bf)
    h1 = jnp.maximum(jnp.dot(adj_bf, s1, preferred_element_type=f32) + b1, 0.0)
    s2 = jnp.dot(h1.astype(bf), w2.astype(bf), preferred_element_type=f32).astype(bf)
    h2 = jnp.dot(adj_bf, s2, preferred_element_type=f32) + b2
    return jax.nn.log_softmax(h2, axis=1)


if __name__ == "__main__":
    N, nfeat, nhid, nclass = 64, 32, 16, 8
    key = jax.random.PRNGKey(0)
    kx, kadj, kp = jax.random.split(key, 3)

    # Node features.
    x = jax.random.normal(kx, (N, nfeat), jnp.float32)

    # Symmetric-normalized dense adjacency with self-loops.
    a = (jax.random.uniform(kadj, (N, N)) > 0.9).astype(jnp.float32)
    a = jnp.maximum(a, a.T) + jnp.eye(N, dtype=jnp.float32)
    deg_inv_sqrt = 1.0 / jnp.sqrt(a.sum(axis=1))
    adj = a * deg_inv_sqrt[:, None] * deg_inv_sqrt[None, :]

    w1, b1, w2, b2 = init_gcn_params(kp, nfeat, nhid, nclass)

    out = gcn_forward(x, adj, w1, b1, w2, b2)
    out = jax.block_until_ready(out)
    assert out.shape == (N, nclass)

    ref_bf16 = reference_forward_bf16(x, adj, w1, b1, w2, b2)
    assert jnp.allclose(out, ref_bf16, atol=2e-4, rtol=2e-4), \
        "mismatch vs bf16-accumulation reference"

    ref_f32 = reference_forward_f32(x, adj, w1, b1, w2, b2)
    assert jnp.allclose(out, ref_f32, atol=5e-2, rtol=5e-2), \
        "mismatch vs f32 reference (bf16 drift too large)"

    print("KERNEL_OK")
</pallas_src>

<mosaic_0001>
module attributes {stable_mosaic.version = 11 : i64} {
  func.func @_support_kernel(%arg0: i32, %arg1: memref<512x256xbf16, #tpu.memory_space<vmem>>, %arg2: memref<256x128xbf16, #tpu.memory_space<vmem>>, %arg3: memref<512x128xbf16, #tpu.memory_space<vmem>>) attributes {dimension_semantics = [#tpu.dimension_semantics<parallel>], iteration_bounds = array<i64: 1>, scalar_prefetch = 0 : i64, scratch_operands = 0 : i64, tpu.core_type = #tpu.core_type<tc>, window_params = [{transform_indices = @transform_0, window_bounds = array<i64: 512, 256>}, {pipeline_mode = #tpu.pipeline_mode<synchronous>, transform_indices = @transform_1, window_bounds = array<i64: 256, 128>}, {transform_indices = @transform_2, window_bounds = array<i64: 512, 128>}]} {
    %c0 = arith.constant 0 : index
    %c0_0 = arith.constant 0 : index
    %0 = vector.load %arg1[%c0, %c0_0] : memref<512x256xbf16, #tpu.memory_space<vmem>>, vector<512x256xbf16>
    %c0_1 = arith.constant 0 : index
    %c0_2 = arith.constant 0 : index
    %1 = vector.load %arg2[%c0_1, %c0_2] : memref<256x128xbf16, #tpu.memory_space<vmem>>, vector<256x128xbf16>
    %cst = arith.constant dense<0.000000e+00> : vector<512x128xf32>
    %2 = tpu.matmul %0, %1, %cst {dimension_numbers = #tpu.dot_dimension_numbers<[1], [0], [0], [1], [0, 0, 1, 1], [], []>} : vector<512x256xbf16>, vector<256x128xbf16>, vector<512x128xf32> -> vector<512x128xf32>
    %3 = arith.truncf %2 : vector<512x128xf32> to vector<512x128xbf16>
    %c0_3 = arith.constant 0 : index
    %c0_4 = arith.constant 0 : index
    %4 = vector.load %arg3[%c0_3, %c0_4] : memref<512x128xbf16, #tpu.memory_space<vmem>>, vector<512x128xbf16>
    tpu.vector_store %arg3[%c0_3, %c0_4], %3 {strides = array<i32>} : memref<512x128xbf16, #tpu.memory_space<vmem>>, vector<512x128xbf16>,
    return
  }
  func.func @transform_0(%arg0: i32) -> (i32, i32) {
    %c0_i32 = arith.constant 0 : i32
    %c0_i32_0 = arith.constant 0 : i32
    return %arg0, %c0_i32 : i32, i32
  }
  func.func @transform_1(%arg0: i32) -> (i32, i32) {
    %c0_i32 = arith.constant 0 : i32
    %c0_i32_0 = arith.constant 0 : i32
    %c0_i32_1 = arith.constant 0 : i32
    return %c0_i32, %c0_i32_0 : i32, i32
  }
  func.func @transform_2(%arg0: i32) -> (i32, i32) {
    %c0_i32 = arith.constant 0 : i32
    %c0_i32_0 = arith.constant 0 : i32
    return %arg0, %c0_i32 : i32, i32
  }
}

module attributes {stable_mosaic.version = 11 : i64} {
  func.func @kernel(%arg0: i32, %arg1: i32, %arg2: memref<256x512xbf16, #tpu.memory_space<vmem>>, %arg3: memref<512x128xbf16, #tpu.memory_space<vmem>>, %arg4: memref<1x128xf32, #tpu.memory_space<vmem>>, %arg5: memref<128x128xbf16, #tpu.memory_space<vmem>>, %arg6: memref<256x128xbf16, #tpu.memory_space<vmem>>, %arg7: memref<256x128xf32, #tpu.memory_space<vmem>>) attributes {dimension_semantics = [#tpu.dimension_semantics<parallel>, #tpu.dimension_semantics<arbitrary>], iteration_bounds = array<i64: 1, 1>, scalar_prefetch = 0 : i64, scratch_operands = 1 : i64, tpu.core_type = #tpu.core_type<tc>, window_params = [{transform_indices = @transform_0, window_bounds = array<i64: 256, 512>}, {pipeline_mode = #tpu.pipeline_mode<synchronous>, transform_indices = @transform_1, window_bounds = array<i64: 512, 128>}, {pipeline_mode = #tpu.pipeline_mode<synchronous>, transform_indices = @transform_2, window_bounds = array<i64: 1, 128>}, {pipeline_mode = #tpu.pipeline_mode<synchronous>, transform_indices = @transform_3, window_bounds = array<i64: 128, 128>}, {transform_indices = @transform_4, window_bounds = array<i64: 256, 128>}]} {
    %c0_i32 = arith.constant 0 : i32
    %0 = arith.cmpi eq, %arg1, %c0_i32 : i32
    %1 = arith.extui %0 : i1 to i32
    %c0_i32_0 = arith.constant 0 : i32
    %2 = arith.cmpi ne, %1, %c0_i32_0 : i32
    scf.if %2 {
      %cst_9 = arith.constant 0.000000e+00 : f32
      %15 = vector.broadcast %cst_9 : f32 to vector<256x128xf32>
      %c0_10 = arith.constant 0 : index
      %c0_11 = arith.constant 0 : index
      %16 = vector.load %arg7[%c0_10, %c0_11] : memref<256x128xf32, #tpu.memory_space<vmem>>, vector<256x128xf32>
      tpu.vector_store %arg7[%c0_10, %c0_11], %15 {strides = array<i32>} : memref<256x128xf32, #tpu.memory_space<vmem>>, vector<256x128xf32>,
    } else {
    }
    %c512_i32 = arith.constant 512 : i32
    %3 = arith.muli %arg1, %c512_i32 : i32
    %4 = tpu.assume_multiple %3, 512 : i32
    %c0 = arith.constant 0 : index
    %c0_1 = arith.constant 0 : index
    %5 = vector.load %arg7[%c0, %c0_1] : memref<256x128xf32, #tpu.memory_space<vmem>>, vector<256x128xf32>
    %c0_2 = arith.constant 0 : index
    %c0_3 = arith.constant 0 : index
    %6 = vector.load %arg2[%c0_2, %c0_3] : memref<256x512xbf16, #tpu.memory_space<vmem>>, vector<256x512xbf16>
    %7 = arith.index_cast %4 : i32 to index
    %c0_4 = arith.constant 0 : index
    %8 = vector.load %arg3[%7, %c0_4] : memref<512x128xbf16, #tpu.memory_space<vmem>>, vector<512x128xbf16>
    %cst = arith.constant dense<0.000000e+00> : vector<256x128xf32>
    %9 = tpu.matmul %6, %8, %cst {dimension_numbers = #tpu.dot_dimension_numbers<[1], [0], [0], [1], [0, 0, 1, 1], [], []>} : vector<256x512xbf16>, vector<512x128xbf16>, vector<256x128xf32> -> vector<256x128xf32>
    %10 = arith.addf %5, %9 : vector<256x128xf32>
    %c0_5 = arith.constant 0 : index
    %c0_6 = arith.constant 0 : index
    %11 = vector.load %arg7[%c0_5, %c0_6] : memref<256x128xf32, #tpu.memory_space<vmem>>, vector<256x128xf32>
    tpu.vector_store %arg7[%c0_5, %c0_6], %10 {strides = array<i32>} : memref<256x128xf32, #tpu.memory_space<vmem>>, vector<256x128xf32>,
    %c0_i32_7 = arith.constant 0 : i32
    %12 = arith.cmpi eq, %arg1, %c0_i32_7 : i32
    %13 = arith.extui %12 : i1 to i32
    %c0_i32_8 = arith.constant 0 : i32
    %14 = arith.cmpi ne, %13, %c0_i32_8 : i32
    scf.if %14 {
      %c0_9 = arith.constant 0 : index
      %c0_10 = arith.constant 0 : index
      %15 = vector.load %arg7[%c0_9, %c0_10] : memref<256x128xf32, #tpu.memory_space<vmem>>, vector<256x128xf32>
      %c0_11 = arith.constant 0 : index
      %c0_12 = arith.constant 0 : index
      %16 = vector.load %arg4[%c0_11, %c0_12] : memref<1x128xf32, #tpu.memory_space<vmem>>, vector<1x128xf32>
      %17 = vector.broadcast %16 : vector<1x128xf32> to vector<256x128xf32>
      %18 = arith.addf %15, %17 : vector<256x128xf32>
      %cst_13 = arith.constant 0.000000e+00 : f32
      %19 = vector.broadcast %cst_13 : f32 to vector<256x128xf32>
      %20 = arith.maximumf %18, %19 : vector<256x128xf32>
      %21 = arith.truncf %20 : vector<256x128xf32> to vector<256x128xbf16>
      %c0_14 = arith.constant 0 : index
      %c0_15 = arith.constant 0 : index
      %22 = vector.load %arg5[%c0_14, %c0_15] : memref<128x128xbf16, #tpu.memory_space<vmem>>, vector<128x128xbf16>
      %cst_16 = arith.constant dense<0.000000e+00> : vector<256x128xf32>
      %23 = tpu.matmul %21, %22, %cst_16 {dimension_numbers = #tpu.dot_dimension_numbers<[1], [0], [0], [1], [0, 0, 1, 1], [], []>} : vector<256x128xbf16>, vector<128x128xbf16>, vector<256x128xf32> -> vector<256x128xf32>
      %24 = arith.truncf %23 : vector<256x128xf32> to vector<256x128xbf16>
      %c0_17 = arith.constant 0 : index
      %c0_18 = arith.constant 0 : index
      %25 = vector.load %arg6[%c0_17, %c0_18] : memref<256x128xbf16, #tpu.memory_space<vmem>>, vector<256x128xbf16>
      tpu.vector_store %arg6[%c0_17, %c0_18], %24 {strides = array<i32>} : memref<256x128xbf16, #tpu.memory_space<vmem>>, vector<256x128xbf16>,
    } else {
    }
    return
  }
  func.func @transform_0(%arg0: i32, %arg1: i32) -> (i32, i32) {
    %c0_i32 = arith.constant 0 : i32
    return %arg0, %arg1 : i32, i32
  }
  func.func @transform_1(%arg0: i32, %arg1: i32) -> (i32, i32) {
    %c0_i32 = arith.constant 0 : i32
    %c0_i32_0 = arith.constant 0 : i32
    %c0_i32_1 = arith.constant 0 : i32
    return %c0_i32, %c0_i32_0 : i32, i32
  }
  func.func @transform_2(%arg0: i32, %arg1: i32) -> (i32, i32) {
    %c0_i32 = arith.constant 0 : i32
    %c0_i32_0 = arith.constant 0 : i32
    %c0_i32_1 = arith.constant 0 : i32
    return %c0_i32, %c0_i32_0 : i32, i32
  }
  func.func @transform_3(%arg0: i32, %arg1: i32) -> (i32, i32) {
    %c0_i32 = arith.constant 0 : i32
    %c0_i32_0 = arith.constant 0 : i32
    %c0_i32_1 = arith.constant 0 : i32
    return %c0_i32, %c0_i32_0 : i32, i32
  }
  func.func @transform_4(%arg0: i32, %arg1: i32) -> (i32, i32) {
    %c0_i32 = arith.constant 0 : i32
    %c0_i32_0 = arith.constant 0 : i32
    return %arg0, %c0_i32 : i32, i32
  }
}

module attributes {stable_mosaic.version = 11 : i64} {
  func.func @kernel(%arg0: i32, %arg1: i32, %arg2: memref<256x512xbf16, #tpu.memory_space<vmem>>, %arg3: memref<512x128xbf16, #tpu.memory_space<vmem>>, %arg4: memref<1x128xf32, #tpu.memory_space<vmem>>, %arg5: memref<256x128xf32, #tpu.memory_space<vmem>>, %arg6: memref<256x128xf32, #tpu.memory_space<vmem>>) attributes {dimension_semantics = [#tpu.dimension_semantics<parallel>, #tpu.dimension_semantics<arbitrary>], iteration_bounds = array<i64: 1, 1>, scalar_prefetch = 0 : i64, scratch_operands = 1 : i64, tpu.core_type = #tpu.core_type<tc>, window_params = [{transform_indices = @transform_0, window_bounds = array<i64: 256, 512>}, {pipeline_mode = #tpu.pipeline_mode<synchronous>, transform_indices = @transform_1, window_bounds = array<i64: 512, 128>}, {pipeline_mode = #tpu.pipeline_mode<synchronous>, transform_indices = @transform_2, window_bounds = array<i64: 1, 128>}, {transform_indices = @transform_3, window_bounds = array<i64: 256, 128>}]} {
    %c0_i32 = arith.constant 0 : i32
    %0 = arith.cmpi eq, %arg1, %c0_i32 : i32
    %1 = arith.extui %0 : i1 to i32
    %c0_i32_0 = arith.constant 0 : i32
    %2 = arith.cmpi ne, %1, %c0_i32_0 : i32
    scf.if %2 {
      %cst_9 = arith.constant 0.000000e+00 : f32
      %15 = vector.broadcast %cst_9 : f32 to vector<256x128xf32>
      %c0_10 = arith.constant 0 : index
      %c0_11 = arith.constant 0 : index
      %16 = vector.load %arg6[%c0_10, %c0_11] : memref<256x128xf32, #tpu.memory_space<vmem>>, vector<256x128xf32>
      tpu.vector_store %arg6[%c0_10, %c0_11], %15 {strides = array<i32>} : memref<256x128xf32, #tpu.memory_space<vmem>>, vector<256x128xf32>,
    } else {
    }
    %c512_i32 = arith.constant 512 : i32
    %3 = arith.muli %arg1, %c512_i32 : i32
    %4 = tpu.assume_multiple %3, 512 : i32
    %c0 = arith.constant 0 : index
    %c0_1 = arith.constant 0 : index
    %5 = vector.load %arg6[%c0, %c0_1] : memref<256x128xf32, #tpu.memory_space<vmem>>, vector<256x128xf32>
    %c0_2 = arith.constant 0 : index
    %c0_3 = arith.constant 0 : index
    %6 = vector.load %arg2[%c0_2, %c0_3] : memref<256x512xbf16, #tpu.memory_space<vmem>>, vector<256x512xbf16>
    %7 = arith.index_cast %4 : i32 to index
    %c0_4 = arith.constant 0 : index
    %8 = vector.load %arg3[%7, %c0_4] : memref<512x128xbf16, #tpu.memory_space<vmem>>, vector<512x128xbf16>
    %cst = arith.constant dense<0.000000e+00> : vector<256x128xf32>
    %9 = tpu.matmul %6, %8, %cst {dimension_numbers = #tpu.dot_dimension_numbers<[1], [0], [0], [1], [0, 0, 1, 1], [], []>} : vector<256x512xbf16>, vector<512x128xbf16>, vector<256x128xf32> -> vector<256x128xf32>
    %10 = arith.addf %5, %9 : vector<256x128xf32>
    %c0_5 = arith.constant 0 : index
    %c0_6 = arith.constant 0 : index
    %11 = vector.load %arg6[%c0_5, %c0_6] : memref<256x128xf32, #tpu.memory_space<vmem>>, vector<256x128xf32>
    tpu.vector_store %arg6[%c0_5, %c0_6], %10 {strides = array<i32>} : memref<256x128xf32, #tpu.memory_space<vmem>>, vector<256x128xf32>,
    %c0_i32_7 = arith.constant 0 : i32
    %12 = arith.cmpi eq, %arg1, %c0_i32_7 : i32
    %13 = arith.extui %12 : i1 to i32
    %c0_i32_8 = arith.constant 0 : i32
    %14 = arith.cmpi ne, %13, %c0_i32_8 : i32
    scf.if %14 {
      %c0_9 = arith.constant 0 : index
      %c0_10 = arith.constant 0 : index
      %15 = vector.load %arg6[%c0_9, %c0_10] : memref<256x128xf32, #tpu.memory_space<vmem>>, vector<256x128xf32>
      %c0_11 = arith.constant 0 : index
      %c0_12 = arith.constant 0 : index
      %16 = vector.load %arg4[%c0_11, %c0_12] : memref<1x128xf32, #tpu.memory_space<vmem>>, vector<1x128xf32>
      %17 = vector.broadcast %16 : vector<1x128xf32> to vector<256x128xf32>
      %18 = arith.addf %15, %17 : vector<256x128xf32>
      %19 = tpu.iota {dimensions = array<i32: 1>} : vector<256x128xi32>
      %c8_i32 = arith.constant 8 : i32
      %20 = vector.broadcast %c8_i32 : i32 to vector<256x128xi32>
      %21 = arith.cmpi slt, %19, %20 : vector<256x128xi32>
      %cst_13 = arith.constant -1.000000e+30 : f32
      %22 = vector.broadcast %cst_13 : f32 to vector<256x128xf32>
      %23 = arith.select %21, %18, %22 : vector<256x128xi1>, vector<256x128xf32>
      %cst_14 = arith.constant dense<0xFF800000> : vector<256xf32>
      %24 = vector.multi_reduction <maximumf>, %23, %cst_14 [1] : vector<256x128xf32> to vector<256xf32>
      %25 = vector.shape_cast %24 : vector<256xf32> to vector<256x1xf32>
      %26 = vector.broadcast %25 : vector<256x1xf32> to vector<256x128xf32>
      %27 = arith.subf %23, %26 : vector<256x128xf32>
      %28 = math.exp %27 : vector<256x128xf32>
      %cst_15 = arith.constant dense<0.000000e+00> : vector<256xf32>
      %29 = vector.multi_reduction <add>, %28, %cst_15 [1] : vector<256x128xf32> to vector<256xf32>
      %30 = vector.shape_cast %29 : vector<256xf32> to vector<256x1xf32>
      %31 = math.log %30 : vector<256x1xf32>
      %32 = vector.broadcast %31 : vector<256x1xf32> to vector<256x128xf32>
      %33 = arith.subf %27, %32 : vector<256x128xf32>
      %c0_16 = arith.constant 0 : index
      %c0_17 = arith.constant 0 : index
      %34 = vector.load %arg5[%c0_16, %c0_17] : memref<256x128xf32, #tpu.memory_space<vmem>>, vector<256x128xf32>
      tpu.vector_store %arg5[%c0_16, %c0_17], %33 {strides = array<i32>} : memref<256x128xf32, #tpu.memory_space<vmem>>, vector<256x128xf32>,
    } else {
    }
    return
  }
  func.func @transform_0(%arg0: i32, %arg1: i32) -> (i32, i32) {
    %c0_i32 = arith.constant 0 : i32
    return %arg0, %arg1 : i32, i32
  }
  func.func @transform_1(%arg0: i32, %arg1: i32) -> (i32, i32) {
    %c0_i32 = arith.constant 0 : i32
    %c0_i32_0 = arith.constant 0 : i32
    %c0_i32_1 = arith.constant 0 : i32
    return %c0_i32, %c0_i32_0 : i32, i32
  }
  func.func @transform_2(%arg0: i32, %arg1: i32) -> (i32, i32) {
    %c0_i32 = arith.constant 0 : i32
    %c0_i32_0 = arith.constant 0 : i32
    %c0_i32_1 = arith.constant 0 : i32
    return %c0_i32, %c0_i32_0 : i32, i32
  }
  func.func @transform_3(%arg0: i32, %arg1: i32) -> (i32, i32) {
    %c0_i32 = arith.constant 0 : i32
    %c0_i32_0 = arith.constant 0 : i32
    return %arg0, %c0_i32 : i32, i32
  }
}

</mosaic_0001>

<bundles_post_ra>
// kernel: gcn_forward.3
= control target key start
LH: loop header
LB: loop body
LE: loop exit
PB: predicated region body
PF: predicated region fallthrough
CT: control target
= control target key end

     0   :  { %v1681_v0 = vmov 0   ;;  %s2065_s1 = inlined_call_operand.vmem [shape: bf16[256,128], index: 1, kind: input, shape index: {}]   ;;  %s2066_s0 = inlined_call_operand.vmem [shape: bf16[512,256], index: 0, kind: input, shape index: {}]   ;;  %s2067_s2 = inlined_call_operand.vmem [shape: bf16[512,128], index: 2, kind: output, shape index: {}]  }
   0x1   :  { %524 = vmatprep.subr.bf16.mxu0 %v1681_v0  ;;  %1536 = vmatprep.subr.bf16.mxu1 %v1681_v0  ;;  %v1569_v1 = vld [vmem:[%s2065_s1] sm:$0xff]   ;;  %v1570_v2 = vld [vmem:[%s2065_s1 + $0x8] sm:$0xff]   ;;  %v1571_v3 = vld [vmem:[%s2065_s1 + $0x10] sm:$0xff]  }
   0x2   :  { %525 = vmatpush1.bf16.msra.mxu0 %v1569_v1  ;;  %1552 = vmatpush1.bf16.msra.mxu1 %v1569_v1  ;;  %v1572_v4 = vld [vmem:[%s2065_s1 + $0x18] sm:$0xff]   ;;  %v1573_v5 = vld [vmem:[%s2065_s1 + $0x20] sm:$0xff]   ;;  %v1574_v7 = vld [vmem:[%s2065_s1 + $0x28] sm:$0xff]  }
   0x3   :  { %526 = vmatprep.subr.bf16.mxu0 %v1681_v0  ;;  %1537 = vmatprep.subr.bf16.mxu1 %v1681_v0  ;;  %v1587_v6 = vld [vmem:[%s2066_s0 + $0x4] ss:$8 sps:$4 sm:$0xff]   ;;  %v1575_v9 = vld [vmem:[%s2065_s1 + $0x30] sm:$0xff]   ;;  %v1576_v10 = vld [vmem:[%s2065_s1 + $0x38] sm:$0xff]  }
   0x4   :  { %v1590_v8 = vld [vmem:[%s2066_s0 + $0x104] ss:$8 sps:$4 sm:$0xff]   ;;  %556 = vmatprep.mubr.bf16.mxu0 %v1587_v6  ;;  %v1579_v13 = vld [vmem:[%s2065_s1 + $0x50] sm:$0xff]   ;;  %v1580_v14 = vld [vmem:[%s2065_s1 + $0x58] sm:$0xff]  }
   0x5   :  { %684 = vmatprep.mubr.bf16.mxu1 %v1590_v8  ;;  %v1577_v11 = vld [vmem:[%s2065_s1 + $0x40] sm:$0xff]   ;;  %v1578_v12 = vld [vmem:[%s2065_s1 + $0x48] sm:$0xff]   ;;  %v1583_v17 = vld [vmem:[%s2065_s1 + $0x70] sm:$0xff]  }
   0x6   :  { %527 = vmatpush1.bf16.msra.mxu0 %v1570_v2  ;;  %1553 = vmatpush1.bf16.msra.mxu1 %v1570_v2  ;;  %v1581_v15 = vld [vmem:[%s2065_s1 + $0x60] sm:$0xff]   ;;  %v1582_v16 = vld [vmem:[%s2065_s1 + $0x68] sm:$0xff]   ;;  %v1584_v18 = vld [vmem:[%s2065_s1 + $0x78] sm:$0xff]  }
   0x7   :  { %528 = vmatprep.subr.bf16.mxu0 %v1681_v0  ;;  %1538 = vmatprep.subr.bf16.mxu1 %v1681_v0  ;;  %v1585_v19 = vld [vmem:[%s2066_s0] ss:$8 sps:$4 sm:$0xff]   ;;  %v1591_v21 = vld [vmem:[%s2066_s0 + $0x14] ss:$8 sps:$4 sm:$0xff]   ;;  %v1595_v23 = vld [vmem:[%s2066_s0 + $0x10] ss:$8 sps:$4 sm:$0xff]  }
   0x8   :  { %v1588_v20 = vld [vmem:[%s2066_s0 + $0x100] ss:$8 sps:$4 sm:$0xff]   ;;  %v1593_v22 = vld [vmem:[%s2066_s0 + $0x114] ss:$8 sps:$4 sm:$0xff]   ;;  %v1596_v24 = vld [vmem:[%s2066_s0 + $0x110] ss:$8 sps:$4 sm:$0xff]  }
   0x9   :  { %v1597_v25 = vld [vmem:[%s2066_s0 + $0x24] ss:$8 sps:$4 sm:$0xff]   ;;  %v1601_v27 = vld [vmem:[%s2066_s0 + $0x20] ss:$8 sps:$4 sm:$0xff]   ;;  %v1603_v29 = vld [vmem:[%s2066_s0 + $0x34] ss:$8 sps:$4 sm:$0xff]  }
   0xa   :  { %529 = vmatpush1.bf16.msra.mxu0 %v1571_v3  ;;  %1554 = vmatpush1.bf16.msra.mxu1 %v1571_v3  ;;  %v1599_v26 = vld [vmem:[%s2066_s0 + $0x124] ss:$8 sps:$4 sm:$0xff]   ;;  %v1602_v28 = vld [vmem:[%s2066_s0 + $0x120] ss:$8 sps:$4 sm:$0xff]   ;;  %v1605_v30 = vld [vmem:[%s2066_s0 + $0x134] ss:$8 sps:$4 sm:$0xff]  }
   0xb   :  { %530 = vmatprep.subr.bf16.mxu0 %v1681_v0  ;;  %1539 = vmatprep.subr.bf16.mxu1 %v1681_v0  ;;  %v1607_v31 = vld [vmem:[%s2066_s0 + $0x30] ss:$8 sps:$4 sm:$0xff]   ;;  %v1609_v33 = vld [vmem:[%s2066_s0 + $0x44] ss:$8 sps:$4 sm:$0xff]   ;;  %v1613_v35 = vld [vmem:[%s2066_s0 + $0x40] ss:$8 sps:$4 sm:$0xff]  }
   0xc   :  { %v1608_v32 = vld [vmem:[%s2066_s0 + $0x130] ss:$8 sps:$4 sm:$0xff]   ;;  %v1611_v34 = vld [vmem:[%s2066_s0 + $0x144] ss:$8 sps:$4 sm:$0xff]   ;;  %v1614_v36 = vld [vmem:[%s2066_s0 + $0x140] ss:$8 sps:$4 sm:$0xff]  }
   0xd   :  { %v1615_v37 = vld [vmem:[%s2066_s0 + $0x54] ss:$8 sps:$4 sm:$0xff]   ;;  %v1619_v39 = vld [vmem:[%s2066_s0 + $0x50] ss:$8 sps:$4 sm:$0xff]   ;;  %v1621_v41 = vld [vmem:[%s2066_s0 + $0x64] ss:$8 sps:$4 sm:$0xff]  }
   0xe   :  { %531 = vmatpush1.bf16.msra.mxu0 %v1572_v4  ;;  %1555 = vmatpush1.bf16.msra.mxu1 %v1572_v4  ;;  %v1617_v38 = vld [vmem:[%s2066_s0 + $0x154] ss:$8 sps:$4 sm:$0xff]   ;;  %v1620_v40 = vld [vmem:[%s2066_s0 + $0x150] ss:$8 sps:$4 sm:$0xff]   ;;  %v1623_v42 = vld [vmem:[%s2066_s0 + $0x164] ss:$8 sps:$4 sm:$0xff]  }
   0xf   :  { %532 = vmatprep.subr.bf16.mxu0 %v1681_v0  ;;  %1540 = vmatprep.subr.bf16.mxu1 %v1681_v0  ;;  %v1625_v43 = vld [vmem:[%s2066_s0 + $0x60] ss:$8 sps:$4 sm:$0xff]   ;;  %v1627_v45 = vld [vmem:[%s2066_s0 + $0x74] ss:$8 sps:$4 sm:$0xff]   ;;  %v1631_v47 = vld [vmem:[%s2066_s0 + $0x70] ss:$8 sps:$4 sm:$0xff]  }
  0x10   :  { %v1626_v44 = vld [vmem:[%s2066_s0 + $0x160] ss:$8 sps:$4 sm:$0xff]   ;;  %v1629_v46 = vld [vmem:[%s2066_s0 + $0x174] ss:$8 sps:$4 sm:$0xff]   ;;  %v1632_v48 = vld [vmem:[%s2066_s0 + $0x170] ss:$8 sps:$4 sm:$0xff]  }
  0x11   :  { %v1633_v49 = vld [vmem:[%s2066_s0 + $0x84] ss:$8 sps:$4 sm:$0xff]   ;;  %v1637_v51 = vld [vmem:[%s2066_s0 + $0x80] ss:$8 sps:$4 sm:$0xff]   ;;  %v1639_v53 = vld [vmem:[%s2066_s0 + $0x94] ss:$8 sps:$4 sm:$0xff]  }
  0x12   :  { %533 = vmatpush1.bf16.msra.mxu0 %v1573_v5  ;;  %1556 = vmatpush1.bf16.msra.mxu1 %v1573_v5  ;;  %v1635_v50 = vld [vmem:[%s2066_s0 + $0x184] ss:$8 sps:$4 sm:$0xff]   ;;  %v1638_v52 = vld [vmem:[%s2066_s0 + $0x180] ss:$8 sps:$4 sm:$0xff]   ;;  %v1641_v54 = vld [vmem:[%s2066_s0 + $0x194] ss:$8 sps:$4 sm:$0xff]  }
  0x13   :  { %534 = vmatprep.subr.bf16.mxu0 %v1681_v0  ;;  %1541 = vmatprep.subr.bf16.mxu1 %v1681_v0  ;;  %v1643_v55 = vld [vmem:[%s2066_s0 + $0x90] ss:$8 sps:$4 sm:$0xff]   ;;  %v1645_v57 = vld [vmem:[%s2066_s0 + $0xa4] ss:$8 sps:$4 sm:$0xff]   ;;  %v1649_v59 = vld [vmem:[%s2066_s0 + $0xa0] ss:$8 sps:$4 sm:$0xff]  }
  0x14   :  { %v1644_v56 = vld [vmem:[%s2066_s0 + $0x190] ss:$8 sps:$4 sm:$0xff]   ;;  %v1647_v58 = vld [vmem:[%s2066_s0 + $0x1a4] ss:$8 sps:$4 sm:$0xff]   ;;  %v1650_v60 = vld [vmem:[%s2066_s0 + $0x1a0] ss:$8 sps:$4 sm:$0xff]  }
  0x15   :  { %v1651_v61 = vld [vmem:[%s2066_s0 + $0xb4] ss:$8 sps:$4 sm:$0xff]   ;;  %v1655_v63 = vld [vmem:[%s2066_s0 + $0xb0] ss:$8 sps:$4 sm:$0xff]   ;;  %v1657_v1 = vld [vmem:[%s2066_s0 + $0xc4] ss:$8 sps:$4 sm:$0xff]  }
  0x16   :  { %535 = vmatpush1.bf16.msra.mxu0 %v1574_v7  ;;  %1557 = vmatpush1.bf16.msra.mxu1 %v1574_v7  ;;  %v1653_v62 = vld [vmem:[%s2066_s0 + $0x1b4] ss:$8 sps:$4 sm:$0xff]   ;;  %v1659_v2 = vld [vmem:[%s2066_s0 + $0x1c4] ss:$8 sps:$4 sm:$0xff]   ;;  %v1661_v3 = vld [vmem:[%s2066_s0 + $0xc0] ss:$8 sps:$4 sm:$0xff]  }
  0x17   :  { %536 = vmatprep.subr.bf16.mxu0 %v1681_v0  ;;  %1542 = vmatprep.subr.bf16.mxu1 %v1681_v0  ;;  %v1662_v4 = vld [vmem:[%s2066_s0 + $0x1c0] ss:$8 sps:$4 sm:$0xff]   ;;  %v1663_v5 = vld [vmem:[%s2066_s0 + $0xd4] ss:$8 sps:$4 sm:$0xff]   ;;  %v1667_v7 = vld [vmem:[%s2066_s0 + $0xd0] ss:$8 sps:$4 sm:$0xff]  }
  0x18   :  { %v1665_v6 = vld [vmem:[%s2066_s0 + $0x1d4] ss:$8 sps:$4 sm:$0xff]   ;;  %v1668_v8 = vld [vmem:[%s2066_s0 + $0x1d0] ss:$8 sps:$4 sm:$0xff]  }
  0x1a   :  { %537 = vmatpush1.bf16.msra.mxu0 %v1575_v9  ;;  %1558 = vmatpush1.bf16.msra.mxu1 %v1575_v9  ;;  %v1669_v9 = vld [vmem:[%s2066_s0 + $0xe4] ss:$8 sps:$4 sm:$0xff]  }
  0x1b   :  { %538 = vmatprep.subr.bf16.mxu0 %v1681_v0  ;;  %1543 = vmatprep.subr.bf16.mxu1 %v1681_v0 }
  0x1e   :  { %539 = vmatpush1.bf16.msra.mxu0 %v1576_v10  ;;  %1559 = vmatpush1.bf16.msra.mxu1 %v1576_v10  ;;  %v1671_v10 = vld [vmem:[%s2066_s0 + $0x1e4] ss:$8 sps:$4 sm:$0xff]  }
  0x1f   :  { %540 = vmatprep.subr.bf16.mxu0 %v1681_v0  ;;  %1544 = vmatprep.subr.bf16.mxu1 %v1681_v0 }
  0x22   :  { %541 = vmatpush1.bf16.msra.mxu0 %v1577_v11  ;;  %1560 = vmatpush1.bf16.msra.mxu1 %v1577_v11  ;;  %v1673_v11 = vld [vmem:[%s2066_s0 + $0xe0] ss:$8 sps:$4 sm:$0xff]  }
  0x23   :  { %542 = vmatprep.subr.bf16.mxu0 %v1681_v0  ;;  %1545 = vmatprep.subr.bf16.mxu1 %v1681_v0 }
  0x26   :  { %543 = vmatpush1.bf16.msra.mxu0 %v1578_v12  ;;  %1561 = vmatpush1.bf16.msra.mxu1 %v1578_v12  ;;  %v1674_v12 = vld [vmem:[%s2066_s0 + $0x1e0] ss:$8 sps:$4 sm:$0xff]  }
  0x27   :  { %544 = vmatprep.subr.bf16.mxu0 %v1681_v0  ;;  %1546 = vmatprep.subr.bf16.mxu1 %v1681_v0 }
  0x2a   :  { %545 = vmatpush1.bf16.msra.mxu0 %v1579_v13  ;;  %1562 = vmatpush1.bf16.msra.mxu1 %v1579_v13  ;;  %v1675_v13 = vld [vmem:[%s2066_s0 + $0xf4] ss:$8 sps:$4 sm:$0xff]  }
  0x2b   :  { %546 = vmatprep.subr.bf16.mxu0 %v1681_v0  ;;  %1547 = vmatprep.subr.bf16.mxu1 %v1681_v0 }
  0x2e   :  { %547 = vmatpush1.bf16.msra.mxu0 %v1580_v14  ;;  %1563 = vmatpush1.bf16.msra.mxu1 %v1580_v14  ;;  %v1677_v14 = vld [vmem:[%s2066_s0 + $0x1f4] ss:$8 sps:$4 sm:$0xff]  }
  0x2f   :  { %548 = vmatprep.subr.bf16.mxu0 %v1681_v0  ;;  %1548 = vmatprep.subr.bf16.mxu1 %v1681_v0 }
  0x32   :  { %549 = vmatpush1.bf16.msra.mxu0 %v1581_v15  ;;  %1564 = vmatpush1.bf16.msra.mxu1 %v1581_v15  ;;  %v1679_v15 = vld [vmem:[%s2066_s0 + $0xf0] ss:$8 sps:$4 sm:$0xff]  }
  0x33   :  { %550 = vmatprep.subr.bf16.mxu0 %v1681_v0  ;;  %1549 = vmatprep.subr.bf16.mxu1 %v1681_v0 }
  0x36   :  { %551 = vmatpush1.bf16.msra.mxu0 %v1582_v16  ;;  %1565 = vmatpush1.bf16.msra.mxu1 %v1582_v16  ;;  %v1680_v16 = vld [vmem:[%s2066_s0 + $0x1f0] ss:$8 sps:$4 sm:$0xff]  }
  0x37   :  { %552 = vmatprep.subr.bf16.mxu0 %v1681_v0  ;;  %1550 = vmatprep.subr.bf16.mxu1 %v1681_v0 }
  0x3a   :  { %553 = vmatpush1.bf16.msra.mxu0 %v1583_v17  ;;  %1566 = vmatpush1.bf16.msra.mxu1 %v1583_v17 }
  0x3b   :  { %554 = vmatprep.subr.bf16.mxu0 %v1681_v0  ;;  %1551 = vmatprep.subr.bf16.mxu1 %v1681_v0  ;;  %v1656_v0 = vld [vmem:[%s2066_s0 + $0x1b0] ss:$8 sps:$4 sm:$0xff]  }
  0x3e   :  { %555 = vmatpush1.bf16.msra.mxu0 %v1584_v18  ;;  %1567 = vmatpush1.bf16.msra.mxu1 %v1584_v18 }
  0x41   :  { %557 = vmatmul.mubr.bf16.vlgmr.msra.gmra.mrb[0].mxu0 %v1585_v19  ;;  %685 = vmatmul.mubr.bf16.vlgmr.msra.gmra.mrb[0].mxu1 %v1588_v20 }
  0x42   :  { %564 = vmatprep.mubr.bf16.mxu0 %v1591_v21  ;;  %692 = vmatprep.mubr.bf16.mxu1 %v1593_v22 }
  0x49   :  { %565 = vmatmul.mubr.bf16.gmra.mrb[4].mxu0 %v1595_v23  ;;  %693 = vmatmul.mubr.bf16.gmra.mrb[4].mxu1 %v1596_v24 }
  0x4a   :  { %572 = vmatprep.mubr.bf16.mxu0 %v1597_v25  ;;  %700 = vmatprep.mubr.bf16.mxu1 %v1599_v26 }
  0x51   :  { %573 = vmatmul.mubr.bf16.gmra.mrb[8].mxu0 %v1601_v27  ;;  %701 = vmatmul.mubr.bf16.gmra.mrb[8].mxu1 %v1602_v28 }
  0x52   :  { %580 = vmatprep.mubr.bf16.mxu0 %v1603_v29  ;;  %708 = vmatprep.mubr.bf16.mxu1 %v1605_v30 }
  0x59   :  { %581 = vmatmul.mubr.bf16.gmra.mrb[12].mxu0 %v1607_v31  ;;  %709 = vmatmul.mubr.bf16.gmra.mrb[12].mxu1 %v1608_v32 }
  0x5a   :  { %588 = vmatprep.mubr.bf16.mxu0 %v1609_v33  ;;  %716 = vmatprep.mubr.bf16.mxu1 %v1611_v34 }
  0x61   :  { %589 = vmatmul.mubr.bf16.gmra.mrb[16].mxu0 %v1613_v35  ;;  %717 = vmatmul.mubr.bf16.gmra.mrb[16].mxu1 %v1614_v36 }
  0x62   :  { %596 = vmatprep.mubr.bf16.mxu0 %v1615_v37  ;;  %724 = vmatprep.mubr.bf16.mxu1 %v1617_v38 }
  0x69   :  { %597 = vmatmul.mubr.bf16.gmra.mrb[20].mxu0 %v1619_v39  ;;  %725 = vmatmul.mubr.bf16.gmra.mrb[20].mxu1 %v1620_v40 }
  0x6a   :  { %604 = vmatprep.mubr.bf16.mxu0 %v1621_v41  ;;  %732 = vmatprep.mubr.bf16.mxu1 %v1623_v42 }
  0x71   :  { %605 = vmatmul.mubr.bf16.gmra.mrb[24].mxu0 %v1625_v43  ;;  %733 = vmatmul.mubr.bf16.gmra.mrb[24].mxu1 %v1626_v44 }
  0x72   :  { %612 = vmatprep.mubr.bf16.mxu0 %v1627_v45  ;;  %740 = vmatprep.mubr.bf16.mxu1 %v1629_v46 }
  0x79   :  { %613 = vmatmul.mubr.bf16.gmra.mrb[28].mxu0 %v1631_v47  ;;  %741 = vmatmul.mubr.bf16.gmra.mrb[28].mxu1 %v1632_v48 }
  0x7a   :  { %620 = vmatprep.mubr.bf16.mxu0 %v1633_v49  ;;  %748 = vmatprep.mubr.bf16.mxu1 %v1635_v50 }
  0x81   :  { %621 = vmatmul.mubr.bf16.gmra.mrb[32].mxu0 %v1637_v51  ;;  %749 = vmatmul.mubr.bf16.gmra.mrb[32].mxu1 %v1638_v52 }
  0x82   :  { %628 = vmatprep.mubr.bf16.mxu0 %v1639_v53  ;;  %756 = vmatprep.mubr.bf16.mxu1 %v1641_v54 }
  0x89   :  { %629 = vmatmul.mubr.bf16.gmra.mrb[36].mxu0 %v1643_v55  ;;  %757 = vmatmul.mubr.bf16.gmra.mrb[36].mxu1 %v1644_v56 }
  0x8a   :  { %636 = vmatprep.mubr.bf16.mxu0 %v1645_v57  ;;  %764 = vmatprep.mubr.bf16.mxu1 %v1647_v58 }
  0x91   :  { %637 = vmatmul.mubr.bf16.gmra.mrb[40].mxu0 %v1649_v59  ;;  %765 = vmatmul.mubr.bf16.gmra.mrb[40].mxu1 %v1650_v60 }
  0x92   :  { %644 = vmatprep.mubr.bf16.mxu0 %v1651_v61  ;;  %772 = vmatprep.mubr.bf16.mxu1 %v1653_v62 }
  0x99   :  { %645 = vmatmul.mubr.bf16.gmra.mrb[44].mxu0 %v1655_v63  ;;  %773 = vmatmul.mubr.bf16.gmra.mrb[44].mxu1 %v1656_v0 }
  0x9a   :  { %652 = vmatprep.mubr.bf16.mxu0 %v1657_v1  ;;  %780 = vmatprep.mubr.bf16.mxu1 %v1659_v2 }
  0xa1   :  { %653 = vmatmul.mubr.bf16.gmra.mrb[48].mxu0 %v1661_v3  ;;  %781 = vmatmul.mubr.bf16.gmra.mrb[48].mxu1 %v1662_v4 }
  0xa2   :  { %660 = vmatprep.mubr.bf16.mxu0 %v1663_v5  ;;  %788 = vmatprep.mubr.bf16.mxu1 %v1665_v6 }
  0xa9   :  { %661 = vmatmul.mubr.bf16.gmra.mrb[52].mxu0 %v1667_v7  ;;  %789 = vmatmul.mubr.bf16.gmra.mrb[52].mxu1 %v1668_v8 }
  0xaa   :  { %668 = vmatprep.mubr.bf16.mxu0 %v1669_v9  ;;  %796 = vmatprep.mubr.bf16.mxu1 %v1671_v10 }
  0xb1   :  { %669 = vmatmul.mubr.bf16.gmra.mrb[56].mxu0 %v1673_v11  ;;  %797 = vmatmul.mubr.bf16.gmra.mrb[56].mxu1 %v1674_v12 }
  0xb2   :  { %676 = vmatprep.mubr.bf16.mxu0 %v1675_v13  ;;  %804 = vmatprep.mubr.bf16.mxu1 %v1677_v14 }
  0xb9   :  { %677 = vmatmul.mubr.bf16.gmra.mrb[60].mxu0 %v1679_v15  ;;  %805 = vmatmul.mubr.bf16.gmra.mrb[60].mxu1 %v1680_v16 }
 0x114   :  { %v558_v17 = vpop.f32.mrb[0].mxu0  ;;  %v686_v18 = vpop.f32.mrb[0].mxu1 }
 0x115   :  { %v560_v19 = vpop.f32.mrb[1].mxu0  ;;  %v688_v20 = vpop.f32.mrb[1].mxu1 }
 0x116   :  { %v561_v21 = vpop.f32.mrb[2].mxu0  ;;  %v689_v22 = vpop.f32.mrb[2].mxu1 }
 0x117   :  { %v1348_v23 = vpack.c.bf16 %v561_v21, %v558_v17  ;;  %v1428_v24 = vpack.c.bf16 %v689_v22, %v686_v18  ;;  %v563_v25 = vpop.f32.mrb[3].mxu0  ;;  %v691_v26 = vpop.f32.mrb[3].mxu1 }
 0x119   :  { %1349 = vst [vmem:[%s2067_s2] sm:$0xff] %v1348_v23   ;;  %1520 = vst [vmem:[%s2067_s2 + $0x80] sm:$0xff] %v1428_v24  }
 0x11c   :  { %v566_v27 = vpop.f32.mrb[4].mxu0  ;;  %v694_v28 = vpop.f32.mrb[4].mxu1 }
 0x11d   :  { %v568_v29 = vpop.f32.mrb[5].mxu0  ;;  %v696_v30 = vpop.f32.mrb[5].mxu1 }
 0x11e   :  { %v569_v31 = vpop.f32.mrb[6].mxu0  ;;  %v697_v32 = vpop.f32.mrb[6].mxu1 }
 0x11f   :  { %v1353_v33 = vpack.c.bf16 %v569_v31, %v566_v27  ;;  %v1433_v34 = vpack.c.bf16 %v697_v32, %v694_v28  ;;  %v571_v35 = vpop.f32.mrb[7].mxu0  ;;  %v699_v36 = vpop.f32.mrb[7].mxu1 }
 0x121   :  { %1505 = vst [vmem:[%s2067_s2 + $0x8] sm:$0xff] %v1353_v33   ;;  %1521 = vst [vmem:[%s2067_s2 + $0x88] sm:$0xff] %v1433_v34  }
 0x124   :  { %v574_v37 = vpop.f32.mrb[8].mxu0  ;;  %v702_v38 = vpop.f32.mrb[8].mxu1 }
 0x125   :  { %v576_v39 = vpop.f32.mrb[9].mxu0  ;;  %v704_v40 = vpop.f32.mrb[9].mxu1 }
 0x126   :  { %v577_v41 = vpop.f32.mrb[10].mxu0  ;;  %v705_v42 = vpop.f32.mrb[10].mxu1 }
 0x127   :  { %v1358_v43 = vpack.c.bf16 %v577_v41, %v574_v37  ;;  %v1438_v44 = vpack.c.bf16 %v705_v42, %v702_v38  ;;  %v579_v45 = vpop.f32.mrb[11].mxu0  ;;  %v707_v46 = vpop.f32.mrb[11].mxu1 }
 0x129   :  { %1506 = vst [vmem:[%s2067_s2 + $0x10] sm:$0xff] %v1358_v43   ;;  %1522 = vst [vmem:[%s2067_s2 + $0x90] sm:$0xff] %v1438_v44  }
 0x12c   :  { %v582_v47 = vpop.f32.mrb[12].mxu0  ;;  %v710_v48 = vpop.f32.mrb[12].mxu1 }
 0x12d   :  { %v584_v49 = vpop.f32.mrb[13].mxu0  ;;  %v712_v50 = vpop.f32.mrb[13].mxu1 }
 0x12e   :  { %v585_v51 = vpop.f32.mrb[14].mxu0  ;;  %v713_v52 = vpop.f32.mrb[14].mxu1 }
 0x12f   :  { %v1363_v53 = vpack.c.bf16 %v585_v51, %v582_v47  ;;  %v1443_v54 = vpack.c.bf16 %v713_v52, %v710_v48  ;;  %v587_v55 = vpop.f32.mrb[15].mxu0  ;;  %v715_v56 = vpop.f32.mrb[15].mxu1 }
 0x131   :  { %1507 = vst [vmem:[%s2067_s2 + $0x18] sm:$0xff] %v1363_v53   ;;  %1523 = vst [vmem:[%s2067_s2 + $0x98] sm:$0xff] %v1443_v54  }
 0x134   :  { %v590_v57 = vpop.f32.mrb[16].mxu0  ;;  %v718_v58 = vpop.f32.mrb[16].mxu1 }
 0x135   :  { %v592_v59 = vpop.f32.mrb[17].mxu0  ;;  %v720_v60 = vpop.f32.mrb[17].mxu1 }
 0x136   :  { %v593_v61 = vpop.f32.mrb[18].mxu0  ;;  %v721_v62 = vpop.f32.mrb[18].mxu1 }
 0x137   :  { %v1368_v63 = vpack.c.bf16 %v593_v61, %v590_v57  ;;  %v1448_v0 = vpack.c.bf16 %v721_v62, %v718_v58  ;;  %v595_v1 = vpop.f32.mrb[19].mxu0  ;;  %v723_v2 = vpop.f32.mrb[19].mxu1 }
 0x139   :  { %1508 = vst [vmem:[%s2067_s2 + $0x20] sm:$0xff] %v1368_v63   ;;  %1524 = vst [vmem:[%s2067_s2 + $0xa0] sm:$0xff] %v1448_v0  }
 0x13c   :  { %v598_v3 = vpop.f32.mrb[20].mxu0  ;;  %v726_v4 = vpop.f32.mrb[20].mxu1 }
 0x13d   :  { %v600_v5 = vpop.f32.mrb[21].mxu0  ;;  %v728_v6 = vpop.f32.mrb[21].mxu1 }
 0x13e   :  { %v601_v7 = vpop.f32.mrb[22].mxu0  ;;  %v729_v8 = vpop.f32.mrb[22].mxu1 }
 0x13f   :  { %v1373_v9 = vpack.c.bf16 %v601_v7, %v598_v3  ;;  %v1453_v10 = vpack.c.bf16 %v729_v8, %v726_v4  ;;  %v603_v11 = vpop.f32.mrb[23].mxu0  ;;  %v731_v12 = vpop.f32.mrb[23].mxu1 }
 0x141   :  { %1509 = vst [vmem:[%s2067_s2 + $0x28] sm:$0xff] %v1373_v9   ;;  %1525 = vst [vmem:[%s2067_s2 + $0xa8] sm:$0xff] %v1453_v10  }
 0x144   :  { %v606_v13 = vpop.f32.mrb[24].mxu0  ;;  %v734_v14 = vpop.f32.mrb[24].mxu1 }
 0x145   :  { %v608_v15 = vpop.f32.mrb[25].mxu0  ;;  %v736_v16 = vpop.f32.mrb[25].mxu1 }
 0x146   :  { %v609_v17 = vpop.f32.mrb[26].mxu0  ;;  %v737_v18 = vpop.f32.mrb[26].mxu1 }
 0x147   :  { %v1378_v19 = vpack.c.bf16 %v609_v17, %v606_v13  ;;  %v1458_v20 = vpack.c.bf16 %v737_v18, %v734_v14  ;;  %v611_v21 = vpop.f32.mrb[27].mxu0  ;;  %v739_v22 = vpop.f32.mrb[27].mxu1 }
 0x149   :  { %1510 = vst [vmem:[%s2067_s2 + $0x30] sm:$0xff] %v1378_v19   ;;  %1526 = vst [vmem:[%s2067_s2 + $0xb0] sm:$0xff] %v1458_v20  }
 0x14c   :  { %v614_v23 = vpop.f32.mrb[28].mxu0  ;;  %v742_v24 = vpop.f32.mrb[28].mxu1 }
 0x14d   :  { %v616_v25 = vpop.f32.mrb[29].mxu0  ;;  %v744_v26 = vpop.f32.mrb[29].mxu1 }
 0x14e   :  { %v617_v27 = vpop.f32.mrb[30].mxu0  ;;  %v745_v28 = vpop.f32.mrb[30].mxu1 }
 0x14f   :  { %v1383_v29 = vpack.c.bf16 %v617_v27, %v614_v23  ;;  %v1463_v30 = vpack.c.bf16 %v745_v28, %v742_v24  ;;  %v619_v31 = vpop.f32.mrb[31].mxu0  ;;  %v747_v32 = vpop.f32.mrb[31].mxu1 }
 0x151   :  { %1511 = vst [vmem:[%s2067_s2 + $0x38] sm:$0xff] %v1383_v29   ;;  %1527 = vst [vmem:[%s2067_s2 + $0xb8] sm:$0xff] %v1463_v30  }
 0x154   :  { %v622_v33 = vpop.f32.mrb[32].mxu0  ;;  %v750_v34 = vpop.f32.mrb[32].mxu1 }
 0x155   :  { %v624_v35 = vpop.f32.mrb[33].mxu0  ;;  %v752_v36 = vpop.f32.mrb[33].mxu1 }
 0x156   :  { %v625_v37 = vpop.f32.mrb[34].mxu0  ;;  %v753_v38 = vpop.f32.mrb[34].mxu1 }
 0x157   :  { %v1388_v39 = vpack.c.bf16 %v625_v37, %v622_v33  ;;  %v1468_v40 = vpack.c.bf16 %v753_v38, %v750_v34  ;;  %v627_v41 = vpop.f32.mrb[35].mxu0  ;;  %v755_v42 = vpop.f32.mrb[35].mxu1 }
 0x159   :  { %1512 = vst [vmem:[%s2067_s2 + $0x40] sm:$0xff] %v1388_v39   ;;  %1528 = vst [vmem:[%s2067_s2 + $0xc0] sm:$0xff] %v1468_v40  }
 0x15c   :  { %v630_v43 = vpop.f32.mrb[36].mxu0  ;;  %v758_v44 = vpop.f32.mrb[36].mxu1 }
 0x15d   :  { %v632_v45 = vpop.f32.mrb[37].mxu0  ;;  %v760_v46 = vpop.f32.mrb[37].mxu1 }
 0x15e   :  { %v633_v47 = vpop.f32.mrb[38].mxu0  ;;  %v761_v48 = vpop.f32.mrb[38].mxu1 }
 0x15f   :  { %v1393_v49 = vpack.c.bf16 %v633_v47, %v630_v43  ;;  %v1473_v50 = vpack.c.bf16 %v761_v48, %v758_v44  ;;  %v635_v51 = vpop.f32.mrb[39].mxu0  ;;  %v763_v52 = vpop.f32.mrb[39].mxu1 }
 0x161   :  { %1513 = vst [vmem:[%s2067_s2 + $0x48] sm:$0xff] %v1393_v49   ;;  %1529 = vst [vmem:[%s2067_s2 + $0xc8] sm:$0xff] %v1473_v50  }
 0x164   :  { %v638_v53 = vpop.f32.mrb[40].mxu0  ;;  %v766_v54 = vpop.f32.mrb[40].mxu1 }
 0x165   :  { %v640_v55 = vpop.f32.mrb[41].mxu0  ;;  %v768_v56 = vpop.f32.mrb[41].mxu1 }
 0x166   :  { %v641_v57 = vpop.f32.mrb[42].mxu0  ;;  %v769_v58 = vpop.f32.mrb[42].mxu1 }
 0x167   :  { %v1398_v59 = vpack.c.bf16 %v641_v57, %v638_v53  ;;  %v1478_v60 = vpack.c.bf16 %v769_v58, %v766_v54  ;;  %v643_v61 = vpop.f32.mrb[43].mxu0  ;;  %v771_v62 = vpop.f32.mrb[43].mxu1 }
 0x169   :  { %1514 = vst [vmem:[%s2067_s2 + $0x50] sm:$0xff] %v1398_v59   ;;  %1530 = vst [vmem:[%s2067_s2 + $0xd0] sm:$0xff] %v1478_v60  }
 0x16c   :  { %v646_v63 = vpop.f32.mrb[44].mxu0  ;;  %v774_v0 = vpop.f32.mrb[44].mxu1 }
 0x16d   :  { %v648_v1 = vpop.f32.mrb[45].mxu0  ;;  %v776_v2 = vpop.f32.mrb[45].mxu1 }
 0x16e   :  { %v649_v3 = vpop.f32.mrb[46].mxu0  ;;  %v777_v4 = vpop.f32.mrb[46].mxu1 }
 0x16f   :  { %v1403_v5 = vpack.c.bf16 %v649_v3, %v646_v63  ;;  %v1483_v6 = vpack.c.bf16 %v777_v4, %v774_v0  ;;  %v651_v7 = vpop.f32.mrb[47].mxu0  ;;  %v779_v8 = vpop.f32.mrb[47].mxu1 }
 0x171   :  { %1515 = vst [vmem:[%s2067_s2 + $0x58] sm:$0xff] %v1403_v5   ;;  %1531 = vst [vmem:[%s2067_s2 + $0xd8] sm:$0xff] %v1483_v6  }
 0x174   :  { %v654_v9 = vpop.f32.mrb[48].mxu0  ;;  %v782_v10 = vpop.f32.mrb[48].mxu1 }
 0x175   :  { %v656_v11 = vpop.f32.mrb[49].mxu0  ;;  %v784_v12 = vpop.f32.mrb[49].mxu1 }
 0x176   :  { %v657_v13 = vpop.f32.mrb[50].mxu0  ;;  %v785_v14 = vpop.f32.mrb[50].mxu1 }
 0x177   :  { %v1408_v15 = vpack.c.bf16 %v657_v13, %v654_v9  ;;  %v1488_v16 = vpack.c.bf16 %v785_v14, %v782_v10  ;;  %v659_v17 = vpop.f32.mrb[51].mxu0  ;;  %v787_v18 = vpop.f32.mrb[51].mxu1 }
 0x179   :  { %1516 = vst [vmem:[%s2067_s2 + $0x60] sm:$0xff] %v1408_v15   ;;  %1532 = vst [vmem:[%s2067_s2 + $0xe0] sm:$0xff] %v1488_v16  }
 0x17c   :  { %v662_v19 = vpop.f32.mrb[52].mxu0  ;;  %v790_v20 = vpop.f32.mrb[52].mxu1 }
 0x17d   :  { %v664_v21 = vpop.f32.mrb[53].mxu0  ;;  %v792_v22 = vpop.f32.mrb[53].mxu1 }
 0x17e   :  { %v665_v23 = vpop.f32.mrb[54].mxu0  ;;  %v793_v24 = vpop.f32.mrb[54].mxu1 }
 0x17f   :  { %v1413_v25 = vpack.c.bf16 %v665_v23, %v662_v19  ;;  %v1493_v26 = vpack.c.bf16 %v793_v24, %v790_v20  ;;  %v667_v27 = vpop.f32.mrb[55].mxu0  ;;  %v795_v28 = vpop.f32.mrb[55].mxu1 }
 0x181   :  { %1517 = vst [vmem:[%s2067_s2 + $0x68] sm:$0xff] %v1413_v25   ;;  %1533 = vst [vmem:[%s2067_s2 + $0xe8] sm:$0xff] %v1493_v26  }
 0x184   :  { %v670_v29 = vpop.f32.mrb[56].mxu0  ;;  %v798_v30 = vpop.f32.mrb[56].mxu1 }
 0x185   :  { %v672_v31 = vpop.f32.mrb[57].mxu0  ;;  %v800_v32 = vpop.f32.mrb[57].mxu1 }
 0x186   :  { %v673_v33 = vpop.f32.mrb[58].mxu0  ;;  %v801_v34 = vpop.f32.mrb[58].mxu1 }
 0x187   :  { %v1418_v35 = vpack.c.bf16 %v673_v33, %v670_v29  ;;  %v1498_v36 = vpack.c.bf16 %v801_v34, %v798_v30  ;;  %v675_v37 = vpop.f32.mrb[59].mxu0  ;;  %v803_v38 = vpop.f32.mrb[59].mxu1 }
 0x189   :  { %1518 = vst [vmem:[%s2067_s2 + $0x70] sm:$0xff] %v1418_v35   ;;  %1534 = vst [vmem:[%s2067_s2 + $0xf0] sm:$0xff] %v1498_v36  }
 0x18c   :  { %v678_v39 = vpop.f32.mrb[60].mxu0  ;;  %v806_v40 = vpop.f32.mrb[60].mxu1 }
 0x18d   :  { %v680_v41 = vpop.f32.mrb[61].mxu0  ;;  %v808_v42 = vpop.f32.mrb[61].mxu1 }
 0x18e   :  { %v681_v43 = vpop.f32.mrb[62].mxu0  ;;  %v809_v44 = vpop.f32.mrb[62].mxu1 }
 0x18f   :  { %v1423_v45 = vpack.c.bf16 %v681_v43, %v678_v39  ;;  %v1503_v46 = vpack.c.bf16 %v809_v44, %v806_v40  ;;  %v683_v47 = vpop.f32.mrb[63].mxu0  ;;  %v811_v48 = vpop.f32.mrb[63].mxu1 }
 0x191   :  { %1519 = vst [vmem:[%s2067_s2 + $0x78] sm:$0xff] %v1423_v45   ;;  %1535 = vst [vmem:[%s2067_s2 + $0xf8] sm:$0xff] %v1503_v46  }

// kernel: gcn_forward.5
= control target key start
LH: loop header
LB: loop body
LE: loop exit
PB: predicated region body
PF: predicated region fallthrough
CT: control target
= control target key end

     0   :  { %s2922_s1 = inlined_call_operand.vmem [shape: bf16[512,128], index: 1, kind: input, shape index: {}]   ;;  %s2923_s0 = inlined_call_operand.vmem [shape: bf16[256,512], index: 0, kind: input, shape index: {}]   ;;  %s2924_s2 = inlined_call_operand.vmem [shape: f32[1,128], index: 2, kind: input, shape index: {}]   ;;  %s2925_s3 = inlined_call_operand.vmem [shape: f32[256,128], index: 3, kind: output, shape index: {}]  }
   0x1   :  { %v1902_v0 = vld [vmem:[%s2922_s1 + $0x40] sm:$0xff]   ;;  %v1906_v4 = vld [vmem:[%s2922_s1 + $0x48] sm:$0xff]   ;;  %v1910_v8 = vld [vmem:[%s2922_s1 + $0x50] sm:$0xff]  }
   0x2   :  { %v1903_v1 = vld [vmem:[%s2922_s1 + $0xc0] sm:$0xff]   ;;  %1678 = vmatprep.subr.bf16.mxu0 %v1902_v0  ;;  %v1907_v5 = vld [vmem:[%s2922_s1 + $0xc8] sm:$0xff]   ;;  %v1911_v9 = vld [vmem:[%s2922_s1 + $0xd0] sm:$0xff]  }
   0x3   :  { %v1904_v2 = vld [vmem:[%s2922_s1] sm:$0xff]   ;;  %1790 = vmatprep.subr.bf16.mxu1 %v1903_v1  ;;  %v1908_v6 = vld [vmem:[%s2922_s1 + $0x8] sm:$0xff]   ;;  %v1912_v10 = vld [vmem:[%s2922_s1 + $0x10] sm:$0xff]  }
   0x4   :  { %v1905_v3 = vld [vmem:[%s2922_s1 + $0x80] sm:$0xff]   ;;  %1679 = vmatpush3.bf16.msra.mxu0 %v1904_v2  ;;  %v1909_v7 = vld [vmem:[%s2922_s1 + $0x88] sm:$0xff]   ;;  %v1913_v11 = vld [vmem:[%s2922_s1 + $0x90] sm:$0xff]  }
   0x5   :  { %1791 = vmatpush3.bf16.msra.mxu1 %v1905_v3  ;;  %1680 = vmatprep.subr.bf16.mxu0 %v1906_v4  ;;  %v1914_v12 = vld [vmem:[%s2922_s1 + $0x58] sm:$0xff]   ;;  %v1918_v16 = vld [vmem:[%s2922_s1 + $0x60] sm:$0xff]   ;;  %v1922_v20 = vld [vmem:[%s2922_s1 + $0x68] sm:$0xff]  }
   0x6   :  { %1792 = vmatprep.subr.bf16.mxu1 %v1907_v5  ;;  %v1915_v13 = vld [vmem:[%s2922_s1 + $0xd8] sm:$0xff]   ;;  %v1919_v17 = vld [vmem:[%s2922_s1 + $0xe0] sm:$0xff]   ;;  %v1923_v21 = vld [vmem:[%s2922_s1 + $0xe8] sm:$0xff]  }
   0x7   :  { %v1916_v14 = vld [vmem:[%s2922_s1 + $0x18] sm:$0xff]   ;;  %v1920_v18 = vld [vmem:[%s2922_s1 + $0x20] sm:$0xff]   ;;  %v1924_v22 = vld [vmem:[%s2922_s1 + $0x28] sm:$0xff]  }
   0x8   :  { %1681 = vmatpush3.bf16.msra.mxu0 %v1908_v6  ;;  %v1917_v15 = vld [vmem:[%s2922_s1 + $0x98] sm:$0xff]   ;;  %v1921_v19 = vld [vmem:[%s2922_s1 + $0xa0] sm:$0xff]   ;;  %v1925_v23 = vld [vmem:[%s2922_s1 + $0xa8] sm:$0xff]  }
   0x9   :  { %1793 = vmatpush3.bf16.msra.mxu1 %v1909_v7  ;;  %1682 = vmatprep.subr.bf16.mxu0 %v1910_v8  ;;  %v1926_v24 = vld [vmem:[%s2922_s1 + $0x70] sm:$0xff]   ;;  %v1930_v28 = vld [vmem:[%s2922_s1 + $0x78] sm:$0xff]  }
   0xa   :  { %1794 = vmatprep.subr.bf16.mxu1 %v1911_v9  ;;  %v1927_v25 = vld [vmem:[%s2922_s1 + $0xf0] sm:$0xff]   ;;  %v1931_v29 = vld [vmem:[%s2922_s1 + $0xf8] sm:$0xff]  }
   0xb   :  { %v1928_v26 = vld [vmem:[%s2922_s1 + $0x30] sm:$0xff]   ;;  %v1932_v30 = vld [vmem:[%s2922_s1 + $0x38] sm:$0xff]  }
   0xc   :  { %1683 = vmatpush3.bf16.msra.mxu0 %v1912_v10  ;;  %v1929_v27 = vld [vmem:[%s2922_s1 + $0xb0] sm:$0xff]   ;;  %v1933_v31 = vld [vmem:[%s2922_s1 + $0xb8] sm:$0xff]  }
   0xd   :  { %1795 = vmatpush3.bf16.msra.mxu1 %v1913_v11  ;;  %1684 = vmatprep.subr.bf16.mxu0 %v1914_v12  ;;  %v1934_v32 = vld [vmem:[%s2923_s0] ss:$16 sps:$4 sm:$0xff]   ;;  %v1936_v33 = vld [vmem:[%s2923_s0 + $0x4] ss:$16 sps:$4 sm:$0xff]   ;;  %v1937_v34 = vld [vmem:[%s2923_s0 + $0x8] ss:$16 sps:$4 sm:$0xff]  }
   0xe   :  { %1796 = vmatprep.subr.bf16.mxu1 %v1915_v13  ;;  %v1939_v35 = vld [vmem:[%s2923_s0 + $0xc] ss:$16 sps:$4 sm:$0xff]   ;;  %760 = vmatprep.mubr.bf16.mxu0 %v1936_v33  ;;  %v1940_v36 = vld [vmem:[%s2923_s0 + $0x24] ss:$16 sps:$4 sm:$0xff]   ;;  %v1944_v38 = vld [vmem:[%s2923_s0 + $0x20] ss:$16 sps:$4 sm:$0xff]  }
   0xf   :  { %921 = vmatprep.mubr.bf16.mxu1 %v1939_v35  ;;  %v1942_v37 = vld [vmem:[%s2923_s0 + $0x2c] ss:$16 sps:$4 sm:$0xff]   ;;  %v1945_v39 = vld [vmem:[%s2923_s0 + $0x28] ss:$16 sps:$4 sm:$0xff]   ;;  %v1946_v40 = vld [vmem:[%s2923_s0 + $0x44] ss:$16 sps:$4 sm:$0xff]  }
  0x10   :  { %1685 = vmatpush3.bf16.msra.mxu0 %v1916_v14  ;;  %v1948_v41 = vld [vmem:[%s2923_s0 + $0x4c] ss:$16 sps:$4 sm:$0xff]   ;;  %v1950_v42 = vld [vmem:[%s2923_s0 + $0x40] ss:$16 sps:$4 sm:$0xff]   ;;  %v1951_v43 = vld [vmem:[%s2923_s0 + $0x48] ss:$16 sps:$4 sm:$0xff]  }
  0x11   :  { %1797 = vmatpush3.bf16.msra.mxu1 %v1917_v15  ;;  %1686 = vmatprep.subr.bf16.mxu0 %v1918_v16  ;;  %v1952_v44 = vld [vmem:[%s2923_s0 + $0x64] ss:$16 sps:$4 sm:$0xff]   ;;  %v1954_v45 = vld [vmem:[%s2923_s0 + $0x6c] ss:$16 sps:$4 sm:$0xff]   ;;  %v1956_v46 = vld [vmem:[%s2923_s0 + $0x60] ss:$16 sps:$4 sm:$0xff]  }
  0x12   :  { %1798 = vmatprep.subr.bf16.mxu1 %v1919_v17  ;;  %v1957_v47 = vld [vmem:[%s2923_s0 + $0x68] ss:$16 sps:$4 sm:$0xff]   ;;  %v1958_v48 = vld [vmem:[%s2923_s0 + $0x84] ss:$16 sps:$4 sm:$0xff]   ;;  %v1960_v49 = vld [vmem:[%s2923_s0 + $0x8c] ss:$16 sps:$4 sm:$0xff]  }
  0x13   :  { %v1962_v50 = vld [vmem:[%s2923_s0 + $0x80] ss:$16 sps:$4 sm:$0xff]   ;;  %v1963_v51 = vld [vmem:[%s2923_s0 + $0x88] ss:$16 sps:$4 sm:$0xff]   ;;  %v1964_v52 = vld [vmem:[%s2923_s0 + $0xa4] ss:$16 sps:$4 sm:$0xff]  }
  0x14   :  { %1687 = vmatpush3.bf16.msra.mxu0 %v1920_v18  ;;  %v1966_v53 = vld [vmem:[%s2923_s0 + $0xac] ss:$16 sps:$4 sm:$0xff]   ;;  %v1968_v54 = vld [vmem:[%s2923_s0 + $0xa0] ss:$16 sps:$4 sm:$0xff]   ;;  %v1969_v55 = vld [vmem:[%s2923_s0 + $0xa8] ss:$16 sps:$4 sm:$0xff]  }
  0x15   :  { %1799 = vmatpush3.bf16.msra.mxu1 %v1921_v19  ;;  %1688 = vmatprep.subr.bf16.mxu0 %v1922_v20  ;;  %v1970_v56 = vld [vmem:[%s2923_s0 + $0xc4] ss:$16 sps:$4 sm:$0xff]   ;;  %v1972_v57 = vld [vmem:[%s2923_s0 + $0xcc] ss:$16 sps:$4 sm:$0xff]   ;;  %v1974_v58 = vld [vmem:[%s2923_s0 + $0xc0] ss:$16 sps:$4 sm:$0xff]  }
  0x16   :  { %1800 = vmatprep.subr.bf16.mxu1 %v1923_v21  ;;  %v1975_v59 = vld [vmem:[%s2923_s0 + $0xc8] ss:$16 sps:$4 sm:$0xff]   ;;  %v1976_v60 = vld [vmem:[%s2923_s0 + $0xe4] ss:$16 sps:$4 sm:$0xff]   ;;  %v1978_v61 = vld [vmem:[%s2923_s0 + $0xec] ss:$16 sps:$4 sm:$0xff]  }
  0x17   :  { %v1980_v62 = vld [vmem:[%s2923_s0 + $0xe0] ss:$16 sps:$4 sm:$0xff]   ;;  %v1981_v63 = vld [vmem:[%s2923_s0 + $0xe8] ss:$16 sps:$4 sm:$0xff]   ;;  %v1982_v0 = vld [vmem:[%s2923_s0 + $0x104] ss:$16 sps:$4 sm:$0xff]  }
  0x18   :  { %1689 = vmatpush3.bf16.msra.mxu0 %v1924_v22  ;;  %v1984_v1 = vld [vmem:[%s2923_s0 + $0x10c] ss:$16 sps:$4 sm:$0xff]   ;;  %v1986_v2 = vld [vmem:[%s2923_s0 + $0x100] ss:$16 sps:$4 sm:$0xff]   ;;  %v1987_v3 = vld [vmem:[%s2923_s0 + $0x108] ss:$16 sps:$4 sm:$0xff]  }
  0x19   :  { %1801 = vmatpush3.bf16.msra.mxu1 %v1925_v23  ;;  %1690 = vmatprep.subr.bf16.mxu0 %v1926_v24  ;;  %v1988_v4 = vld [vmem:[%s2923_s0 + $0x124] ss:$16 sps:$4 sm:$0xff]   ;;  %v1990_v5 = vld [vmem:[%s2923_s0 + $0x12c] ss:$16 sps:$4 sm:$0xff]   ;;  %v1992_v6 = vld [vmem:[%s2923_s0 + $0x120] ss:$16 sps:$4 sm:$0xff]  }
  0x1a   :  { %1802 = vmatprep.subr.bf16.mxu1 %v1927_v25  ;;  %v1993_v7 = vld [vmem:[%s2923_s0 + $0x128] ss:$16 sps:$4 sm:$0xff]   ;;  %v1994_v8 = vld [vmem:[%s2923_s0 + $0x144] ss:$16 sps:$4 sm:$0xff]   ;;  %v1996_v9 = vld [vmem:[%s2923_s0 + $0x14c] ss:$16 sps:$4 sm:$0xff]  }
  0x1b   :  { %v1998_v10 = vld [vmem:[%s2923_s0 + $0x140] ss:$16 sps:$4 sm:$0xff]   ;;  %v1999_v11 = vld [vmem:[%s2923_s0 + $0x148] ss:$16 sps:$4 sm:$0xff]   ;;  %v2000_v12 = vld [vmem:[%s2923_s0 + $0x164] ss:$16 sps:$4 sm:$0xff]  }
  0x1c   :  { %1691 = vmatpush3.bf16.msra.mxu0 %v1928_v26  ;;  %v2002_v13 = vld [vmem:[%s2923_s0 + $0x16c] ss:$16 sps:$4 sm:$0xff]   ;;  %v2004_v14 = vld [vmem:[%s2923_s0 + $0x160] ss:$16 sps:$4 sm:$0xff]   ;;  %v2005_v15 = vld [vmem:[%s2923_s0 + $0x168] ss:$16 sps:$4 sm:$0xff]  }
  0x1d   :  { %1803 = vmatpush3.bf16.msra.mxu1 %v1929_v27  ;;  %1692 = vmatprep.subr.bf16.mxu0 %v1930_v28  ;;  %v2006_v16 = vld [vmem:[%s2923_s0 + $0x184] ss:$16 sps:$4 sm:$0xff]   ;;  %v2008_v17 = vld [vmem:[%s2923_s0 + $0x18c] ss:$16 sps:$4 sm:$0xff]   ;;  %v2010_v18 = vld [vmem:[%s2923_s0 + $0x180] ss:$16 sps:$4 sm:$0xff]  }
  0x1e   :  { %1804 = vmatprep.subr.bf16.mxu1 %v1931_v29  ;;  %v2011_v19 = vld [vmem:[%s2923_s0 + $0x188] ss:$16 sps:$4 sm:$0xff]   ;;  %v2012_v20 = vld [vmem:[%s2923_s0 + $0x1a4] ss:$16 sps:$4 sm:$0xff]   ;;  %v2014_v21 = vld [vmem:[%s2923_s0 + $0x1ac] ss:$16 sps:$4 sm:$0xff]  }
  0x1f   :  { %v2016_v22 = vld [vmem:[%s2923_s0 + $0x1a0] ss:$16 sps:$4 sm:$0xff]   ;;  %v2017_v23 = vld [vmem:[%s2923_s0 + $0x1a8] ss:$16 sps:$4 sm:$0xff]   ;;  %v2018_v24 = vld [vmem:[%s2923_s0 + $0x1c4] ss:$16 sps:$4 sm:$0xff]  }
  0x20   :  { %1693 = vmatpush3.bf16.msra.mxu0 %v1932_v30  ;;  %v2020_v25 = vld [vmem:[%s2923_s0 + $0x1cc] ss:$16 sps:$4 sm:$0xff]   ;;  %v2022_v26 = vld [vmem:[%s2923_s0 + $0x1c0] ss:$16 sps:$4 sm:$0xff]   ;;  %v2023_v27 = vld [vmem:[%s2923_s0 + $0x1c8] ss:$16 sps:$4 sm:$0xff]  }
  0x21   :  { %1805 = vmatpush3.bf16.msra.mxu1 %v1933_v31  ;;  %v2024_v28 = vld [vmem:[%s2923_s0 + $0x1e4] ss:$16 sps:$4 sm:$0xff]   ;;  %v2026_v29 = vld [vmem:[%s2923_s0 + $0x1ec] ss:$16 sps:$4 sm:$0xff]   ;;  %v2028_v30 = vld [vmem:[%s2923_s0 + $0x1e0] ss:$16 sps:$4 sm:$0xff]  }
  0x22   :  { %v2029_v31 = vld [vmem:[%s2923_s0 + $0x1e8] ss:$16 sps:$4 sm:$0xff]  }
  0x23   :  { %761 = vmatmul.mubr.bf16.vlgmr.msra.gmra.mrb[0].mxu0 %v1934_v32  ;;  %v1188_v32 = vlaneseq }
  0x24   :  { %922 = vmatmul.mubr.bf16.vlgmr.msra.gmra.mrb[0].mxu1 %v1937_v34  ;;  %768 = vmatprep.mubr.bf16.mxu0 %v1940_v36 }
  0x25   :  { %929 = vmatprep.mubr.bf16.mxu1 %v1942_v37 }
  0x2b   :  { %769 = vmatmul.mubr.bf16.gmra.mrb[4].mxu0 %v1944_v38 }
  0x2c   :  { %930 = vmatmul.mubr.bf16.gmra.mrb[4].mxu1 %v1945_v39  ;;  %776 = vmatprep.mubr.bf16.mxu0 %v1946_v40  ;;  %v2466_v39 = vand.u32 127, %v1188_v32 }
  0x2d   :  { %937 = vmatprep.mubr.bf16.mxu1 %v1948_v41 }
  0x2e   :  { %vm1190_vm0 = vcmp.lt.s32.totalorder %v2466_v39, 8 }
  0x33   :  { %777 = vmatmul.mubr.bf16.gmra.mrb[8].mxu0 %v1950_v42 }
  0x34   :  { %938 = vmatmul.mubr.bf16.gmra.mrb[8].mxu1 %v1951_v43  ;;  %784 = vmatprep.mubr.bf16.mxu0 %v1952_v44 }
  0x35   :  { %945 = vmatprep.mubr.bf16.mxu1 %v1954_v45  ;;  %v2471_v45 = vld [vmem:[%s2924_s2] ss:$0 sm:$0xff] }
  0x3b   :  { %785 = vmatmul.mubr.bf16.gmra.mrb[12].mxu0 %v1956_v46 }
  0x3c   :  { %946 = vmatmul.mubr.bf16.gmra.mrb[12].mxu1 %v1957_v47  ;;  %792 = vmatprep.mubr.bf16.mxu0 %v1958_v48 }
  0x3d   :  { %953 = vmatprep.mubr.bf16.mxu1 %v1960_v49 }
  0x43   :  { %793 = vmatmul.mubr.bf16.gmra.mrb[16].mxu0 %v1962_v50 }
  0x44   :  { %954 = vmatmul.mubr.bf16.gmra.mrb[16].mxu1 %v1963_v51  ;;  %800 = vmatprep.mubr.bf16.mxu0 %v1964_v52 }
  0x45   :  { %961 = vmatprep.mubr.bf16.mxu1 %v1966_v53 }
  0x4b   :  { %801 = vmatmul.mubr.bf16.gmra.mrb[20].mxu0 %v1968_v54 }
  0x4c   :  { %962 = vmatmul.mubr.bf16.gmra.mrb[20].mxu1 %v1969_v55  ;;  %808 = vmatprep.mubr.bf16.mxu0 %v1970_v56 }
  0x4d   :  { %969 = vmatprep.mubr.bf16.mxu1 %v1972_v57 }
  0x53   :  { %809 = vmatmul.mubr.bf16.gmra.mrb[24].mxu0 %v1974_v58 }
  0x54   :  { %970 = vmatmul.mubr.bf16.gmra.mrb[24].mxu1 %v1975_v59  ;;  %816 = vmatprep.mubr.bf16.mxu0 %v1976_v60 }
  0x55   :  { %977 = vmatprep.mubr.bf16.mxu1 %v1978_v61 }
  0x5b   :  { %817 = vmatmul.mubr.bf16.gmra.mrb[28].mxu0 %v1980_v62 }
  0x5c   :  { %978 = vmatmul.mubr.bf16.gmra.mrb[28].mxu1 %v1981_v63  ;;  %824 = vmatprep.mubr.bf16.mxu0 %v1982_v0 }
  0x5d   :  { %985 = vmatprep.mubr.bf16.mxu1 %v1984_v1 }
  0x63   :  { %825 = vmatmul.mubr.bf16.gmra.mrb[32].mxu0 %v1986_v2 }
  0x64   :  { %986 = vmatmul.mubr.bf16.gmra.mrb[32].mxu1 %v1987_v3  ;;  %832 = vmatprep.mubr.bf16.mxu0 %v1988_v4 }
  0x65   :  { %993 = vmatprep.mubr.bf16.mxu1 %v1990_v5 }
  0x6b   :  { %833 = vmatmul.mubr.bf16.gmra.mrb[36].mxu0 %v1992_v6 }
  0x6c   :  { %994 = vmatmul.mubr.bf16.gmra.mrb[36].mxu1 %v1993_v7  ;;  %840 = vmatprep.mubr.bf16.mxu0 %v1994_v8 }
  0x6d   :  { %1001 = vmatprep.mubr.bf16.mxu1 %v1996_v9 }
  0x73   :  { %841 = vmatmul.mubr.bf16.gmra.mrb[40].mxu0 %v1998_v10 }
  0x74   :  { %1002 = vmatmul.mubr.bf16.gmra.mrb[40].mxu1 %v1999_v11  ;;  %848 = vmatprep.mubr.bf16.mxu0 %v2000_v12 }
  0x75   :  { %1009 = vmatprep.mubr.bf16.mxu1 %v2002_v13 }
  0x7b   :  { %849 = vmatmul.mubr.bf16.gmra.mrb[44].mxu0 %v2004_v14 }
  0x7c   :  { %1010 = vmatmul.mubr.bf16.gmra.mrb[44].mxu1 %v2005_v15  ;;  %856 = vmatprep.mubr.bf16.mxu0 %v2006_v16 }
  0x7d   :  { %1017 = vmatprep.mubr.bf16.mxu1 %v2008_v17 }
  0x83   :  { %857 = vmatmul.mubr.bf16.gmra.mrb[48].mxu0 %v2010_v18 }
  0x84   :  { %1018 = vmatmul.mubr.bf16.gmra.mrb[48].mxu1 %v2011_v19  ;;  %864 = vmatprep.mubr.bf16.mxu0 %v2012_v20 }
  0x85   :  { %1025 = vmatprep.mubr.bf16.mxu1 %v2014_v21 }
  0x8b   :  { %865 = vmatmul.mubr.bf16.gmra.mrb[52].mxu0 %v2016_v22 }
  0x8c   :  { %1026 = vmatmul.mubr.bf16.gmra.mrb[52].mxu1 %v2017_v23  ;;  %872 = vmatprep.mubr.bf16.mxu0 %v2018_v24 }
  0x8d   :  { %1033 = vmatprep.mubr.bf16.mxu1 %v2020_v25 }
  0x93   :  { %873 = vmatmul.mubr.bf16.gmra.mrb[56].mxu0 %v2022_v26 }
  0x94   :  { %1034 = vmatmul.mubr.bf16.gmra.mrb[56].mxu1 %v2023_v27  ;;  %880 = vmatprep.mubr.bf16.mxu0 %v2024_v28 }
  0x95   :  { %1041 = vmatprep.mubr.bf16.mxu1 %v2026_v29 }
  0x9b   :  { %881 = vmatmul.mubr.bf16.gmra.mrb[60].mxu0 %v2028_v30 }
  0x9c   :  { %1042 = vmatmul.mubr.bf16.gmra.mrb[60].mxu1 %v2029_v31 }
  0xf6   :  { %v1694_v33 = vpop.f32.mrb[0].mxu0 }
  0xf7   :  { %v1806_v34 = vpop.f32.mrb[0].mxu1  ;;  %v1695_v35 = vpop.f32.mrb[1].mxu0 }
  0xf8   :  { %v1696_v36 = vadd.f32 %v1695_v35, %v1694_v33  ;;  %v1807_v37 = vpop.f32.mrb[1].mxu1  ;;  %v1697_v38 = vpop.f32.mrb[2].mxu0 }
  0xf9   :  { %v1808_v40 = vadd.f32 %v1807_v37, %v1806_v34  ;;  %v1809_v41 = vpop.f32.mrb[2].mxu1  ;;  %v1698_v42 = vpop.f32.mrb[3].mxu0 }
  0xfa   :  { %v1699_v43 = vadd.f32 %v1698_v42, %v1697_v38  ;;  %v1810_v44 = vpop.f32.mrb[3].mxu1 }
  0xfb   :  { %v924_v46 = vadd.f32 %v1808_v40, %v1696_v36  ;;  %v1811_v47 = vadd.f32 %v1810_v44, %v1809_v41 }
  0xfd   :  { %v927_v48 = vadd.f32 %v1811_v47, %v1699_v43  ;;  %v1156_v49 = vadd.f32 %v2471_v45, %v924_v46 }
  0xfe   :  { %v1700_v50 = vpop.f32.mrb[4].mxu0 }
  0xff   :  { %v1812_v51 = vpop.f32.mrb[4].mxu1  ;;  %v1701_v52 = vpop.f32.mrb[5].mxu0  ;;  %v2477_v53 = vsel %vm1190_vm0, %v1156_v49, -1e+30  ;;  %v1157_v54 = vadd.f32 %v2471_v45, %v927_v48 }
 0x100   :  { %v1702_v55 = vadd.f32 %v1701_v52, %v1700_v50  ;;  %v1813_v56 = vpop.f32.mrb[5].mxu1  ;;  %1223 = vmax.xlane.f32.xlu0 %v2477_v53  ;;  %v1703_v57 = vpop.f32.mrb[6].mxu0 }
 0x101   :  { %v1814_v58 = vadd.f32 %v1813_v56, %v1812_v51  ;;  %v1815_v59 = vpop.f32.mrb[6].mxu1  ;;  %v1704_v60 = vpop.f32.mrb[7].mxu0  ;;  %v2483_v1 = vsel %vm1190_vm0, %v1157_v54, -1e+30 }
 0x102   :  { %v1705_v61 = vadd.f32 %v1704_v60, %v1703_v57  ;;  %v1816_v62 = vpop.f32.mrb[7].mxu1 }
 0x103   :  { %v932_v63 = vadd.f32 %v1814_v58, %v1702_v55  ;;  %v1817_v0 = vadd.f32 %v1816_v62, %v1815_v59 }
 0x104   :  { %1225 = vmax.xlane.f32.xlu0 %v2483_v1 }
 0x105   :  { %v935_v2 = vadd.f32 %v1817_v0, %v1705_v61  ;;  %v1158_v3 = vadd.f32 %v2471_v45, %v932_v63 }
 0x106   :  { %v1706_v4 = vpop.f32.mrb[8].mxu0 }
 0x107   :  { %v1818_v5 = vpop.f32.mrb[8].mxu1  ;;  %v1707_v6 = vpop.f32.mrb[9].mxu0  ;;  %v2489_v7 = vsel %vm1190_vm0, %v1158_v3, -1e+30  ;;  %v1159_v8 = vadd.f32 %v2471_v45, %v935_v2 }
 0x108   :  { %v1708_v9 = vadd.f32 %v1707_v6, %v1706_v4  ;;  %v1819_v10 = vpop.f32.mrb[9].mxu1  ;;  %1227 = vmax.xlane.f32.xlu1 %v2489_v7  ;;  %v1709_v11 = vpop.f32.mrb[10].mxu0 }
 0x109   :  { %v1820_v12 = vadd.f32 %v1819_v10, %v1818_v5  ;;  %v1821_v13 = vpop.f32.mrb[10].mxu1  ;;  %v1710_v14 = vpop.f32.mrb[11].mxu0  ;;  %v2495_v19 = vsel %vm1190_vm0, %v1159_v8, -1e+30 }
 0x10a   :  { %v1711_v15 = vadd.f32 %v1710_v14, %v1709_v11  ;;  %v1822_v16 = vpop.f32.mrb[11].mxu1 }
 0x10b   :  { %v940_v17 = vadd.f32 %v1820_v12, %v1708_v9  ;;  %v1823_v18 = vadd.f32 %v1822_v16, %v1821_v13 }
 0x10c   :  { %1229 = vmax.xlane.f32.xlu1 %v2495_v19 }
 0x10d   :  { %v943_v20 = vadd.f32 %v1823_v18, %v1711_v15  ;;  %v1160_v21 = vadd.f32 %v2471_v45, %v940_v17 }
 0x10e   :  { %v1712_v22 = vpop.f32.mrb[12].mxu0 }
 0x10f   :  { %v1824_v23 = vpop.f32.mrb[12].mxu1  ;;  %v1713_v24 = vpop.f32.mrb[13].mxu0  ;;  %v2501_v25 = vsel %vm1190_vm0, %v1160_v21, -1e+30  ;;  %v1161_v26 = vadd.f32 %v2471_v45, %v943_v20 }
 0x110   :  { %v1714_v27 = vadd.f32 %v1713_v24, %v1712_v22  ;;  %v1825_v28 = vpop.f32.mrb[13].mxu1  ;;  %1231 = vmax.xlane.f32.xlu0 %v2501_v25  ;;  %v1715_v29 = vpop.f32.mrb[14].mxu0 }
 0x111   :  { %v1826_v30 = vadd.f32 %v1825_v28, %v1824_v23  ;;  %v1827_v31 = vpop.f32.mrb[14].mxu1  ;;  %v1716_v32 = vpop.f32.mrb[15].mxu0  ;;  %v2507_v33 = vsel %vm1190_vm0, %v1161_v26, -1e+30 }
 0x112   :  { %v1717_v34 = vadd.f32 %v1716_v32, %v1715_v29  ;;  %v1828_v35 = vpop.f32.mrb[15].mxu1  ;;  %1233 = vmax.xlane.f32.xlu1 %v2507_v33 }
 0x113   :  { %v948_v36 = vadd.f32 %v1826_v30, %v1714_v27  ;;  %v1829_v37 = vadd.f32 %v1828_v35, %v1827_v31 }
 0x115   :  { %v951_v38 = vadd.f32 %v1829_v37, %v1717_v34  ;;  %v1162_v40 = vadd.f32 %v2471_v45, %v948_v36 }
 0x116   :  { %v1718_v41 = vpop.f32.mrb[16].mxu0 }
 0x117   :  { %v1830_v42 = vpop.f32.mrb[16].mxu1  ;;  %v1719_v43 = vpop.f32.mrb[17].mxu0  ;;  %v2513_v44 = vsel %vm1190_vm0, %v1162_v40, -1e+30  ;;  %v1163_v46 = vadd.f32 %v2471_v45, %v951_v38 }
 0x118   :  { %v1720_v47 = vadd.f32 %v1719_v43, %v1718_v41  ;;  %v1831_v48 = vpop.f32.mrb[17].mxu1  ;;  %1235 = vmax.xlane.f32.xlu0 %v2513_v44  ;;  %v1721_v49 = vpop.f32.mrb[18].mxu0 }
 0x119   :  { %v1832_v50 = vadd.f32 %v1831_v48, %v1830_v42  ;;  %v1833_v51 = vpop.f32.mrb[18].mxu1  ;;  %v1722_v52 = vpop.f32.mrb[19].mxu0  ;;  %v2519_v54 = vsel %vm1190_vm0, %v1163_v46, -1e+30 }
 0x11a   :  { %v1723_v55 = vadd.f32 %v1722_v52, %v1721_v49  ;;  %v1834_v56 = vpop.f32.mrb[19].mxu1  ;;  %1237 = vmax.xlane.f32.xlu1 %v2519_v54 }
 0x11b   :  { %v956_v57 = vadd.f32 %v1832_v50, %v1720_v47  ;;  %v1835_v58 = vadd.f32 %v1834_v56, %v1833_v51 }
 0x11d   :  { %v959_v59 = vadd.f32 %v1835_v58, %v1723_v55  ;;  %v1164_v60 = vadd.f32 %v2471_v45, %v956_v57 }
 0x11e   :  { %v1724_v61 = vpop.f32.mrb[20].mxu0 }
 0x11f   :  { %v1836_v62 = vpop.f32.mrb[20].mxu1  ;;  %v1725_v63 = vpop.f32.mrb[21].mxu0  ;;  %v2525_v0 = vsel %vm1190_vm0, %v1164_v60, -1e+30  ;;  %v1165_v2 = vadd.f32 %v2471_v45, %v959_v59 }
 0x120   :  { %v1726_v3 = vadd.f32 %v1725_v63, %v1724_v61  ;;  %v1837_v4 = vpop.f32.mrb[21].mxu1  ;;  %1239 = vmax.xlane.f32.xlu0 %v2525_v0  ;;  %v1727_v5 = vpop.f32.mrb[22].mxu0 }
 0x121   :  { %v1838_v6 = vadd.f32 %v1837_v4, %v1836_v62  ;;  %v1839_v8 = vpop.f32.mrb[22].mxu1  ;;  %v1728_v9 = vpop.f32.mrb[23].mxu0  ;;  %v2531_v10 = vsel %vm1190_vm0, %v1165_v2, -1e+30 }
 0x122   :  { %v1729_v11 = vadd.f32 %v1728_v9, %v1727_v5  ;;  %v1840_v12 = vpop.f32.mrb[23].mxu1  ;;  %1241 = vmax.xlane.f32.xlu1 %v2531_v10 }
 0x123   :  { %v964_v13 = vadd.f32 %v1838_v6, %v1726_v3  ;;  %v1841_v14 = vadd.f32 %v1840_v12, %v1839_v8 }
 0x125   :  { %v967_v15 = vadd.f32 %v1841_v14, %v1729_v11  ;;  %v1166_v16 = vadd.f32 %v2471_v45, %v964_v13 }
 0x126   :  { %v1730_v17 = vpop.f32.mrb[24].mxu0 }
 0x127   :  { %v1842_v18 = vpop.f32.mrb[24].mxu1  ;;  %v1731_v20 = vpop.f32.mrb[25].mxu0  ;;  %v2537_v21 = vsel %vm1190_vm0, %v1166_v16, -1e+30  ;;  %v1167_v22 = vadd.f32 %v2471_v45, %v967_v15 }
 0x128   :  { %v1732_v23 = vadd.f32 %v1731_v20, %v1730_v17  ;;  %v1843_v24 = vpop.f32.mrb[25].mxu1  ;;  %1243 = vmax.xlane.f32.xlu0 %v2537_v21  ;;  %v1733_v26 = vpop.f32.mrb[26].mxu0 }
 0x129   :  { %v1844_v27 = vadd.f32 %v1843_v24, %v1842_v18  ;;  %v1845_v28 = vpop.f32.mrb[26].mxu1  ;;  %v1734_v29 = vpop.f32.mrb[27].mxu0  ;;  %v2543_v30 = vsel %vm1190_vm0, %v1167_v22, -1e+30 }
 0x12a   :  { %v1735_v31 = vadd.f32 %v1734_v29, %v1733_v26  ;;  %v1846_v32 = vpop.f32.mrb[27].mxu1  ;;  %1245 = vmax.xlane.f32.xlu1 %v2543_v30 }
 0x12b   :  { %v972_v34 = vadd.f32 %v1844_v27, %v1732_v23  ;;  %v1847_v35 = vadd.f32 %v1846_v32, %v1845_v28 }
 0x12d   :  { %v975_v36 = vadd.f32 %v1847_v35, %v1735_v31  ;;  %v1168_v37 = vadd.f32 %v2471_v45, %v972_v34 }
 0x12e   :  { %v1736_v38 = vpop.f32.mrb[28].mxu0 }
 0x12f   :  { %v1848_v40 = vpop.f32.mrb[28].mxu1  ;;  %v1737_v41 = vpop.f32.mrb[29].mxu0  ;;  %v2549_v42 = vsel %vm1190_vm0, %v1168_v37, -1e+30  ;;  %v1169_v43 = vadd.f32 %v2471_v45, %v975_v36 }
 0x130   :  { %v1738_v46 = vadd.f32 %v1737_v41, %v1736_v38  ;;  %v1849_v47 = vpop.f32.mrb[29].mxu1  ;;  %1247 = vmax.xlane.f32.xlu0 %v2549_v42  ;;  %v1739_v48 = vpop.f32.mrb[30].mxu0 }
 0x131   :  { %v1850_v49 = vadd.f32 %v1849_v47, %v1848_v40  ;;  %v1851_v50 = vpop.f32.mrb[30].mxu1  ;;  %v1740_v51 = vpop.f32.mrb[31].mxu0  ;;  %v2555_v52 = vsel %vm1190_vm0, %v1169_v43, -1e+30 }
 0x132   :  { %v1741_v55 = vadd.f32 %v1740_v51, %v1739_v48  ;;  %v1852_v56 = vpop.f32.mrb[31].mxu1  ;;  %1249 = vmax.xlane.f32.xlu1 %v2555_v52 }
 0x133   :  { %v980_v57 = vadd.f32 %v1850_v49, %v1738_v46  ;;  %v1853_v58 = vadd.f32 %v1852_v56, %v1851_v50 }
 0x135   :  { %v983_v59 = vadd.f32 %v1853_v58, %v1741_v55  ;;  %v1170_v60 = vadd.f32 %v2471_v45, %v980_v57 }
 0x136   :  { %v1742_v61 = vpop.f32.mrb[32].mxu0 }
 0x137   :  { %v1854_v62 = vpop.f32.mrb[32].mxu1  ;;  %v1743_v63 = vpop.f32.mrb[33].mxu0  ;;  %v2561_v2 = vsel %vm1190_vm0, %v1170_v60, -1e+30  ;;  %v1171_v3 = vadd.f32 %v2471_v45, %v983_v59 }
 0x138   :  { %v1744_v4 = vadd.f32 %v1743_v63, %v1742_v61  ;;  %v1855_v5 = vpop.f32.mrb[33].mxu1  ;;  %1251 = vmax.xlane.f32.xlu0 %v2561_v2  ;;  %v1745_v6 = vpop.f32.mrb[34].mxu0 }
 0x139   :  { %v1856_v8 = vadd.f32 %v1855_v5, %v1854_v62  ;;  %v1857_v9 = vpop.f32.mrb[34].mxu1  ;;  %v1746_v11 = vpop.f32.mrb[35].mxu0  ;;  %v2567_v12 = vsel %vm1190_vm0, %v1171_v3, -1e+30 }
 0x13a   :  { %v1747_v13 = vadd.f32 %v1746_v11, %v1745_v6  ;;  %v1858_v14 = vpop.f32.mrb[35].mxu1  ;;  %1253 = vmax.xlane.f32.xlu1 %v2567_v12 }
 0x13b   :  { %v988_v15 = vadd.f32 %v1856_v8, %v1744_v4  ;;  %v1859_v16 = vadd.f32 %v1858_v14, %v1857_v9 }
 0x13d   :  { %v991_v17 = vadd.f32 %v1859_v16, %v1747_v13  ;;  %v1172_v18 = vadd.f32 %v2471_v45, %v988_v15 }
 0x13e   :  { %v1748_v20 = vpop.f32.mrb[36].mxu0 }
 0x13f   :  { %v1860_v22 = vpop.f32.mrb[36].mxu1  ;;  %v1749_v23 = vpop.f32.mrb[37].mxu0  ;;  %v2573_v24 = vsel %vm1190_vm0, %v1172_v18, -1e+30  ;;  %v1173_v26 = vadd.f32 %v2471_v45, %v991_v17 }
 0x140   :  { %v1750_v27 = vadd.f32 %v1749_v23, %v1748_v20  ;;  %v1861_v28 = vpop.f32.mrb[37].mxu1  ;;  %1255 = vmax.xlane.f32.xlu0 %v2573_v24  ;;  %v1751_v29 = vpop.f32.mrb[38].mxu0 }
 0x141   :  { %v1862_v31 = vadd.f32 %v1861_v28, %v1860_v22  ;;  %v1863_v32 = vpop.f32.mrb[38].mxu1  ;;  %v1752_v34 = vpop.f32.mrb[39].mxu0  ;;  %v2579_v35 = vsel %vm1190_vm0, %v1173_v26, -1e+30 }
 0x142   :  { %v1753_v36 = vadd.f32 %v1752_v34, %v1751_v29  ;;  %v1864_v37 = vpop.f32.mrb[39].mxu1  ;;  %1257 = vmax.xlane.f32.xlu1 %v2579_v35 }
 0x143   :  { %v996_v38 = vadd.f32 %v1862_v31, %v1750_v27  ;;  %v1865_v40 = vadd.f32 %v1864_v37, %v1863_v32 }
 0x145   :  { %v999_v41 = vadd.f32 %v1865_v40, %v1753_v36  ;;  %v1174_v43 = vadd.f32 %v2471_v45, %v996_v38 }
 0x146   :  { %v1754_v46 = vpop.f32.mrb[40].mxu0 }
 0x147   :  { %v1866_v47 = vpop.f32.mrb[40].mxu1  ;;  %v1755_v48 = vpop.f32.mrb[41].mxu0  ;;  %v2585_v49 = vsel %vm1190_vm0, %v1174_v43, -1e+30  ;;  %v1175_v50 = vadd.f32 %v2471_v45, %v999_v41 }
 0x148   :  { %v1756_v51 = vadd.f32 %v1755_v48, %v1754_v46  ;;  %v1867_v55 = vpop.f32.mrb[41].mxu1  ;;  %1259 = vmax.xlane.f32.xlu0 %v2585_v49  ;;  %v1757_v56 = vpop.f32.mrb[42].mxu0 }
 0x149   :  { %v1868_v57 = vadd.f32 %v1867_v55, %v1866_v47  ;;  %v1869_v58 = vpop.f32.mrb[42].mxu1  ;;  %v1758_v59 = vpop.f32.mrb[43].mxu0  ;;  %v2591_v60 = vsel %vm1190_vm0, %v1175_v50, -1e+30 }
 0x14a   :  { %v1759_v61 = vadd.f32 %v1758_v59, %v1757_v56  ;;  %v1870_v62 = vpop.f32.mrb[43].mxu1  ;;  %1261 = vmax.xlane.f32.xlu1 %v2591_v60 }
 0x14b   :  { %v1004_v63 = vadd.f32 %v1868_v57, %v1756_v51  ;;  %v1871_v3 = vadd.f32 %v1870_v62, %v1869_v58 }
 0x14d   :  { %v1007_v4 = vadd.f32 %v1871_v3, %v1759_v61  ;;  %v1176_v5 = vadd.f32 %v2471_v45, %v1004_v63 }
 0x14e   :  { %v1760_v6 = vpop.f32.mrb[44].mxu0 }
 0x14f   :  { %v1872_v8 = vpop.f32.mrb[44].mxu1  ;;  %v1761_v9 = vpop.f32.mrb[45].mxu0  ;;  %v2597_v11 = vsel %vm1190_vm0, %v1176_v5, -1e+30  ;;  %v1177_v13 = vadd.f32 %v2471_v45, %v1007_v4 }
 0x150   :  { %v1762_v14 = vadd.f32 %v1761_v9, %v1760_v6  ;;  %v1873_v15 = vpop.f32.mrb[45].mxu1  ;;  %1263 = vmax.xlane.f32.xlu0 %v2597_v11  ;;  %v1763_v16 = vpop.f32.mrb[46].mxu0 }
 0x151   :  { %v1874_v17 = vadd.f32 %v1873_v15, %v1872_v8  ;;  %v1875_v18 = vpop.f32.mrb[46].mxu1  ;;  %v1764_v20 = vpop.f32.mrb[47].mxu0  ;;  %v2603_v22 = vsel %vm1190_vm0, %v1177_v13, -1e+30 }
 0x152   :  { %v1765_v23 = vadd.f32 %v1764_v20, %v1763_v16  ;;  %v1876_v26 = vpop.f32.mrb[47].mxu1  ;;  %1265 = vmax.xlane.f32.xlu1 %v2603_v22 }
 0x153   :  { %v1012_v27 = vadd.f32 %v1874_v17, %v1762_v14  ;;  %v1877_v28 = vadd.f32 %v1876_v26, %v1875_v18 }
 0x155   :  { %v1015_v29 = vadd.f32 %v1877_v28, %v1765_v23  ;;  %v1178_v31 = vadd.f32 %v2471_v45, %v1012_v27 }
 0x156   :  { %v1766_v32 = vpop.f32.mrb[48].mxu0 }
 0x157   :  { %v1878_v34 = vpop.f32.mrb[48].mxu1  ;;  %v1767_v36 = vpop.f32.mrb[49].mxu0  ;;  %v2609_v37 = vsel %vm1190_vm0, %v1178_v31, -1e+30  ;;  %v1179_v38 = vadd.f32 %v2471_v45, %v1015_v29 }
 0x158   :  { %v1768_v40 = vadd.f32 %v1767_v36, %v1766_v32  ;;  %v1879_v41 = vpop.f32.mrb[49].mxu1  ;;  %1267 = vmax.xlane.f32.xlu0 %v2609_v37  ;;  %v1769_v43 = vpop.f32.mrb[50].mxu0 }
 0x159   :  { %v1880_v46 = vadd.f32 %v1879_v41, %v1878_v34  ;;  %v1881_v47 = vpop.f32.mrb[50].mxu1  ;;  %v1770_v48 = vpop.f32.mrb[51].mxu0  ;;  %v2615_v50 = vsel %vm1190_vm0, %v1179_v38, -1e+30 }
 0x15a   :  { %v1771_v51 = vadd.f32 %v1770_v48, %v1769_v43  ;;  %v1882_v55 = vpop.f32.mrb[51].mxu1  ;;  %1269 = vmax.xlane.f32.xlu1 %v2615_v50 }
 0x15b   :  { %v1020_v56 = vadd.f32 %v1880_v46, %v1768_v40  ;;  %v1883_v57 = vadd.f32 %v1882_v55, %v1881_v47 }
 0x15d   :  { %v1023_v58 = vadd.f32 %v1883_v57, %v1771_v51  ;;  %v1180_v59 = vadd.f32 %v2471_v45, %v1020_v56 }
 0x15e   :  { %v1772_v61 = vpop.f32.mrb[52].mxu0 }
 0x15f   :  { %v1884_v62 = vpop.f32.mrb[52].mxu1  ;;  %v1773_v63 = vpop.f32.mrb[53].mxu0  ;;  %v2621_v3 = vsel %vm1190_vm0, %v1180_v59, -1e+30  ;;  %v1181_v4 = vadd.f32 %v2471_v45, %v1023_v58 }
 0x160   :  { %v1774_v5 = vadd.f32 %v1773_v63, %v1772_v61  ;;  %v1885_v6 = vpop.f32.mrb[53].mxu1  ;;  %1271 = vmax.xlane.f32.xlu0 %v2621_v3  ;;  %v1775_v8 = vpop.f32.mrb[54].mxu0 }
 0x161   :  { %v1886_v9 = vadd.f32 %v1885_v6, %v1884_v62  ;;  %v1887_v13 = vpop.f32.mrb[54].mxu1  ;;  %v1776_v14 = vpop.f32.mrb[55].mxu0  ;;  %v2627_v15 = vsel %vm1190_vm0, %v1181_v4, -1e+30 }
 0x162   :  { %v1777_v16 = vadd.f32 %v1776_v14, %v1775_v8  ;;  %v1888_v17 = vpop.f32.mrb[55].mxu1  ;;  %1273 = vmax.xlane.f32.xlu1 %v2627_v15 }
 0x163   :  { %v1028_v18 = vadd.f32 %v1886_v9, %v1774_v5  ;;  %v1889_v20 = vadd.f32 %v1888_v17, %v1887_v13 }
 0x165   :  { %v1031_v23 = vadd.f32 %v1889_v20, %v1777_v16  ;;  %v1182_v26 = vadd.f32 %v2471_v45, %v1028_v18 }
 0x166   :  { %v1778_v27 = vpop.f32.mrb[56].mxu0 }
 0x167   :  { %v1890_v28 = vpop.f32.mrb[56].mxu1  ;;  %v1779_v29 = vpop.f32.mrb[57].mxu0  ;;  %v2633_v31 = vsel %vm1190_vm0, %v1182_v26, -1e+30  ;;  %v1183_v32 = vadd.f32 %v2471_v45, %v1031_v23 }
 0x168   :  { %v1780_v34 = vadd.f32 %v1779_v29, %v1778_v27  ;;  %v1891_v36 = vpop.f32.mrb[57].mxu1  ;;  %1275 = vmax.xlane.f32.xlu0 %v2633_v31  ;;  %v1781_v38 = vpop.f32.mrb[58].mxu0 }
 0x169   :  { %v1892_v40 = vadd.f32 %v1891_v36, %v1890_v28  ;;  %v1893_v41 = vpop.f32.mrb[58].mxu1  ;;  %v1782_v43 = vpop.f32.mrb[59].mxu0  ;;  %v2639_v46 = vsel %vm1190_vm0, %v1183_v32, -1e+30 }
 0x16a   :  { %v1783_v47 = vadd.f32 %v1782_v43, %v1781_v38  ;;  %v1894_v48 = vpop.f32.mrb[59].mxu1  ;;  %1277 = vmax.xlane.f32.xlu1 %v2639_v46 }
 0x16b   :  { %v1036_v51 = vadd.f32 %v1892_v40, %v1780_v34  ;;  %v1895_v55 = vadd.f32 %v1894_v48, %v1893_v41 }
 0x16d   :  { %v1039_v56 = vadd.f32 %v1895_v55, %v1783_v47  ;;  %v1184_v57 = vadd.f32 %v2471_v45, %v1036_v51 }
 0x16e   :  { %v1784_v58 = vpop.f32.mrb[60].mxu0 }
 0x16f   :  { %v1896_v59 = vpop.f32.mrb[60].mxu1  ;;  %v1785_v61 = vpop.f32.mrb[61].mxu0  ;;  %v2645_v62 = vsel %vm1190_vm0, %v1184_v57, -1e+30  ;;  %v1185_v63 = vadd.f32 %v2471_v45, %v1039_v56 }
 0x170   :  { %v1786_v4 = vadd.f32 %v1785_v61, %v1784_v58  ;;  %v1897_v5 = vpop.f32.mrb[61].mxu1  ;;  %1279 = vmax.xlane.f32.xlu0 %v2645_v62  ;;  %v1787_v6 = vpop.f32.mrb[62].mxu0 }
 0x171   :  { %v1898_v8 = vadd.f32 %v1897_v5, %v1896_v59  ;;  %v1899_v9 = vpop.f32.mrb[62].mxu1  ;;  %v1788_v13 = vpop.f32.mrb[63].mxu0  ;;  %v2651_v14 = vsel %vm1190_vm0, %v1185_v63, -1e+30 }
 0x172   :  { %v1789_v16 = vadd.f32 %v1788_v13, %v1787_v6  ;;  %v1900_v17 = vpop.f32.mrb[63].mxu1  ;;  %1281 = vmax.xlane.f32.xlu1 %v2651_v14 }
 0x173   :  { %v1044_v18 = vadd.f32 %v1898_v8, %v1786_v4  ;;  %v1901_v20 = vadd.f32 %v1900_v17, %v1899_v9 }
 0x175   :  { %v1047_v23 = vadd.f32 %v1901_v20, %v1789_v16  ;;  %v1186_v26 = vadd.f32 %v2471_v45, %v1044_v18 }
 0x177   :  { %v2657_v27 = vsel %vm1190_vm0, %v1186_v26, -1e+30  ;;  %v1187_v28 = vadd.f32 %v2471_v45, %v1047_v23 }
 0x178   :  { %1283 = vmax.xlane.f32.xlu0 %v2657_v27 }
 0x179   :  { %v2663_v29 = vsel %vm1190_vm0, %v1187_v28, -1e+30 }
 0x17a   :  { %1285 = vmax.xlane.f32.xlu1 %v2663_v29 }
 0x18d   :  { %v1224_v32 = vpop.xlane.xlu0 %1223 }
 0x18e   :  { %v2667_v34 = vsub.f32 %v2477_v53, %v1224_v32 }
 0x190   :  { %v1319_v36 = vmul.f32 1.442695, %v2667_v34 }
 0x191   :  { %v1226_v38 = vpop.xlane.xlu0 %1225 }
 0x192   :  { %2030 = vpow2.f32 %v1319_v36  ;;  %v2671_v40 = vsub.f32 %v2483_v1, %v1226_v38 }
 0x194   :  { %v1321_v45 = vmul.f32 1.442695, %v2671_v40 }
 0x195   :  { %v1228_v41 = vpop.xlane.xlu1 %1227 }
 0x196   :  { %2032 = vpow2.f32 %v1321_v45  ;;  %v2675_v39 = vsub.f32 %v2489_v7, %v1228_v41 }
 0x198   :  { %v1323_v43 = vmul.f32 1.442695, %v2675_v39 }
 0x199   :  { %v1230_v47 = vpop.xlane.xlu1 %1229 }
 0x19a   :  { %2034 = vpow2.f32 %v1323_v43  ;;  %v2679_v53 = vsub.f32 %v2495_v19, %v1230_v47 }
 0x19c   :  { %v2031_v48 = vpop.eup %2030  ;;  %v1325_v51 = vmul.f32 1.442695, %v2679_v53 }
 0x19d   :  { %1383 = vadd.xlane.f32.xlu0 %v2031_v48  ;;  %v1232_v1 = vpop.xlane.xlu0 %1231 }
 0x19e   :  { %2036 = vpow2.f32 %v1325_v51  ;;  %v2683_v55 = vsub.f32 %v2501_v25, %v1232_v1 }
 0x19f   :  { %v1234_v56 = vpop.xlane.xlu1 %1233 }
 0x1a0   :  { %v2033_v57 = vpop.eup %2032  ;;  %v1327_v7 = vmul.f32 1.442695, %v2683_v55  ;;  %v2687_v58 = vsub.f32 %v2507_v33, %v1234_v56 }
 0x1a1   :  { %1385 = vadd.xlane.f32.xlu1 %v2033_v57 }
 0x1a2   :  { %2038 = vpow2.f32 %v1327_v7  ;;  %v1329_v19 = vmul.f32 1.442695, %v2687_v58 }
 0x1a4   :  { %v2035_v59 = vpop.eup %2034  ;;  %2040 = vpow2.f32 %v1329_v19 }
 0x1a5   :  { %1387 = vadd.xlane.f32.xlu0 %v2035_v59  ;;  %v1236_v61 = vpop.xlane.xlu0 %1235 }
 0x1a6   :  { %v2691_v63 = vsub.f32 %v2513_v44, %v1236_v61 }
 0x1a7   :  { %v1238_v25 = vpop.xlane.xlu1 %1237 }
 0x1a8   :  { %v2037_v4 = vpop.eup %2036  ;;  %v1331_v5 = vmul.f32 1.442695, %v2691_v63  ;;  %v2695_v6 = vsub.f32 %v2519_v54, %v1238_v25 }
 0x1a9   :  { %1389 = vadd.xlane.f32.xlu1 %v2037_v4 }
 0x1aa   :  { %2042 = vpow2.f32 %v1331_v5  ;;  %v1333_v33 = vmul.f32 1.442695, %v2695_v6 }
 0x1ac   :  { %v2039_v8 = vpop.eup %2038  ;;  %2044 = vpow2.f32 %v1333_v33 }
 0x1ad   :  { %1391 = vadd.xlane.f32.xlu0 %v2039_v8  ;;  %v1240_v9 = vpop.xlane.xlu0 %1239 }
 0x1ae   :  { %v2041_v13 = vpop.eup %2040  ;;  %v2699_v16 = vsub.f32 %v2525_v0, %v1240_v9 }
 0x1af   :  { %v1242_v44 = vpop.xlane.xlu1 %1241  ;;  %1393 = vadd.xlane.f32.xlu1 %v2041_v13 }
 0x1b0   :  { %v1335_v17 = vmul.f32 1.442695, %v2699_v16  ;;  %v2703_v18 = vsub.f32 %v2531_v10, %v1242_v44 }
 0x1b2   :  { %2046 = vpow2.f32 %v1335_v17  ;;  %v1337_v54 = vmul.f32 1.442695, %v2703_v18 }
 0x1b4   :  { %v2043_v20 = vpop.eup %2042  ;;  %2048 = vpow2.f32 %v1337_v54 }
 0x1b5   :  { %1395 = vadd.xlane.f32.xlu0 %v2043_v20  ;;  %v1244_v23 = vpop.xlane.xlu0 %1243 }
 0x1b6   :  { %v2045_v26 = vpop.eup %2044  ;;  %v2707_v28 = vsub.f32 %v2537_v21, %v1244_v23 }
 0x1b7   :  { %v1246_v0 = vpop.xlane.xlu1 %1245  ;;  %1397 = vadd.xlane.f32.xlu1 %v2045_v26 }
 0x1b8   :  { %v1339_v32 = vmul.f32 1.442695, %v2707_v28  ;;  %v2711_v36 = vsub.f32 %v2543_v30, %v1246_v0 }
 0x1ba   :  { %2050 = vpow2.f32 %v1339_v32  ;;  %v1341_v10 = vmul.f32 1.442695, %v2711_v36 }
 0x1bc   :  { %v2047_v38 = vpop.eup %2046  ;;  %2052 = vpow2.f32 %v1341_v10 }
 0x1bd   :  { %1399 = vadd.xlane.f32.xlu0 %v2047_v38  ;;  %v1248_v45 = vpop.xlane.xlu0 %1247 }
 0x1be   :  { %v2049_v41 = vpop.eup %2048  ;;  %v2715_v43 = vsub.f32 %v2549_v42, %v1248_v45 }
 0x1bf   :  { %v1250_v21 = vpop.xlane.xlu1 %1249  ;;  %1401 = vadd.xlane.f32.xlu1 %v2049_v41 }
 0x1c0   :  { %v1343_v47 = vmul.f32 1.442695, %v2715_v43  ;;  %v2719_v48 = vsub.f32 %v2555_v52, %v1250_v21 }
 0x1c2   :  { %2054 = vpow2.f32 %v1343_v47  ;;  %v1345_v30 = vmul.f32 1.442695, %v2719_v48 }
 0x1c4   :  { %v2051_v51 = vpop.eup %2050  ;;  %2056 = vpow2.f32 %v1345_v30 }
 0x1c5   :  { %1403 = vadd.xlane.f32.xlu0 %v2051_v51  ;;  %v1252_v1 = vpop.xlane.xlu0 %1251 }
 0x1c6   :  { %v2053_v56 = vpop.eup %2052  ;;  %v2723_v57 = vsub.f32 %v2561_v2, %v1252_v1 }
 0x1c7   :  { %v1254_v42 = vpop.xlane.xlu1 %1253  ;;  %1405 = vadd.xlane.f32.xlu1 %v2053_v56 }
 0x1c8   :  { %v1347_v7 = vmul.f32 1.442695, %v2723_v57  ;;  %v2727_v19 = vsub.f32 %v2567_v12, %v1254_v42 }
 0x1ca   :  { %2058 = vpow2.f32 %v1347_v7  ;;  %v1349_v52 = vmul.f32 1.442695, %v2727_v19 }
 0x1cc   :  { %v2055_v59 = vpop.eup %2054  ;;  %2060 = vpow2.f32 %v1349_v52 }
 0x1cd   :  { %1407 = vadd.xlane.f32.xlu0 %v2055_v59  ;;  %v1256_v61 = vpop.xlane.xlu0 %1255 }
 0x1ce   :  { %v2057_v25 = vpop.eup %2056  ;;  %v2731_v4 = vsub.f32 %v2573_v24, %v1256_v61 }
 0x1cf   :  { %v1258_v2 = vpop.xlane.xlu1 %1257  ;;  %1409 = vadd.xlane.f32.xlu1 %v2057_v25 }
 0x1d0   :  { %v1351_v5 = vmul.f32 1.442695, %v2731_v4  ;;  %v2735_v33 = vsub.f32 %v2579_v35, %v1258_v2 }
 0x1d2   :  { %2062 = vpow2.f32 %v1351_v5  ;;  %v1353_v12 = vmul.f32 1.442695, %v2735_v33 }
 0x1d4   :  { %v2059_v8 = vpop.eup %2058  ;;  %2064 = vpow2.f32 %v1353_v12 }
 0x1d5   :  { %1411 = vadd.xlane.f32.xlu0 %v2059_v8  ;;  %v1260_v9 = vpop.xlane.xlu0 %1259 }
 0x1d6   :  { %v2061_v13 = vpop.eup %2060  ;;  %v2739_v44 = vsub.f32 %v2585_v49, %v1260_v9 }
 0x1d7   :  { %v1262_v24 = vpop.xlane.xlu1 %1261  ;;  %1413 = vadd.xlane.f32.xlu1 %v2061_v13 }
 0x1d8   :  { %v1355_v17 = vmul.f32 1.442695, %v2739_v44  ;;  %v2743_v54 = vsub.f32 %v2591_v60, %v1262_v24 }
 0x1da   :  { %2066 = vpow2.f32 %v1355_v17  ;;  %v1357_v35 = vmul.f32 1.442695, %v2743_v54 }
 0x1dc   :  { %v2063_v20 = vpop.eup %2062  ;;  %2068 = vpow2.f32 %v1357_v35 }
 0x1dd   :  { %1415 = vadd.xlane.f32.xlu0 %v2063_v20  ;;  %v1264_v23 = vpop.xlane.xlu0 %1263 }
 0x1de   :  { %v2065_v26 = vpop.eup %2064  ;;  %v2747_v0 = vsub.f32 %v2597_v11, %v1264_v23 }
 0x1df   :  { %v1266_v49 = vpop.xlane.xlu1 %1265  ;;  %1417 = vadd.xlane.f32.xlu1 %v2065_v26 }
 0x1e0   :  { %v1359_v32 = vmul.f32 1.442695, %v2747_v0  ;;  %v2751_v10 = vsub.f32 %v2603_v22, %v1266_v49 }
 0x1e2   :  { %2070 = vpow2.f32 %v1359_v32  ;;  %v1361_v60 = vmul.f32 1.442695, %v2751_v10 }
 0x1e4   :  { %v2067_v38 = vpop.eup %2066  ;;  %2072 = vpow2.f32 %v1361_v60 }
 0x1e5   :  { %1419 = vadd.xlane.f32.xlu0 %v2067_v38  ;;  %v1268_v45 = vpop.xlane.xlu0 %1267 }
 0x1e6   :  { %v2069_v41 = vpop.eup %2068  ;;  %v2755_v21 = vsub.f32 %v2609_v37, %v1268_v45 }
 0x1e7   :  { %v1270_v11 = vpop.xlane.xlu1 %1269  ;;  %1421 = vadd.xlane.f32.xlu1 %v2069_v41 }
 0x1e8   :  { %v1363_v47 = vmul.f32 1.442695, %v2755_v21  ;;  %v2759_v30 = vsub.f32 %v2615_v50, %v1270_v11 }
 0x1ea   :  { %2074 = vpow2.f32 %v1363_v47  ;;  %v1365_v22 = vmul.f32 1.442695, %v2759_v30 }
 0x1ec   :  { %v2071_v51 = vpop.eup %2070  ;;  %2076 = vpow2.f32 %v1365_v22 }
 0x1ed   :  { %1423 = vadd.xlane.f32.xlu0 %v2071_v51  ;;  %v1272_v1 = vpop.xlane.xlu0 %1271 }
 0x1ee   :  { %v2073_v56 = vpop.eup %2072  ;;  %v2763_v42 = vsub.f32 %v2621_v3, %v1272_v1 }
 0x1ef   :  { %v1274_v37 = vpop.xlane.xlu1 %1273  ;;  %1425 = vadd.xlane.f32.xlu1 %v2073_v56 }
 0x1f0   :  { %v1367_v7 = vmul.f32 1.442695, %v2763_v42  ;;  %v2767_v52 = vsub.f32 %v2627_v15, %v1274_v37 }
 0x1f2   :  { %2078 = vpow2.f32 %v1367_v7  ;;  %v1369_v50 = vmul.f32 1.442695, %v2767_v52 }
 0x1f4   :  { %v2075_v59 = vpop.eup %2074  ;;  %2080 = vpow2.f32 %v1369_v50 }
 0x1f5   :  { %1427 = vadd.xlane.f32.xlu0 %v2075_v59  ;;  %v1276_v61 = vpop.xlane.xlu0 %1275 }
 0x1f6   :  { %v2077_v25 = vpop.eup %2076  ;;  %v2771_v2 = vsub.f32 %v2633_v31, %v1276_v61 }
 0x1f7   :  { %v1278_v3 = vpop.xlane.xlu1 %1277  ;;  %1429 = vadd.xlane.f32.xlu1 %v2077_v25 }
 0x1f8   :  { %v1371_v5 = vmul.f32 1.442695, %v2771_v2  ;;  %v2775_v12 = vsub.f32 %v2639_v46, %v1278_v3 }
 0x1fa   :  { %2082 = vpow2.f32 %v1371_v5  ;;  %v1373_v15 = vmul.f32 1.442695, %v2775_v12 }
 0x1fc   :  { %v2079_v8 = vpop.eup %2078  ;;  %2084 = vpow2.f32 %v1373_v15 }
 0x1fd   :  { %1431 = vadd.xlane.f32.xlu0 %v2079_v8  ;;  %v1280_v9 = vpop.xlane.xlu0 %1279 }
 0x1fe   :  { %v2081_v13 = vpop.eup %2080  ;;  %v2779_v24 = vsub.f32 %v2645_v62, %v1280_v9 }
 0x1ff   :  { %v1282_v31 = vpop.xlane.xlu1 %1281  ;;  %1433 = vadd.xlane.f32.xlu1 %v2081_v13 }
 0x200   :  { %v1375_v17 = vmul.f32 1.442695, %v2779_v24  ;;  %v2783_v35 = vsub.f32 %v2651_v14, %v1282_v31 }
 0x202   :  { %2086 = vpow2.f32 %v1375_v17  ;;  %v1377_v46 = vmul.f32 1.442695, %v2783_v35 }
 0x204   :  { %v2083_v20 = vpop.eup %2082  ;;  %2088 = vpow2.f32 %v1377_v46 }
 0x205   :  { %1435 = vadd.xlane.f32.xlu0 %v2083_v20  ;;  %v1284_v23 = vpop.xlane.xlu0 %1283 }
 0x206   :  { %v2085_v26 = vpop.eup %2084  ;;  %v2787_v49 = vsub.f32 %v2657_v27, %v1284_v23 }
 0x207   :  { %v1286_v62 = vpop.xlane.xlu1 %1285  ;;  %1437 = vadd.xlane.f32.xlu1 %v2085_v26 }
 0x208   :  { %v1379_v32 = vmul.f32 1.442695, %v2787_v49  ;;  %v2791_v60 = vsub.f32 %v2663_v29, %v1286_v62 }
 0x20a   :  { %2090 = vpow2.f32 %v1379_v32  ;;  %v1381_v14 = vmul.f32 1.442695, %v2791_v60 }
 0x20c   :  { %v2087_v38 = vpop.eup %2086  ;;  %2092 = vpow2.f32 %v1381_v14 }
 0x20d   :  { %1439 = vadd.xlane.f32.xlu0 %v2087_v38 }
 0x20e   :  { %v2089_v45 = vpop.eup %2088 }
 0x20f   :  { %1441 = vadd.xlane.f32.xlu1 %v2089_v45 }
 0x214   :  { %v2091_v41 = vpop.eup %2090 }
 0x215   :  { %1443 = vadd.xlane.f32.xlu0 %v2091_v41 }
 0x216   :  { %v2093_v11 = vpop.eup %2092 }
 0x217   :  { %1445 = vadd.xlane.f32.xlu1 %v2093_v11 }
 0x22a   :  { %v1384_v27 = vpop.xlane.xlu0 %1383 }
 0x22b   :  { %2094 = vlog2.f32 %v1384_v27 }
 0x22e   :  { %v1386_v47 = vpop.xlane.xlu1 %1385 }
 0x22f   :  { %2096 = vlog2.f32 %v1386_v47 }
 0x232   :  { %v1388_v22 = vpop.xlane.xlu0 %1387 }
 0x233   :  { %2098 = vlog2.f32 %v1388_v22 }
 0x235   :  { %v2095_v29 = vpop.eup %2094 }
 0x236   :  { %v1448_v51 = vmul.f32 0.6931472, %v2095_v29  ;;  %v1390_v1 = vpop.xlane.xlu1 %1389 }
 0x237   :  { %2100 = vlog2.f32 %v1390_v1 }
 0x238   :  { %v1511_v56 = vsub.f32 %v2667_v34, %v1448_v51 }
 0x239   :  { %v2097_v37 = vpop.eup %2096 }
 0x23a   :  { %1543 = vst [vmem:[%s2925_s3] sm:$0xff] %v1511_v56  ;;  %v1450_v7 = vmul.f32 0.6931472, %v2097_v37  ;;  %v1392_v50 = vpop.xlane.xlu0 %1391 }
 0x23b   :  { %2102 = vlog2.f32 %v1392_v50 }
 0x23c   :  { %v1512_v59 = vsub.f32 %v2671_v40, %v1450_v7  ;;  %v1394_v61 = vpop.xlane.xlu1 %1393 }
 0x23d   :  { %v2099_v25 = vpop.eup %2098  ;;  %2104 = vlog2.f32 %v1394_v61 }
 0x23e   :  { %1544 = vst [vmem:[%s2925_s3 + $0x8] sm:$0xff] %v1512_v59  ;;  %v1452_v3 = vmul.f32 0.6931472, %v2099_v25 }
 0x240   :  { %v1513_v34 = vsub.f32 %v2675_v39, %v1452_v3 }
 0x241   :  { %v2101_v5 = vpop.eup %2100 }
 0x242   :  { %1545 = vst [vmem:[%s2925_s3 + $0x10] sm:$0xff] %v1513_v34  ;;  %v1454_v15 = vmul.f32 0.6931472, %v2101_v5  ;;  %v1396_v8 = vpop.xlane.xlu0 %1395 }
 0x243   :  { %2106 = vlog2.f32 %v1396_v8 }
 0x244   :  { %v1514_v40 = vsub.f32 %v2679_v53, %v1454_v15  ;;  %v1398_v9 = vpop.xlane.xlu1 %1397 }
 0x245   :  { %v2103_v13 = vpop.eup %2102  ;;  %2108 = vlog2.f32 %v1398_v9 }
 0x246   :  { %1546 = vst [vmem:[%s2925_s3 + $0x18] sm:$0xff] %v1514_v40  ;;  %v1456_v31 = vmul.f32 0.6931472, %v2103_v13 }
 0x247   :  { %v2105_v17 = vpop.eup %2104 }
 0x248   :  { %v1515_v39 = vsub.f32 %v2683_v55, %v1456_v31  ;;  %v1458_v46 = vmul.f32 0.6931472, %v2105_v17 }
 0x24a   :  { %1547 = vst [vmem:[%s2925_s3 + $0x20] sm:$0xff] %v1515_v39  ;;  %v1516_v20 = vsub.f32 %v2687_v58, %v1458_v46  ;;  %v1400_v23 = vpop.xlane.xlu0 %1399 }
 0x24b   :  { %2110 = vlog2.f32 %v1400_v23 }
 0x24c   :  { %1548 = vst [vmem:[%s2925_s3 + $0x28] sm:$0xff] %v1516_v20  ;;  %v1402_v53 = vpop.xlane.xlu1 %1401 }
 0x24d   :  { %v2107_v26 = vpop.eup %2106  ;;  %2112 = vlog2.f32 %v1402_v53 }
 0x24e   :  { %v1460_v62 = vmul.f32 0.6931472, %v2107_v26 }
 0x24f   :  { %v2109_v32 = vpop.eup %2108 }
 0x250   :  { %v1517_v55 = vsub.f32 %v2691_v63, %v1460_v62  ;;  %v1462_v14 = vmul.f32 0.6931472, %v2109_v32 }
 0x252   :  { %1549 = vst [vmem:[%s2925_s3 + $0x30] sm:$0xff] %v1517_v55  ;;  %v1518_v58 = vsub.f32 %v2695_v6, %v1462_v14  ;;  %v1404_v38 = vpop.xlane.xlu0 %1403 }
 0x253   :  { %2114 = vlog2.f32 %v1404_v38 }
 0x254   :  { %1550 = vst [vmem:[%s2925_s3 + $0x38] sm:$0xff] %v1518_v58  ;;  %v1406_v45 = vpop.xlane.xlu1 %1405 }
 0x255   :  { %v2111_v41 = vpop.eup %2110  ;;  %2116 = vlog2.f32 %v1406_v45 }
 0x256   :  { %v1464_v11 = vmul.f32 0.6931472, %v2111_v41 }
 0x257   :  { %v2113_v27 = vpop.eup %2112 }
 0x258   :  { %v1519_v63 = vsub.f32 %v2699_v16, %v1464_v11  ;;  %v1466_v47 = vmul.f32 0.6931472, %v2113_v27 }
 0x25a   :  { %1551 = vst [vmem:[%s2925_s3 + $0x40] sm:$0xff] %v1519_v63  ;;  %v1520_v6 = vsub.f32 %v2703_v18, %v1466_v47  ;;  %v1408_v22 = vpop.xlane.xlu0 %1407 }
 0x25b   :  { %2118 = vlog2.f32 %v1408_v22 }
 0x25c   :  { %1552 = vst [vmem:[%s2925_s3 + $0x48] sm:$0xff] %v1520_v6  ;;  %v1410_v29 = vpop.xlane.xlu1 %1409 }
 0x25d   :  { %v2115_v51 = vpop.eup %2114  ;;  %2120 = vlog2.f32 %v1410_v29 }
 0x25e   :  { %v1468_v1 = vmul.f32 0.6931472, %v2115_v51 }
 0x25f   :  { %v2117_v56 = vpop.eup %2116 }
 0x260   :  { %v1521_v16 = vsub.f32 %v2707_v28, %v1468_v1  ;;  %v1470_v37 = vmul.f32 0.6931472, %v2117_v56 }
 0x262   :  { %1553 = vst [vmem:[%s2925_s3 + $0x50] sm:$0xff] %v1521_v16  ;;  %v1522_v18 = vsub.f32 %v2711_v36, %v1470_v37  ;;  %v1412_v7 = vpop.xlane.xlu0 %1411 }
 0x263   :  { %2122 = vlog2.f32 %v1412_v7 }
 0x264   :  { %1554 = vst [vmem:[%s2925_s3 + $0x58] sm:$0xff] %v1522_v18  ;;  %v1414_v50 = vpop.xlane.xlu1 %1413 }
 0x265   :  { %v2119_v59 = vpop.eup %2118  ;;  %2124 = vlog2.f32 %v1414_v50 }
 0x266   :  { %v1472_v61 = vmul.f32 0.6931472, %v2119_v59 }
 0x267   :  { %v2121_v25 = vpop.eup %2120 }
 0x268   :  { %v1523_v28 = vsub.f32 %v2715_v43, %v1472_v61  ;;  %v1474_v3 = vmul.f32 0.6931472, %v2121_v25 }
 0x26a   :  { %1555 = vst [vmem:[%s2925_s3 + $0x60] sm:$0xff] %v1523_v28  ;;  %v1524_v36 = vsub.f32 %v2719_v48, %v1474_v3  ;;  %v1416_v34 = vpop.xlane.xlu0 %1415 }
 0x26b   :  { %2126 = vlog2.f32 %v1416_v34 }
 0x26c   :  { %1556 = vst [vmem:[%s2925_s3 + $0x68] sm:$0xff] %v1524_v36  ;;  %v1418_v5 = vpop.xlane.xlu1 %1417 }
 0x26d   :  { %v2123_v15 = vpop.eup %2122  ;;  %2128 = vlog2.f32 %v1418_v5 }
 0x26e   :  { %v1476_v8 = vmul.f32 0.6931472, %v2123_v15 }
 0x26f   :  { %v2125_v40 = vpop.eup %2124 }
 0x270   :  { %v1525_v43 = vsub.f32 %v2723_v57, %v1476_v8  ;;  %v1478_v9 = vmul.f32 0.6931472, %v2125_v40 }
 0x272   :  { %1557 = vst [vmem:[%s2925_s3 + $0x70] sm:$0xff] %v1525_v43  ;;  %v1526_v48 = vsub.f32 %v2727_v19, %v1478_v9  ;;  %v1420_v13 = vpop.xlane.xlu0 %1419 }
 0x273   :  { %2130 = vlog2.f32 %v1420_v13 }
 0x274   :  { %1558 = vst [vmem:[%s2925_s3 + $0x78] sm:$0xff] %v1526_v48  ;;  %v1422_v31 = vpop.xlane.xlu1 %1421 }
 0x275   :  { %v2127_v17 = vpop.eup %2126  ;;  %2132 = vlog2.f32 %v1422_v31 }
 0x276   :  { %v1480_v39 = vmul.f32 0.6931472, %v2127_v17 }
 0x277   :  { %v2129_v46 = vpop.eup %2128 }
 0x278   :  { %v1527_v57 = vsub.f32 %v2731_v4, %v1480_v39  ;;  %v1482_v20 = vmul.f32 0.6931472, %v2129_v46 }
 0x27a   :  { %1559 = vst [vmem:[%s2925_s3 + $0x80] sm:$0xff] %v1527_v57  ;;  %v1528_v19 = vsub.f32 %v2735_v33, %v1482_v20  ;;  %v1424_v23 = vpop.xlane.xlu0 %1423 }
 0x27b   :  { %2134 = vlog2.f32 %v1424_v23 }
 0x27c   :  { %1560 = vst [vmem:[%s2925_s3 + $0x88] sm:$0xff] %v1528_v19  ;;  %v1426_v53 = vpop.xlane.xlu1 %1425 }
 0x27d   :  { %v2131_v26 = vpop.eup %2130  ;;  %2136 = vlog2.f32 %v1426_v53 }
 0x27e   :  { %v1484_v62 = vmul.f32 0.6931472, %v2131_v26 }
 0x27f   :  { %v2133_v32 = vpop.eup %2132 }
 0x280   :  { %v1529_v4 = vsub.f32 %v2739_v44, %v1484_v62  ;;  %v1486_v55 = vmul.f32 0.6931472, %v2133_v32 }
 0x282   :  { %1561 = vst [vmem:[%s2925_s3 + $0x90] sm:$0xff] %v1529_v4  ;;  %v1530_v33 = vsub.f32 %v2743_v54, %v1486_v55  ;;  %v1428_v14 = vpop.xlane.xlu0 %1427 }
 0x283   :  { %2138 = vlog2.f32 %v1428_v14 }
 0x284   :  { %1562 = vst [vmem:[%s2925_s3 + $0x98] sm:$0xff] %v1530_v33  ;;  %v1430_v58 = vpop.xlane.xlu1 %1429 }
 0x285   :  { %v2135_v38 = vpop.eup %2134  ;;  %2140 = vlog2.f32 %v1430_v58 }
 0x286   :  { %v1488_v45 = vmul.f32 0.6931472, %v2135_v38 }
 0x287   :  { %v2137_v41 = vpop.eup %2136 }
 0x288   :  { %v1531_v44 = vsub.f32 %v2747_v0, %v1488_v45  ;;  %v1490_v11 = vmul.f32 0.6931472, %v2137_v41 }
 0x28a   :  { %1563 = vst [vmem:[%s2925_s3 + $0xa0] sm:$0xff] %v1531_v44  ;;  %v1532_v54 = vsub.f32 %v2751_v10, %v1490_v11  ;;  %v1432_v27 = vpop.xlane.xlu0 %1431 }
 0x28b   :  { %2142 = vlog2.f32 %v1432_v27 }
 0x28c   :  { %1564 = vst [vmem:[%s2925_s3 + $0xa8] sm:$0xff] %v1532_v54  ;;  %v1434_v63 = vpop.xlane.xlu1 %1433 }
 0x28d   :  { %v2139_v47 = vpop.eup %2138  ;;  %2144 = vlog2.f32 %v1434_v63 }
 0x28e   :  { %v1492_v6 = vmul.f32 0.6931472, %v2139_v47 }
 0x28f   :  { %v2141_v22 = vpop.eup %2140 }
 0x290   :  { %v1533_v0 = vsub.f32 %v2755_v21, %v1492_v6  ;;  %v1494_v29 = vmul.f32 0.6931472, %v2141_v22 }
 0x292   :  { %1565 = vst [vmem:[%s2925_s3 + $0xb0] sm:$0xff] %v1533_v0  ;;  %v1534_v10 = vsub.f32 %v2759_v30, %v1494_v29  ;;  %v1436_v51 = vpop.xlane.xlu0 %1435 }
 0x293   :  { %2146 = vlog2.f32 %v1436_v51 }
 0x294   :  { %1566 = vst [vmem:[%s2925_s3 + $0xb8] sm:$0xff] %v1534_v10  ;;  %v1438_v1 = vpop.xlane.xlu1 %1437 }
 0x295   :  { %v2143_v56 = vpop.eup %2142  ;;  %2148 = vlog2.f32 %v1438_v1 }
 0x296   :  { %v1496_v16 = vmul.f32 0.6931472, %v2143_v56 }
 0x297   :  { %v2145_v37 = vpop.eup %2144 }
 0x298   :  { %v1535_v21 = vsub.f32 %v2763_v42, %v1496_v16  ;;  %v1498_v18 = vmul.f32 0.6931472, %v2145_v37 }
 0x29a   :  { %1567 = vst [vmem:[%s2925_s3 + $0xc0] sm:$0xff] %v1535_v21  ;;  %v1536_v30 = vsub.f32 %v2767_v52, %v1498_v18  ;;  %v1440_v7 = vpop.xlane.xlu0 %1439 }
 0x29b   :  { %2150 = vlog2.f32 %v1440_v7 }
 0x29c   :  { %1568 = vst [vmem:[%s2925_s3 + $0xc8] sm:$0xff] %v1536_v30  ;;  %v1442_v50 = vpop.xlane.xlu1 %1441 }
 0x29d   :  { %v2147_v59 = vpop.eup %2146  ;;  %2152 = vlog2.f32 %v1442_v50 }
 0x29e   :  { %v1500_v61 = vmul.f32 0.6931472, %v2147_v59 }
 0x29f   :  { %v2149_v25 = vpop.eup %2148 }
 0x2a0   :  { %v1537_v42 = vsub.f32 %v2771_v2, %v1500_v61  ;;  %v1502_v28 = vmul.f32 0.6931472, %v2149_v25 }
 0x2a2   :  { %1569 = vst [vmem:[%s2925_s3 + $0xd0] sm:$0xff] %v1537_v42  ;;  %v1538_v52 = vsub.f32 %v2775_v12, %v1502_v28  ;;  %v1444_v3 = vpop.xlane.xlu0 %1443 }
 0x2a3   :  { %2154 = vlog2.f32 %v1444_v3 }
 0x2a4   :  { %1570 = vst [vmem:[%s2925_s3 + $0xd8] sm:$0xff] %v1538_v52  ;;  %v1446_v36 = vpop.xlane.xlu1 %1445 }
 0x2a5   :  { %v2151_v34 = vpop.eup %2150  ;;  %2156 = vlog2.f32 %v1446_v36 }
 0x2a6   :  { %v1504_v5 = vmul.f32 0.6931472, %v2151_v34 }
 0x2a7   :  { %v2153_v15 = vpop.eup %2152 }
 0x2a8   :  { %v1539_v2 = vsub.f32 %v2779_v24, %v1504_v5  ;;  %v1506_v8 = vmul.f32 0.6931472, %v2153_v15 }
 0x2aa   :  { %1571 = vst [vmem:[%s2925_s3 + $0xe0] sm:$0xff] %v1539_v2  ;;  %v1540_v12 = vsub.f32 %v2783_v35, %v1506_v8 }
 0x2ac   :  { %1572 = vst [vmem:[%s2925_s3 + $0xe8] sm:$0xff] %v1540_v12 }
 0x2ad   :  { %v2155_v40 = vpop.eup %2154 }
 0x2ae   :  { %v1508_v43 = vmul.f32 0.6931472, %v2155_v40 }
 0x2af   :  { %v2157_v9 = vpop.eup %2156 }
 0x2b0   :  { %v1541_v48 = vsub.f32 %v2787_v49, %v1508_v43  ;;  %v1510_v13 = vmul.f32 0.6931472, %v2157_v9 }
 0x2b2   :  { %1573 = vst [vmem:[%s2925_s3 + $0xf0] sm:$0xff] %v1541_v48  ;;  %v1542_v24 = vsub.f32 %v2791_v60, %v1510_v13 }
 0x2b4   :  { %1574 = vst [vmem:[%s2925_s3 + $0xf8] sm:$0xff] %v1542_v24 }

// kernel: gcn_forward.4
= control target key start
LH: loop header
LB: loop body
LE: loop exit
PB: predicated region body
PF: predicated region fallthrough
CT: control target
= control target key end

     0   :  { %s2827_s1 = inlined_call_operand.vmem [shape: bf16[512,128], index: 1, kind: input, shape index: {}]   ;;  %s2828_s0 = inlined_call_operand.vmem [shape: bf16[256,512], index: 0, kind: input, shape index: {}]   ;;  %s2829_s3 = inlined_call_operand.vmem [shape: bf16[128,128], index: 3, kind: input, shape index: {}]   ;;  %s2830_s2 = inlined_call_operand.vmem [shape: f32[1,128], index: 2, kind: input, shape index: {}]   ;;  %s2831_s4 = inlined_call_operand.vmem [shape: bf16[256,128], index: 4, kind: output, shape index: {}]  }
   0x1   :  { %v2206_v0 = vld [vmem:[%s2827_s1 + $0x40] sm:$0xff]   ;;  %v2208_v2 = vld [vmem:[%s2827_s1 + $0x48] sm:$0xff]   ;;  %v2210_v4 = vld [vmem:[%s2827_s1 + $0x50] sm:$0xff]  }
   0x2   :  { %v2207_v1 = vld [vmem:[%s2827_s1] sm:$0xff]   ;;  %2190 = vmatprep.subr.bf16.mxu1 %v2206_v0  ;;  %1894 = vmatprep.subr.bf16.mxu0 %v2206_v0  ;;  %v2209_v3 = vld [vmem:[%s2827_s1 + $0x8] sm:$0xff]   ;;  %v2211_v5 = vld [vmem:[%s2827_s1 + $0x10] sm:$0xff]  }
   0x3   :  { %2198 = vmatpush3.bf16.msra.mxu1 %v2207_v1  ;;  %1895 = vmatpush3.bf16.msra.mxu0 %v2207_v1  ;;  %v2212_v6 = vld [vmem:[%s2827_s1 + $0x58] sm:$0xff]   ;;  %v2214_v8 = vld [vmem:[%s2827_s1 + $0x60] sm:$0xff]   ;;  %v2216_v10 = vld [vmem:[%s2827_s1 + $0x68] sm:$0xff]  }
   0x4   :  { %2191 = vmatprep.subr.bf16.mxu1 %v2208_v2  ;;  %1896 = vmatprep.subr.bf16.mxu0 %v2208_v2  ;;  %v2213_v7 = vld [vmem:[%s2827_s1 + $0x18] sm:$0xff]   ;;  %v2215_v9 = vld [vmem:[%s2827_s1 + $0x20] sm:$0xff]   ;;  %v2217_v12 = vld [vmem:[%s2827_s1 + $0x28] sm:$0xff]  }
   0x5   :  { %v2224_v11 = vld [vmem:[%s2828_s0 + $0x184] ss:$16 sps:$4 sm:$0xff]   ;;  %v2220_v15 = vld [vmem:[%s2827_s1 + $0x78] sm:$0xff]   ;;  %v2222_v18 = vld [vmem:[%s2828_s0 + $0x180] ss:$16 sps:$4 sm:$0xff]  }
   0x6   :  { %859 = vmatprep.mubr.bf16.mxu1 %v2224_v11  ;;  %v2218_v13 = vld [vmem:[%s2827_s1 + $0x70] sm:$0xff]   ;;  %v2221_v16 = vld [vmem:[%s2827_s1 + $0x38] sm:$0xff]   ;;  %v2225_v17 = vld [vmem:[%s2827_s1 + $0xc0] sm:$0xff]  }
   0x7   :  { %2199 = vmatpush3.bf16.msra.mxu1 %v2209_v3  ;;  %1897 = vmatpush3.bf16.msra.mxu0 %v2209_v3  ;;  %v2219_v14 = vld [vmem:[%s2827_s1 + $0x30] sm:$0xff]   ;;  %v2226_v19 = vld [vmem:[%s2827_s1 + $0x80] sm:$0xff]   ;;  %v2227_v21 = vld [vmem:[%s2827_s1 + $0xc8] sm:$0xff]  }
   0x8   :  { %2192 = vmatprep.subr.bf16.mxu1 %v2210_v4  ;;  %1898 = vmatprep.subr.bf16.mxu0 %v2210_v4  ;;  %v2229_v20 = vld [vmem:[%s2828_s0 + $0x1a4] ss:$16 sps:$4 sm:$0xff]   ;;  %v2228_v22 = vld [vmem:[%s2827_s1 + $0x88] sm:$0xff]   ;;  %v2231_v23 = vld [vmem:[%s2828_s0 + $0x1a0] ss:$16 sps:$4 sm:$0xff]  }
   0x9   :  { %v2232_v24 = vld [vmem:[%s2827_s1 + $0xd0] sm:$0xff]   ;;  %v2234_v28 = vld [vmem:[%s2827_s1 + $0xd8] sm:$0xff]   ;;  %v2239_v33 = vld [vmem:[%s2827_s1 + $0xe0] sm:$0xff]  }
   0xa   :  { %v2233_v25 = vld [vmem:[%s2827_s1 + $0x90] sm:$0xff]   ;;  %v2235_v31 = vld [vmem:[%s2827_s1 + $0x98] sm:$0xff]   ;;  %v2240_v36 = vld [vmem:[%s2827_s1 + $0xa0] sm:$0xff]  }
   0xb   :  { %2200 = vmatpush3.bf16.msra.mxu1 %v2211_v5  ;;  %1899 = vmatpush3.bf16.msra.mxu0 %v2211_v5  ;;  %v2250_v26 = vld [vmem:[%s2828_s0] ss:$16 sps:$4 sm:$0xff]   ;;  %v2252_v27 = vld [vmem:[%s2828_s0 + $0x4] ss:$16 sps:$4 sm:$0xff]   ;;  %v2241_v38 = vld [vmem:[%s2827_s1 + $0xe8] sm:$0xff]  }
   0xc   :  { %2193 = vmatprep.subr.bf16.mxu1 %v2212_v6  ;;  %1900 = vmatprep.subr.bf16.mxu0 %v2212_v6  ;;  %v2236_v29 = vld [vmem:[%s2828_s0 + $0x1c4] ss:$16 sps:$4 sm:$0xff]   ;;  %v2238_v32 = vld [vmem:[%s2828_s0 + $0x1c0] ss:$16 sps:$4 sm:$0xff]   ;;  %v2242_v39 = vld [vmem:[%s2827_s1 + $0xa8] sm:$0xff]  }
   0xd   :  { %763 = vmatprep.mubr.bf16.mxu0 %v2252_v27  ;;  %v2256_v30 = vld [vmem:[%s2828_s0 + $0x24] ss:$16 sps:$4 sm:$0xff]   ;;  %v2260_v34 = vld [vmem:[%s2828_s0 + $0x20] ss:$16 sps:$4 sm:$0xff]   ;;  %v2255_v45 = vld [vmem:[%s2828_s0 + $0xc] ss:$16 sps:$4 sm:$0xff]  }
   0xe   :  { %v2262_v35 = vld [vmem:[%s2828_s0 + $0x44] ss:$16 sps:$4 sm:$0xff]   ;;  %v2245_v40 = vld [vmem:[%s2828_s0 + $0x1e0] ss:$16 sps:$4 sm:$0xff]   ;;  %v2248_v46 = vld [vmem:[%s2827_s1 + $0xf8] sm:$0xff]  }
   0xf   :  { %2201 = vmatpush3.bf16.msra.mxu1 %v2213_v7  ;;  %1901 = vmatpush3.bf16.msra.mxu0 %v2213_v7  ;;  %v2243_v37 = vld [vmem:[%s2828_s0 + $0x1e4] ss:$16 sps:$4 sm:$0xff]   ;;  %v2266_v42 = vld [vmem:[%s2828_s0 + $0x40] ss:$16 sps:$4 sm:$0xff]   ;;  %v2249_v47 = vld [vmem:[%s2827_s1 + $0xb8] sm:$0xff]  }
  0x10   :  { %2194 = vmatprep.subr.bf16.mxu1 %v2214_v8  ;;  %1902 = vmatprep.subr.bf16.mxu0 %v2214_v8  ;;  %v2246_v41 = vld [vmem:[%s2827_s1 + $0xf0] sm:$0xff]   ;;  %v2253_v48 = vld [vmem:[%s2828_s0 + $0x8] ss:$16 sps:$4 sm:$0xff]   ;;  %v2258_v51 = vld [vmem:[%s2828_s0 + $0x2c] ss:$16 sps:$4 sm:$0xff]  }
  0x11   :  { %v2268_v43 = vld [vmem:[%s2828_s0 + $0x64] ss:$16 sps:$4 sm:$0xff]   ;;  %v2272_v49 = vld [vmem:[%s2828_s0 + $0x60] ss:$16 sps:$4 sm:$0xff]   ;;  %v2261_v53 = vld [vmem:[%s2828_s0 + $0x28] ss:$16 sps:$4 sm:$0xff]  }
  0x12   :  { %v2247_v44 = vld [vmem:[%s2827_s1 + $0xb0] sm:$0xff]   ;;  %v2264_v55 = vld [vmem:[%s2828_s0 + $0x4c] ss:$16 sps:$4 sm:$0xff]   ;;  %v2267_v57 = vld [vmem:[%s2828_s0 + $0x48] ss:$16 sps:$4 sm:$0xff]  }
  0x13   :  { %2202 = vmatpush3.bf16.msra.mxu1 %v2215_v9  ;;  %1903 = vmatpush3.bf16.msra.mxu0 %v2215_v9  ;;  %v2274_v50 = vld [vmem:[%s2828_s0 + $0x84] ss:$16 sps:$4 sm:$0xff]   ;;  %v2278_v52 = vld [vmem:[%s2828_s0 + $0x80] ss:$16 sps:$4 sm:$0xff]   ;;  %v2270_v59 = vld [vmem:[%s2828_s0 + $0x6c] ss:$16 sps:$4 sm:$0xff]  }
  0x14   :  { %2195 = vmatprep.subr.bf16.mxu1 %v2216_v10  ;;  %1904 = vmatprep.subr.bf16.mxu0 %v2216_v10  ;;  %v2280_v54 = vld [vmem:[%s2828_s0 + $0xa4] ss:$16 sps:$4 sm:$0xff]   ;;  %v2284_v56 = vld [vmem:[%s2828_s0 + $0xa0] ss:$16 sps:$4 sm:$0xff]   ;;  %v2273_v61 = vld [vmem:[%s2828_s0 + $0x68] ss:$16 sps:$4 sm:$0xff]  }
  0x15   :  { %v2286_v58 = vld [vmem:[%s2828_s0 + $0xc4] ss:$16 sps:$4 sm:$0xff]   ;;  %v2290_v60 = vld [vmem:[%s2828_s0 + $0xc0] ss:$16 sps:$4 sm:$0xff]   ;;  %v2276_v63 = vld [vmem:[%s2828_s0 + $0x8c] ss:$16 sps:$4 sm:$0xff]  }
  0x16   :  { %v2292_v62 = vld [vmem:[%s2828_s0 + $0xe4] ss:$16 sps:$4 sm:$0xff]   ;;  %v2296_v0 = vld [vmem:[%s2828_s0 + $0xe0] ss:$16 sps:$4 sm:$0xff]   ;;  %v2279_v1 = vld [vmem:[%s2828_s0 + $0x88] ss:$16 sps:$4 sm:$0xff]  }
  0x17   :  { %2203 = vmatpush3.bf16.msra.mxu1 %v2217_v12  ;;  %1905 = vmatpush3.bf16.msra.mxu0 %v2217_v12  ;;  %v2298_v2 = vld [vmem:[%s2828_s0 + $0x104] ss:$16 sps:$4 sm:$0xff]   ;;  %v2282_v3 = vld [vmem:[%s2828_s0 + $0xac] ss:$16 sps:$4 sm:$0xff]   ;;  %v2302_v4 = vld [vmem:[%s2828_s0 + $0x100] ss:$16 sps:$4 sm:$0xff]  }
  0x18   :  { %2196 = vmatprep.subr.bf16.mxu1 %v2218_v13  ;;  %1906 = vmatprep.subr.bf16.mxu0 %v2218_v13  ;;  %v2285_v5 = vld [vmem:[%s2828_s0 + $0xa8] ss:$16 sps:$4 sm:$0xff]   ;;  %v2304_v6 = vld [vmem:[%s2828_s0 + $0x124] ss:$16 sps:$4 sm:$0xff]   ;;  %v2288_v7 = vld [vmem:[%s2828_s0 + $0xcc] ss:$16 sps:$4 sm:$0xff]  }
  0x19   :  { %v2308_v8 = vld [vmem:[%s2828_s0 + $0x120] ss:$16 sps:$4 sm:$0xff]   ;;  %v2291_v9 = vld [vmem:[%s2828_s0 + $0xc8] ss:$16 sps:$4 sm:$0xff]   ;;  %v2310_v10 = vld [vmem:[%s2828_s0 + $0x144] ss:$16 sps:$4 sm:$0xff]  }
  0x1a   :  { %v2294_v11 = vld [vmem:[%s2828_s0 + $0xec] ss:$16 sps:$4 sm:$0xff]   ;;  %v2314_v12 = vld [vmem:[%s2828_s0 + $0x140] ss:$16 sps:$4 sm:$0xff]   ;;  %v2297_v13 = vld [vmem:[%s2828_s0 + $0xe8] ss:$16 sps:$4 sm:$0xff]  }
  0x1b   :  { %2204 = vmatpush3.bf16.msra.mxu1 %v2219_v14  ;;  %1907 = vmatpush3.bf16.msra.mxu0 %v2219_v14  ;;  %v2316_v14 = vld [vmem:[%s2828_s0 + $0x164] ss:$16 sps:$4 sm:$0xff]   ;;  %v2321_v27 = vld [vmem:[%s2828_s0 + $0x168] ss:$16 sps:$4 sm:$0xff]  }
  0x1c   :  { %2197 = vmatprep.subr.bf16.mxu1 %v2220_v15  ;;  %1908 = vmatprep.subr.bf16.mxu0 %v2220_v15  ;;  %v2300_v15 = vld [vmem:[%s2828_s0 + $0x10c] ss:$16 sps:$4 sm:$0xff]  }
  0x1f   :  { %2205 = vmatpush3.bf16.msra.mxu1 %v2221_v16  ;;  %1909 = vmatpush3.bf16.msra.mxu0 %v2221_v16  ;;  %v2320_v16 = vld [vmem:[%s2828_s0 + $0x160] ss:$16 sps:$4 sm:$0xff]  }
  0x20   :  { %2006 = vmatprep.subr.bf16.mxu1 %v2225_v17  ;;  %v2303_v17 = vld [vmem:[%s2828_s0 + $0x108] ss:$16 sps:$4 sm:$0xff]  }
  0x22   :  { %860 = vmatmul.mubr.bf16.vlgmr.msra.gmra.mrb[0].mxu1 %v2222_v18  ;;  %764 = vmatmul.mubr.bf16.vlgmr.msra.gmra.mrb[0].mxu0 %v2250_v26  ;;  %v2306_v18 = vld [vmem:[%s2828_s0 + $0x12c] ss:$16 sps:$4 sm:$0xff]  }
  0x23   :  { %2007 = vmatpush3.bf16.msra.mxu1 %v2226_v19  ;;  %867 = vmatprep.mubr.bf16.mxu1 %v2229_v20  ;;  %v2334_v19 = vld [vmem:[%s2829_s3] sm:$0xff]   ;;  %v2309_v20 = vld [vmem:[%s2828_s0 + $0x128] ss:$16 sps:$4 sm:$0xff]  }
  0x24   :  { %2008 = vmatprep.subr.bf16.mxu1 %v2227_v21  ;;  %771 = vmatprep.mubr.bf16.mxu0 %v2256_v30  ;;  %v2312_v21 = vld [vmem:[%s2828_s0 + $0x14c] ss:$16 sps:$4 sm:$0xff]  }
  0x25   :  { %2142 = vmatprep.subr.bf16.mxu0 %v2334_v19  ;;  %v2337_v26 = vld [vmem:[%s2829_s3 + $0x18] sm:$0xff]   ;;  %v2339_v30 = vld [vmem:[%s2829_s3 + $0x28] sm:$0xff]  }
  0x26   :  { %2143 = vmatpush3.bf16.msra.mxu0 %v2334_v19 }
  0x27   :  { %2009 = vmatpush3.bf16.msra.mxu1 %v2228_v22  ;;  %v2335_v22 = vld [vmem:[%s2829_s3 + $0x8] sm:$0xff]  }
  0x28   :  { %2010 = vmatprep.subr.bf16.mxu1 %v2232_v24  ;;  %v2318_v24 = vld [vmem:[%s2828_s0 + $0x16c] ss:$16 sps:$4 sm:$0xff]   ;;  %2144 = vmatprep.subr.bf16.mxu0 %v2335_v22 }
  0x2a   :  { %868 = vmatmul.mubr.bf16.gmra.mrb[4].mxu1 %v2231_v23  ;;  %772 = vmatmul.mubr.bf16.gmra.mrb[4].mxu0 %v2260_v34  ;;  %v2315_v23 = vld [vmem:[%s2828_s0 + $0x148] ss:$16 sps:$4 sm:$0xff]  }
  0x2b   :  { %2011 = vmatpush3.bf16.msra.mxu1 %v2233_v25  ;;  %875 = vmatprep.mubr.bf16.mxu1 %v2236_v29  ;;  %v2336_v25 = vld [vmem:[%s2829_s3 + $0x10] sm:$0xff]   ;;  %v2338_v29 = vld [vmem:[%s2829_s3 + $0x20] sm:$0xff]   ;;  %v2341_v34 = vld [vmem:[%s2829_s3 + $0x38] sm:$0xff]  }
  0x2c   :  { %2012 = vmatprep.subr.bf16.mxu1 %v2234_v28  ;;  %779 = vmatprep.mubr.bf16.mxu0 %v2262_v35  ;;  %v2322_v28 = vld [vmem:[%s2828_s0 + $0x18c] ss:$16 sps:$4 sm:$0xff]   ;;  %v2327_v35 = vld [vmem:[%s2828_s0 + $0x1a8] ss:$16 sps:$4 sm:$0xff]  }
  0x2d   :  { %2145 = vmatpush3.bf16.msra.mxu0 %v2335_v22 }
  0x2e   :  { %2146 = vmatprep.subr.bf16.mxu0 %v2336_v25 }
  0x2f   :  { %2013 = vmatpush3.bf16.msra.mxu1 %v2235_v31  ;;  %v2324_v31 = vld [vmem:[%s2828_s0 + $0x188] ss:$16 sps:$4 sm:$0xff]  }
  0x30   :  { %2014 = vmatprep.subr.bf16.mxu1 %v2239_v33  ;;  %v2340_v33 = vld [vmem:[%s2829_s3 + $0x30] sm:$0xff]  }
  0x31   :  { %2147 = vmatpush3.bf16.msra.mxu0 %v2336_v25 }
  0x32   :  { %876 = vmatmul.mubr.bf16.gmra.mrb[8].mxu1 %v2238_v32  ;;  %780 = vmatmul.mubr.bf16.gmra.mrb[8].mxu0 %v2266_v42  ;;  %v2325_v32 = vld [vmem:[%s2828_s0 + $0x1ac] ss:$16 sps:$4 sm:$0xff]  }
  0x33   :  { %2015 = vmatpush3.bf16.msra.mxu1 %v2240_v36  ;;  %883 = vmatprep.mubr.bf16.mxu1 %v2243_v37  ;;  %v2328_v36 = vld [vmem:[%s2828_s0 + $0x1cc] ss:$16 sps:$4 sm:$0xff]   ;;  %v2330_v37 = vld [vmem:[%s2828_s0 + $0x1c8] ss:$16 sps:$4 sm:$0xff]  }
  0x34   :  { %2016 = vmatprep.subr.bf16.mxu1 %v2241_v38  ;;  %787 = vmatprep.mubr.bf16.mxu0 %v2268_v43  ;;  %v2331_v38 = vld [vmem:[%s2828_s0 + $0x1ec] ss:$16 sps:$4 sm:$0xff]  }
  0x35   :  { %2148 = vmatprep.subr.bf16.mxu0 %v2337_v26 }
  0x36   :  { %2149 = vmatpush3.bf16.msra.mxu0 %v2337_v26 }
  0x37   :  { %2017 = vmatpush3.bf16.msra.mxu1 %v2242_v39  ;;  %2150 = vmatprep.subr.bf16.mxu0 %v2338_v29  ;;  %v2333_v39 = vld [vmem:[%s2828_s0 + $0x1e8] ss:$16 sps:$4 sm:$0xff]  }
  0x38   :  { %2018 = vmatprep.subr.bf16.mxu1 %v2246_v41 }
  0x3a   :  { %884 = vmatmul.mubr.bf16.gmra.mrb[12].mxu1 %v2245_v40  ;;  %788 = vmatmul.mubr.bf16.gmra.mrb[12].mxu0 %v2272_v49 }
  0x3b   :  { %2019 = vmatpush3.bf16.msra.mxu1 %v2247_v44  ;;  %924 = vmatprep.mubr.bf16.mxu1 %v2255_v45 }
  0x3c   :  { %2020 = vmatprep.subr.bf16.mxu1 %v2248_v46  ;;  %795 = vmatprep.mubr.bf16.mxu0 %v2274_v50 }
  0x3d   :  { %2151 = vmatpush3.bf16.msra.mxu0 %v2338_v29 }
  0x3e   :  { %2152 = vmatprep.subr.bf16.mxu0 %v2339_v30 }
  0x3f   :  { %2021 = vmatpush3.bf16.msra.mxu1 %v2249_v47 }
  0x41   :  { %2153 = vmatpush3.bf16.msra.mxu0 %v2339_v30 }
  0x42   :  { %925 = vmatmul.mubr.bf16.vlgmr.msra.gmra.mrb[16].mxu1 %v2253_v48  ;;  %796 = vmatmul.mubr.bf16.gmra.mrb[16].mxu0 %v2278_v52 }
  0x43   :  { %932 = vmatprep.mubr.bf16.mxu1 %v2258_v51  ;;  %803 = vmatprep.mubr.bf16.mxu0 %v2280_v54 }
  0x44   :  { %2154 = vmatprep.subr.bf16.mxu0 %v2340_v33 }
  0x45   :  { %2155 = vmatpush3.bf16.msra.mxu0 %v2340_v33 }
  0x46   :  { %2156 = vmatprep.subr.bf16.mxu0 %v2341_v34 }
  0x49   :  { %2157 = vmatpush3.bf16.msra.mxu0 %v2341_v34 }
  0x4a   :  { %933 = vmatmul.mubr.bf16.gmra.mrb[20].mxu1 %v2261_v53  ;;  %804 = vmatmul.mubr.bf16.gmra.mrb[20].mxu0 %v2284_v56 }
  0x4b   :  { %940 = vmatprep.mubr.bf16.mxu1 %v2264_v55  ;;  %811 = vmatprep.mubr.bf16.mxu0 %v2286_v58 }
  0x52   :  { %941 = vmatmul.mubr.bf16.gmra.mrb[24].mxu1 %v2267_v57  ;;  %812 = vmatmul.mubr.bf16.gmra.mrb[24].mxu0 %v2290_v60 }
  0x53   :  { %948 = vmatprep.mubr.bf16.mxu1 %v2270_v59  ;;  %819 = vmatprep.mubr.bf16.mxu0 %v2292_v62 }
  0x5a   :  { %949 = vmatmul.mubr.bf16.gmra.mrb[28].mxu1 %v2273_v61  ;;  %820 = vmatmul.mubr.bf16.gmra.mrb[28].mxu0 %v2296_v0 }
  0x5b   :  { %956 = vmatprep.mubr.bf16.mxu1 %v2276_v63  ;;  %827 = vmatprep.mubr.bf16.mxu0 %v2298_v2 }
  0x62   :  { %957 = vmatmul.mubr.bf16.gmra.mrb[32].mxu1 %v2279_v1  ;;  %828 = vmatmul.mubr.bf16.gmra.mrb[32].mxu0 %v2302_v4 }
  0x63   :  { %964 = vmatprep.mubr.bf16.mxu1 %v2282_v3  ;;  %835 = vmatprep.mubr.bf16.mxu0 %v2304_v6 }
  0x6a   :  { %965 = vmatmul.mubr.bf16.gmra.mrb[36].mxu1 %v2285_v5  ;;  %836 = vmatmul.mubr.bf16.gmra.mrb[36].mxu0 %v2308_v8 }
  0x6b   :  { %972 = vmatprep.mubr.bf16.mxu1 %v2288_v7  ;;  %843 = vmatprep.mubr.bf16.mxu0 %v2310_v10 }
  0x72   :  { %973 = vmatmul.mubr.bf16.gmra.mrb[40].mxu1 %v2291_v9  ;;  %844 = vmatmul.mubr.bf16.gmra.mrb[40].mxu0 %v2314_v12 }
  0x73   :  { %980 = vmatprep.mubr.bf16.mxu1 %v2294_v11  ;;  %851 = vmatprep.mubr.bf16.mxu0 %v2316_v14 }
  0x7a   :  { %981 = vmatmul.mubr.bf16.gmra.mrb[44].mxu1 %v2297_v13  ;;  %852 = vmatmul.mubr.bf16.gmra.mrb[44].mxu0 %v2320_v16 }
  0x7b   :  { %988 = vmatprep.mubr.bf16.mxu1 %v2300_v15 }
  0x82   :  { %989 = vmatmul.mubr.bf16.gmra.mrb[48].mxu1 %v2303_v17 }
  0x83   :  { %996 = vmatprep.mubr.bf16.mxu1 %v2306_v18 }
  0x8a   :  { %997 = vmatmul.mubr.bf16.gmra.mrb[52].mxu1 %v2309_v20 }
  0x8b   :  { %1004 = vmatprep.mubr.bf16.mxu1 %v2312_v21 }
  0x92   :  { %1005 = vmatmul.mubr.bf16.gmra.mrb[56].mxu1 %v2315_v23 }
  0x93   :  { %1012 = vmatprep.mubr.bf16.mxu1 %v2318_v24 }
  0x9a   :  { %1013 = vmatmul.mubr.bf16.gmra.mrb[60].mxu1 %v2321_v27  ;;  %v2700_v27 = vld [vmem:[%s2830_s2] ss:$0 sm:$0xff] }
  0x9b   :  { %1020 = vmatprep.mubr.bf16.mxu1 %v2322_v28 }
  0xa2   :  { %1021 = vmatmul.mubr.bf16.gmra.mrb[64].mxu1 %v2324_v31 }
  0xa3   :  { %1028 = vmatprep.mubr.bf16.mxu1 %v2325_v32 }
  0xaa   :  { %1029 = vmatmul.mubr.bf16.gmra.mrb[68].mxu1 %v2327_v35 }
  0xab   :  { %1036 = vmatprep.mubr.bf16.mxu1 %v2328_v36 }
  0xb2   :  { %1037 = vmatmul.mubr.bf16.gmra.mrb[72].mxu1 %v2330_v37 }
  0xb3   :  { %1044 = vmatprep.mubr.bf16.mxu1 %v2331_v38 }
  0xba   :  { %1045 = vmatmul.mubr.bf16.gmra.mrb[76].mxu1 %v2333_v39 }
  0xf5   :  { %v1982_v40 = vpop.f32.mrb[0].mxu1  ;;  %v1910_v46 = vpop.f32.mrb[0].mxu0 }
  0xf6   :  { %v1983_v41 = vpop.f32.mrb[1].mxu1  ;;  %v1911_v48 = vpop.f32.mrb[1].mxu0 }
  0xf7   :  { %v2679_v42 = vadd.f32 %v1983_v41, %v1982_v40  ;;  %v1985_v43 = vpop.f32.mrb[2].mxu1  ;;  %v1912_v50 = vadd.f32 %v1911_v48, %v1910_v46  ;;  %v1913_v51 = vpop.f32.mrb[2].mxu0 }
  0xf8   :  { %v1986_v44 = vpop.f32.mrb[3].mxu1  ;;  %v1914_v54 = vpop.f32.mrb[3].mxu0 }
  0xf9   :  { %v2681_v45 = vadd.f32 %v1986_v44, %v1985_v43  ;;  %v1915_v56 = vadd.f32 %v1914_v54, %v1913_v51 }
  0xfd   :  { %v1988_v47 = vpop.f32.mrb[4].mxu1  ;;  %v1916_v58 = vpop.f32.mrb[4].mxu0 }
  0xfe   :  { %v1989_v49 = vpop.f32.mrb[5].mxu1  ;;  %v1917_v60 = vpop.f32.mrb[5].mxu0 }
  0xff   :  { %v2683_v52 = vadd.f32 %v1989_v49, %v1988_v47  ;;  %v1991_v53 = vpop.f32.mrb[6].mxu1  ;;  %v1918_v62 = vadd.f32 %v1917_v60, %v1916_v58  ;;  %v1919_v63 = vpop.f32.mrb[6].mxu0 }
 0x100   :  { %v1992_v55 = vpop.f32.mrb[7].mxu1  ;;  %v1920_v2 = vpop.f32.mrb[7].mxu0 }
 0x101   :  { %v2685_v57 = vadd.f32 %v1992_v55, %v1991_v53  ;;  %v1921_v4 = vadd.f32 %v1920_v2, %v1919_v63 }
 0x105   :  { %v1994_v59 = vpop.f32.mrb[8].mxu1  ;;  %v1922_v6 = vpop.f32.mrb[8].mxu0 }
 0x106   :  { %v1995_v61 = vpop.f32.mrb[9].mxu1  ;;  %v1923_v8 = vpop.f32.mrb[9].mxu0 }
 0x107   :  { %v2687_v0 = vadd.f32 %v1995_v61, %v1994_v59  ;;  %v1997_v1 = vpop.f32.mrb[10].mxu1  ;;  %v1924_v10 = vadd.f32 %v1923_v8, %v1922_v6  ;;  %v1925_v11 = vpop.f32.mrb[10].mxu0 }
 0x108   :  { %v1998_v3 = vpop.f32.mrb[11].mxu1  ;;  %v1926_v14 = vpop.f32.mrb[11].mxu0 }
 0x109   :  { %v2689_v5 = vadd.f32 %v1998_v3, %v1997_v1  ;;  %v1927_v16 = vadd.f32 %v1926_v14, %v1925_v11 }
 0x10d   :  { %v2000_v7 = vpop.f32.mrb[12].mxu1  ;;  %v1928_v18 = vpop.f32.mrb[12].mxu0 }
 0x10e   :  { %v2001_v9 = vpop.f32.mrb[13].mxu1  ;;  %v1929_v20 = vpop.f32.mrb[13].mxu0 }
 0x10f   :  { %v2691_v12 = vadd.f32 %v2001_v9, %v2000_v7  ;;  %v2003_v13 = vpop.f32.mrb[14].mxu1  ;;  %v2695_v22 = vadd.f32 %v1929_v20, %v1928_v18  ;;  %v1931_v23 = vpop.f32.mrb[14].mxu0 }
 0x110   :  { %v2004_v15 = vpop.f32.mrb[15].mxu1  ;;  %v1932_v26 = vpop.f32.mrb[15].mxu0 }
 0x111   :  { %v2693_v17 = vadd.f32 %v2004_v15, %v2003_v13  ;;  %v2702_v29 = vadd.f32 %v1932_v26, %v1931_v23 }
 0x115   :  { %v2022_v19 = vpop.f32.mrb[16].mxu1  ;;  %v1934_v34 = vpop.f32.mrb[16].mxu0 }
 0x116   :  { %v2023_v21 = vpop.f32.mrb[17].mxu1  ;;  %v1935_v37 = vpop.f32.mrb[17].mxu0 }
 0x117   :  { %v2024_v24 = vadd.f32 %v2023_v21, %v2022_v19  ;;  %v2025_v25 = vpop.f32.mrb[18].mxu1  ;;  %v2706_v39 = vadd.f32 %v1935_v37, %v1934_v34  ;;  %v1937_v40 = vpop.f32.mrb[18].mxu0 }
 0x118   :  { %v2026_v28 = vpop.f32.mrb[19].mxu1  ;;  %v1938_v47 = vpop.f32.mrb[19].mxu0 }
 0x119   :  { %v927_v30 = vadd.f32 %v2024_v24, %v1912_v50  ;;  %v2027_v31 = vadd.f32 %v2026_v28, %v2025_v25  ;;  %v2708_v49 = vadd.f32 %v1938_v47, %v1937_v40 }
 0x11b   :  { %v1159_v32 = vadd.f32 %v2700_v27, %v927_v30  ;;  %v930_v33 = vadd.f32 %v2027_v31, %v1915_v56 }
 0x11d   :  { %v1160_v35 = vadd.f32 %v2700_v27, %v930_v33  ;;  %v2028_v36 = vpop.f32.mrb[20].mxu1  ;;  %v1191_v41 = vmax.f32 %v1159_v32, 0.0  ;;  %v1940_v56 = vpop.f32.mrb[20].mxu0 }
 0x11e   :  { %v2029_v38 = vpop.f32.mrb[21].mxu1  ;;  %v1941_v60 = vpop.f32.mrb[21].mxu0 }
 0x11f   :  { %v1192_v43 = vmax.f32 %v1160_v35, 0.0  ;;  %v2030_v44 = vadd.f32 %v2029_v38, %v2028_v36  ;;  %v2031_v46 = vpop.f32.mrb[22].mxu1  ;;  %v2712_v63 = vadd.f32 %v1941_v60, %v1940_v56  ;;  %v1943_v1 = vpop.f32.mrb[22].mxu0 }
 0x120   :  { %v2032_v48 = vpop.f32.mrb[23].mxu1 }
 0x121   :  { %v935_v50 = vadd.f32 %v2030_v44, %v1918_v62  ;;  %v2033_v51 = vadd.f32 %v2032_v48, %v2031_v46  ;;  %v1223_v53 = vpack.c.bf16 %v1192_v43, %v1191_v41  ;;  %v1944_v62 = vpop.f32.mrb[23].mxu0 }
 0x122   :  { %v2714_v9 = vadd.f32 %v1944_v62, %v1943_v1 }
 0x123   :  { %v1161_v54 = vadd.f32 %v2700_v27, %v935_v50  ;;  %v938_v55 = vadd.f32 %v2033_v51, %v1921_v4  ;;  %2158 = vmatprep.mubr.bf16.mxu0 %v1223_v53 }
 0x125   :  { %v1162_v58 = vadd.f32 %v2700_v27, %v938_v55  ;;  %v2034_v59 = vpop.f32.mrb[24].mxu1  ;;  %v1193_v2 = vmax.f32 %v1161_v54, 0.0  ;;  %v1946_v18 = vpop.f32.mrb[24].mxu0 }
 0x126   :  { %v2035_v61 = vpop.f32.mrb[25].mxu1  ;;  %v1947_v21 = vpop.f32.mrb[25].mxu0 }
 0x127   :  { %v1194_v3 = vmax.f32 %v1162_v58, 0.0  ;;  %v2036_v6 = vadd.f32 %v2035_v61, %v2034_v59  ;;  %v2037_v7 = vpop.f32.mrb[26].mxu1  ;;  %v2718_v24 = vadd.f32 %v1947_v21, %v1946_v18  ;;  %v1949_v25 = vpop.f32.mrb[26].mxu0 }
 0x128   :  { %v2038_v8 = vpop.f32.mrb[27].mxu1  ;;  %v1950_v32 = vpop.f32.mrb[27].mxu0 }
 0x129   :  { %v1224_v11 = vpack.c.bf16 %v1194_v3, %v1193_v2  ;;  %v943_v4 = vadd.f32 %v2036_v6, %v1924_v10  ;;  %v2039_v13 = vadd.f32 %v2038_v8, %v2037_v7  ;;  %v2720_v33 = vadd.f32 %v1950_v32, %v1949_v25 }
 0x12b   :  { %v1163_v14 = vadd.f32 %v2700_v27, %v943_v4  ;;  %v946_v15 = vadd.f32 %v2039_v13, %v1927_v16  ;;  %2159 = vmatmul.mubr.bf16.vlgmr.msra.gmra.mrb[48].mxu0 %v1224_v11 }
 0x12d   :  { %v1164_v19 = vadd.f32 %v2700_v27, %v946_v15  ;;  %v2040_v20 = vpop.f32.mrb[28].mxu1  ;;  %v1195_v26 = vmax.f32 %v1163_v14, 0.0  ;;  %v1952_v38 = vpop.f32.mrb[28].mxu0 }
 0x12e   :  { %v2041_v23 = vpop.f32.mrb[29].mxu1  ;;  %v1953_v43 = vpop.f32.mrb[29].mxu0 }
 0x12f   :  { %v1196_v28 = vmax.f32 %v1164_v19, 0.0  ;;  %v2042_v30 = vadd.f32 %v2041_v23, %v2040_v20  ;;  %v2043_v31 = vpop.f32.mrb[30].mxu1  ;;  %v2726_v46 = vadd.f32 %v1953_v43, %v1952_v38  ;;  %v1955_v47 = vpop.f32.mrb[30].mxu0 }
 0x130   :  { %v2044_v10 = vpop.f32.mrb[31].mxu1  ;;  %v1956_v53 = vpop.f32.mrb[31].mxu0 }
 0x131   :  { %v951_v16 = vadd.f32 %v2042_v30, %v2695_v22  ;;  %v2045_v34 = vadd.f32 %v2044_v10, %v2043_v31  ;;  %v1225_v35 = vpack.c.bf16 %v1196_v28, %v1195_v26  ;;  %v2728_v55 = vadd.f32 %v1956_v53, %v1955_v47 }
 0x133   :  { %v1165_v36 = vadd.f32 %v2700_v27, %v951_v16  ;;  %v954_v37 = vadd.f32 %v2045_v34, %v2702_v29  ;;  %2162 = vmatprep.mubr.bf16.mxu0 %v1225_v35 }
 0x135   :  { %v1166_v40 = vadd.f32 %v2700_v27, %v954_v37  ;;  %v2046_v41 = vpop.f32.mrb[32].mxu1  ;;  %v1197_v48 = vmax.f32 %v1165_v36, 0.0  ;;  %v1958_v61 = vpop.f32.mrb[32].mxu0 }
 0x136   :  { %v2047_v44 = vpop.f32.mrb[33].mxu1  ;;  %v1959_v3 = vpop.f32.mrb[33].mxu0 }
 0x137   :  { %v1198_v50 = vmax.f32 %v1166_v40, 0.0  ;;  %v2048_v51 = vadd.f32 %v2047_v44, %v2046_v41  ;;  %v2049_v22 = vpop.f32.mrb[34].mxu1  ;;  %v2734_v7 = vadd.f32 %v1959_v3, %v1958_v61  ;;  %v1961_v62 = vpop.f32.mrb[34].mxu0 }
 0x138   :  { %v2050_v54 = vpop.f32.mrb[35].mxu1  ;;  %v1962_v13 = vpop.f32.mrb[35].mxu0 }
 0x139   :  { %v959_v29 = vadd.f32 %v2048_v51, %v2706_v39  ;;  %v2051_v56 = vadd.f32 %v2050_v54, %v2049_v22  ;;  %v1226_v58 = vpack.c.bf16 %v1198_v50, %v1197_v48  ;;  %v2736_v15 = vadd.f32 %v1962_v13, %v1961_v62 }
 0x13b   :  { %v1167_v59 = vadd.f32 %v2700_v27, %v959_v29  ;;  %v962_v60 = vadd.f32 %v2051_v56, %v2708_v49  ;;  %2163 = vmatmul.mubr.bf16.gmra.mrb[52].mxu0 %v1226_v58 }
 0x13d   :  { %v1168_v1 = vadd.f32 %v2700_v27, %v962_v60  ;;  %v2052_v2 = vpop.f32.mrb[36].mxu1  ;;  %v1199_v8 = vmax.f32 %v1167_v59, 0.0  ;;  %v1964_v23 = vpop.f32.mrb[36].mxu0 }
 0x13e   :  { %v2053_v6 = vpop.f32.mrb[37].mxu1  ;;  %v1965_v28 = vpop.f32.mrb[37].mxu0 }
 0x13f   :  { %v1200_v11 = vmax.f32 %v1168_v1, 0.0  ;;  %v2054_v4 = vadd.f32 %v2053_v6, %v2052_v2  ;;  %v2055_v39 = vpop.f32.mrb[38].mxu1  ;;  %v2742_v31 = vadd.f32 %v1965_v28, %v1964_v23  ;;  %v1967_v32 = vpop.f32.mrb[38].mxu0 }
 0x140   :  { %v2056_v14 = vpop.f32.mrb[39].mxu1  ;;  %v1968_v35 = vpop.f32.mrb[39].mxu0 }
 0x141   :  { %v967_v49 = vadd.f32 %v2054_v4, %v2712_v63  ;;  %v2057_v18 = vadd.f32 %v2056_v14, %v2055_v39  ;;  %v1227_v19 = vpack.c.bf16 %v1200_v11, %v1199_v8  ;;  %v1969_v37 = vadd.f32 %v1968_v35, %v1967_v32 }
 0x143   :  { %v1169_v20 = vadd.f32 %v2700_v27, %v967_v49  ;;  %v970_v21 = vadd.f32 %v2057_v18, %v2714_v9  ;;  %2166 = vmatprep.mubr.bf16.mxu0 %v1227_v19 }
 0x145   :  { %v1170_v25 = vadd.f32 %v2700_v27, %v970_v21  ;;  %v2058_v26 = vpop.f32.mrb[40].mxu1  ;;  %v1201_v10 = vmax.f32 %v1169_v20, 0.0  ;;  %v1970_v44 = vpop.f32.mrb[40].mxu0 }
 0x146   :  { %v2059_v30 = vpop.f32.mrb[41].mxu1  ;;  %v1971_v50 = vpop.f32.mrb[41].mxu0 }
 0x147   :  { %v1202_v16 = vmax.f32 %v1170_v25, 0.0  ;;  %v2060_v34 = vadd.f32 %v2059_v30, %v2058_v26  ;;  %v2061_v63 = vpop.f32.mrb[42].mxu1  ;;  %v1972_v22 = vadd.f32 %v1971_v50, %v1970_v44  ;;  %v1973_v53 = vpop.f32.mrb[42].mxu0 }
 0x148   :  { %v2062_v36 = vpop.f32.mrb[43].mxu1 }
 0x149   :  { %v975_v38 = vadd.f32 %v2060_v34, %v2718_v24  ;;  %v2063_v9 = vadd.f32 %v2062_v36, %v2061_v63  ;;  %v1228_v40 = vpack.c.bf16 %v1202_v16, %v1201_v10  ;;  %v1974_v24 = vpop.f32.mrb[43].mxu0 }
 0x14a   :  { %v1975_v60 = vadd.f32 %v1974_v24, %v1973_v53 }
 0x14b   :  { %v1171_v41 = vadd.f32 %v2700_v27, %v975_v38  ;;  %v978_v43 = vadd.f32 %v2063_v9, %v2720_v33  ;;  %2167 = vmatmul.mubr.bf16.gmra.mrb[56].mxu0 %v1228_v40 }
 0x14d   :  { %v1172_v47 = vadd.f32 %v2700_v27, %v978_v43  ;;  %v2064_v48 = vpop.f32.mrb[44].mxu1  ;;  %v1203_v54 = vmax.f32 %v1171_v41, 0.0  ;;  %v1976_v6 = vpop.f32.mrb[44].mxu0 }
 0x14e   :  { %v2065_v51 = vpop.f32.mrb[45].mxu1  ;;  %v1977_v11 = vpop.f32.mrb[45].mxu0 }
 0x14f   :  { %v1204_v29 = vmax.f32 %v1172_v47, 0.0  ;;  %v2066_v56 = vadd.f32 %v2065_v51, %v2064_v48  ;;  %v2067_v58 = vpop.f32.mrb[46].mxu1  ;;  %v1978_v39 = vadd.f32 %v1977_v11, %v1976_v6  ;;  %v1979_v13 = vpop.f32.mrb[46].mxu0 }
 0x150   :  { %v2068_v59 = vpop.f32.mrb[47].mxu1 }
 0x151   :  { %v983_v61 = vadd.f32 %v2066_v56, %v2726_v46  ;;  %v2069_v1 = vadd.f32 %v2068_v59, %v2067_v58  ;;  %v1229_v33 = vpack.c.bf16 %v1204_v29, %v1203_v54  ;;  %v1980_v46 = vpop.f32.mrb[47].mxu0 }
 0x152   :  { %v1981_v21 = vadd.f32 %v1980_v46, %v1979_v13 }
 0x153   :  { %v1173_v2 = vadd.f32 %v2700_v27, %v983_v61  ;;  %v986_v3 = vadd.f32 %v2069_v1, %v2728_v55  ;;  %2170 = vmatprep.mubr.bf16.mxu0 %v1229_v33 }
 0x155   :  { %v1174_v62 = vadd.f32 %v2700_v27, %v986_v3  ;;  %v2070_v8 = vpop.f32.mrb[48].mxu1  ;;  %v1205_v14 = vmax.f32 %v1173_v2, 0.0 }
 0x156   :  { %v2071_v4 = vpop.f32.mrb[49].mxu1 }
 0x157   :  { %v1206_v49 = vmax.f32 %v1174_v62, 0.0  ;;  %v2072_v18 = vadd.f32 %v2071_v4, %v2070_v8  ;;  %v2073_v19 = vpop.f32.mrb[50].mxu1 }
 0x158   :  { %v2074_v20 = vpop.f32.mrb[51].mxu1 }
 0x159   :  { %v991_v23 = vadd.f32 %v2072_v18, %v2734_v7  ;;  %v2075_v25 = vadd.f32 %v2074_v20, %v2073_v19  ;;  %v1230_v55 = vpack.c.bf16 %v1206_v49, %v1205_v14 }
 0x15b   :  { %v1175_v26 = vadd.f32 %v2700_v27, %v991_v23  ;;  %v994_v28 = vadd.f32 %v2075_v25, %v2736_v15  ;;  %2171 = vmatmul.mubr.bf16.gmra.mrb[60].mxu0 %v1230_v55 }
 0x15d   :  { %v1176_v30 = vadd.f32 %v2700_v27, %v994_v28  ;;  %v2076_v32 = vpop.f32.mrb[52].mxu1  ;;  %v1207_v16 = vmax.f32 %v1175_v26, 0.0 }
 0x15e   :  { %v2077_v10 = vpop.f32.mrb[53].mxu1 }
 0x15f   :  { %v1208_v34 = vmax.f32 %v1176_v30, 0.0  ;;  %v2078_v63 = vadd.f32 %v2077_v10, %v2076_v32  ;;  %v2079_v35 = vpop.f32.mrb[54].mxu1 }
 0x160   :  { %v2080_v36 = vpop.f32.mrb[55].mxu1 }
 0x161   :  { %v999_v38 = vadd.f32 %v2078_v63, %v2742_v31  ;;  %v2081_v9 = vadd.f32 %v2080_v36, %v2079_v35  ;;  %v1231_v7 = vpack.c.bf16 %v1208_v34, %v1207_v16 }
 0x163   :  { %v1177_v40 = vadd.f32 %v2700_v27, %v999_v38  ;;  %v1002_v41 = vadd.f32 %v2081_v9, %v1969_v37  ;;  %2174 = vmatprep.mubr.bf16.mxu0 %v1231_v7 }
 0x165   :  { %v1178_v15 = vadd.f32 %v2700_v27, %v1002_v41  ;;  %v2082_v43 = vpop.f32.mrb[56].mxu1  ;;  %v1209_v47 = vmax.f32 %v1177_v40, 0.0 }
 0x166   :  { %v2083_v44 = vpop.f32.mrb[57].mxu1 }
 0x167   :  { %v1210_v48 = vmax.f32 %v1178_v15, 0.0  ;;  %v2084_v50 = vadd.f32 %v2083_v44, %v2082_v43  ;;  %v2085_v51 = vpop.f32.mrb[58].mxu1 }
 0x168   :  { %v2086_v53 = vpop.f32.mrb[59].mxu1 }
 0x169   :  { %v1007_v54 = vadd.f32 %v2084_v50, %v1972_v22  ;;  %v2087_v29 = vadd.f32 %v2086_v53, %v2085_v51  ;;  %v1232_v56 = vpack.c.bf16 %v1210_v48, %v1209_v47 }
 0x16b   :  { %v1179_v31 = vadd.f32 %v2700_v27, %v1007_v54  ;;  %v1010_v58 = vadd.f32 %v2087_v29, %v1975_v60  ;;  %2175 = vmatmul.mubr.bf16.gmra.mrb[64].mxu0 %v1232_v56 }
 0x16d   :  { %v1180_v24 = vadd.f32 %v2700_v27, %v1010_v58  ;;  %v2088_v37 = vpop.f32.mrb[60].mxu1  ;;  %v1211_v61 = vmax.f32 %v1179_v31, 0.0 }
 0x16e   :  { %v2089_v59 = vpop.f32.mrb[61].mxu1 }
 0x16f   :  { %v1212_v1 = vmax.f32 %v1180_v24, 0.0  ;;  %v2090_v33 = vadd.f32 %v2089_v59, %v2088_v37  ;;  %v2091_v2 = vpop.f32.mrb[62].mxu1 }
 0x170   :  { %v2092_v3 = vpop.f32.mrb[63].mxu1 }
 0x171   :  { %v1015_v6 = vadd.f32 %v2090_v33, %v1978_v39  ;;  %v2093_v62 = vadd.f32 %v2092_v3, %v2091_v2  ;;  %v1233_v8 = vpack.c.bf16 %v1212_v1, %v1211_v61 }
 0x173   :  { %v1181_v22 = vadd.f32 %v2700_v27, %v1015_v6  ;;  %v1018_v11 = vadd.f32 %v2093_v62, %v1981_v21  ;;  %2178 = vmatprep.mubr.bf16.mxu0 %v1233_v8 }
 0x175   :  { %v1182_v4 = vadd.f32 %v2700_v27, %v1018_v11  ;;  %v2094_v60 = vpop.f32.mrb[64].mxu1  ;;  %v1213_v14 = vmax.f32 %v1181_v22, 0.0 }
 0x176   :  { %v2095_v13 = vpop.f32.mrb[65].mxu1 }
 0x177   :  { %v1214_v49 = vmax.f32 %v1182_v4, 0.0  ;;  %v2096_v18 = vadd.f32 %v2095_v13, %v2094_v60  ;;  %v2097_v19 = vpop.f32.mrb[66].mxu1 }
 0x178   :  { %v2098_v46 = vpop.f32.mrb[67].mxu1 }
 0x179   :  { %v1023_v20 = vadd.f32 %v2096_v18, %v2679_v42  ;;  %v2099_v23 = vadd.f32 %v2098_v46, %v2097_v19  ;;  %v1234_v25 = vpack.c.bf16 %v1214_v49, %v1213_v14 }
 0x17b   :  { %v1183_v39 = vadd.f32 %v2700_v27, %v1023_v20  ;;  %v1026_v55 = vadd.f32 %v2099_v23, %v2681_v45  ;;  %2179 = vmatmul.mubr.bf16.gmra.mrb[68].mxu0 %v1234_v25 }
 0x17d   :  { %v1184_v21 = vadd.f32 %v2700_v27, %v1026_v55  ;;  %v2100_v26 = vpop.f32.mrb[68].mxu1  ;;  %v1215_v30 = vmax.f32 %v1183_v39, 0.0 }
 0x17e   :  { %v2101_v28 = vpop.f32.mrb[69].mxu1 }
 0x17f   :  { %v1216_v32 = vmax.f32 %v1184_v21, 0.0  ;;  %v2102_v10 = vadd.f32 %v2101_v28, %v2100_v26  ;;  %v2103_v16 = vpop.f32.mrb[70].mxu1 }
 0x180   :  { %v2104_v34 = vpop.f32.mrb[71].mxu1 }
 0x181   :  { %v1031_v63 = vadd.f32 %v2102_v10, %v2683_v52  ;;  %v2105_v35 = vadd.f32 %v2104_v34, %v2103_v16  ;;  %v1235_v42 = vpack.c.bf16 %v1216_v32, %v1215_v30 }
 0x183   :  { %v1185_v36 = vadd.f32 %v2700_v27, %v1031_v63  ;;  %v1034_v38 = vadd.f32 %v2105_v35, %v2685_v57  ;;  %2182 = vmatprep.mubr.bf16.mxu0 %v1235_v42 }
 0x185   :  { %v1186_v45 = vadd.f32 %v2700_v27, %v1034_v38  ;;  %v2106_v9 = vpop.f32.mrb[72].mxu1  ;;  %v1217_v40 = vmax.f32 %v1185_v36, 0.0 }
 0x186   :  { %v2107_v7 = vpop.f32.mrb[73].mxu1 }
 0x187   :  { %v1218_v41 = vmax.f32 %v1186_v45, 0.0  ;;  %v2108_v15 = vadd.f32 %v2107_v7, %v2106_v9  ;;  %v2109_v43 = vpop.f32.mrb[74].mxu1 }
 0x188   :  { %v2110_v44 = vpop.f32.mrb[75].mxu1 }
 0x189   :  { %v1039_v47 = vadd.f32 %v2108_v15, %v2687_v0  ;;  %v2111_v48 = vadd.f32 %v2110_v44, %v2109_v43  ;;  %v1236_v52 = vpack.c.bf16 %v1218_v41, %v1217_v40 }
 0x18b   :  { %v1187_v50 = vadd.f32 %v2700_v27, %v1039_v47  ;;  %v1042_v51 = vadd.f32 %v2111_v48, %v2689_v5  ;;  %2183 = vmatmul.mubr.bf16.gmra.mrb[72].mxu0 %v1236_v52 }
 0x18d   :  { %v1188_v57 = vadd.f32 %v2700_v27, %v1042_v51  ;;  %v2112_v53 = vpop.f32.mrb[76].mxu1  ;;  %v1219_v29 = vmax.f32 %v1187_v50, 0.0 }
 0x18e   :  { %v2113_v54 = vpop.f32.mrb[77].mxu1 }
 0x18f   :  { %v1220_v56 = vmax.f32 %v1188_v57, 0.0  ;;  %v2114_v31 = vadd.f32 %v2113_v54, %v2112_v53  ;;  %v2115_v58 = vpop.f32.mrb[78].mxu1 }
 0x190   :  { %v2116_v24 = vpop.f32.mrb[79].mxu1 }
 0x191   :  { %v1047_v37 = vadd.f32 %v2114_v31, %v2691_v12  ;;  %v2117_v59 = vadd.f32 %v2116_v24, %v2115_v58  ;;  %v1237_v0 = vpack.c.bf16 %v1220_v56, %v1219_v29 }
 0x193   :  { %v1189_v61 = vadd.f32 %v2700_v27, %v1047_v37  ;;  %v1050_v1 = vadd.f32 %v2117_v59, %v2693_v17  ;;  %2186 = vmatprep.mubr.bf16.mxu0 %v1237_v0 }
 0x195   :  { %v1190_v5 = vadd.f32 %v2700_v27, %v1050_v1  ;;  %v1221_v33 = vmax.f32 %v1189_v61, 0.0 }
 0x197   :  { %v1222_v2 = vmax.f32 %v1190_v5, 0.0 }
 0x199   :  { %v1238_v3 = vpack.c.bf16 %v1222_v2, %v1221_v33 }
 0x19b   :  { %2187 = vmatmul.mubr.bf16.gmra.mrb[76].mxu0 %v1238_v3 }
 0x1fe   :  { %v2160_v6 = vpop.f32.mrb[48].mxu0 }
 0x1ff   :  { %v1337_v62 = vpop.f32.mrb[49].mxu0 }
 0x200   :  { %v2161_v8 = vpop.f32.mrb[50].mxu0 }
 0x201   :  { %v1807_v22 = vpack.c.bf16 %v2161_v8, %v2160_v6  ;;  %v1340_v11 = vpop.f32.mrb[51].mxu0 }
 0x202   :  { %v1802_v4 = vpack.c.bf16 %v1340_v11, %v1337_v62 }
 0x203   :  { %1879 = vst [vmem:[%s2831_s4 + $0x8] sm:$0xff] %v1807_v22  }
 0x204   :  { %1803 = vst [vmem:[%s2831_s4] sm:$0xff] %v1802_v4  }
 0x20e   :  { %v2164_v12 = vpop.f32.mrb[52].mxu0 }
 0x20f   :  { %v1353_v17 = vpop.f32.mrb[53].mxu0 }
 0x210   :  { %v2165_v27 = vpop.f32.mrb[54].mxu0 }
 0x211   :  { %v1817_v60 = vpack.c.bf16 %v2165_v27, %v2164_v12  ;;  %v1356_v13 = vpop.f32.mrb[55].mxu0 }
 0x212   :  { %v1812_v14 = vpack.c.bf16 %v1356_v13, %v1353_v17 }
 0x213   :  { %1881 = vst [vmem:[%s2831_s4 + $0x18] sm:$0xff] %v1817_v60  }
 0x214   :  { %1880 = vst [vmem:[%s2831_s4 + $0x10] sm:$0xff] %v1812_v14  }
 0x21e   :  { %v2168_v49 = vpop.f32.mrb[56].mxu0 }
 0x21f   :  { %v1369_v18 = vpop.f32.mrb[57].mxu0 }
 0x220   :  { %v2169_v19 = vpop.f32.mrb[58].mxu0 }
 0x221   :  { %v1827_v46 = vpack.c.bf16 %v2169_v19, %v2168_v49  ;;  %v1372_v20 = vpop.f32.mrb[59].mxu0 }
 0x222   :  { %v1822_v23 = vpack.c.bf16 %v1372_v20, %v1369_v18 }
 0x223   :  { %1883 = vst [vmem:[%s2831_s4 + $0x28] sm:$0xff] %v1827_v46  }
 0x224   :  { %1882 = vst [vmem:[%s2831_s4 + $0x20] sm:$0xff] %v1822_v23  }
 0x22e   :  { %v2172_v25 = vpop.f32.mrb[60].mxu0 }
 0x22f   :  { %v1385_v39 = vpop.f32.mrb[61].mxu0 }
 0x230   :  { %v2173_v55 = vpop.f32.mrb[62].mxu0 }
 0x231   :  { %v1837_v21 = vpack.c.bf16 %v2173_v55, %v2172_v25  ;;  %v1388_v26 = vpop.f32.mrb[63].mxu0 }
 0x232   :  { %v1832_v28 = vpack.c.bf16 %v1388_v26, %v1385_v39 }
 0x233   :  { %1885 = vst [vmem:[%s2831_s4 + $0x38] sm:$0xff] %v1837_v21  }
 0x234   :  { %1884 = vst [vmem:[%s2831_s4 + $0x30] sm:$0xff] %v1832_v28  }
 0x23e   :  { %v2176_v30 = vpop.f32.mrb[64].mxu0 }
 0x23f   :  { %v1401_v32 = vpop.f32.mrb[65].mxu0 }
 0x240   :  { %v2177_v10 = vpop.f32.mrb[66].mxu0 }
 0x241   :  { %v1847_v16 = vpack.c.bf16 %v2177_v10, %v2176_v30  ;;  %v1404_v34 = vpop.f32.mrb[67].mxu0 }
 0x242   :  { %v1842_v63 = vpack.c.bf16 %v1404_v34, %v1401_v32 }
 0x243   :  { %1887 = vst [vmem:[%s2831_s4 + $0x48] sm:$0xff] %v1847_v16  }
 0x244   :  { %1886 = vst [vmem:[%s2831_s4 + $0x40] sm:$0xff] %v1842_v63  }
 0x24e   :  { %v2180_v35 = vpop.f32.mrb[68].mxu0 }
 0x24f   :  { %v1417_v42 = vpop.f32.mrb[69].mxu0 }
 0x250   :  { %v2181_v36 = vpop.f32.mrb[70].mxu0 }
 0x251   :  { %v1857_v38 = vpack.c.bf16 %v2181_v36, %v2180_v35  ;;  %v1420_v45 = vpop.f32.mrb[71].mxu0 }
 0x252   :  { %v1852_v9 = vpack.c.bf16 %v1420_v45, %v1417_v42 }
 0x253   :  { %1889 = vst [vmem:[%s2831_s4 + $0x58] sm:$0xff] %v1857_v38  }
 0x254   :  { %1888 = vst [vmem:[%s2831_s4 + $0x50] sm:$0xff] %v1852_v9  }
 0x25e   :  { %v2184_v7 = vpop.f32.mrb[72].mxu0 }
 0x25f   :  { %v1433_v40 = vpop.f32.mrb[73].mxu0 }
 0x260   :  { %v2185_v41 = vpop.f32.mrb[74].mxu0 }
 0x261   :  { %v1867_v15 = vpack.c.bf16 %v2185_v41, %v2184_v7  ;;  %v1436_v43 = vpop.f32.mrb[75].mxu0 }
 0x262   :  { %v1862_v44 = vpack.c.bf16 %v1436_v43, %v1433_v40 }
 0x263   :  { %1891 = vst [vmem:[%s2831_s4 + $0x68] sm:$0xff] %v1867_v15  }
 0x264   :  { %1890 = vst [vmem:[%s2831_s4 + $0x60] sm:$0xff] %v1862_v44  }
 0x26e   :  { %v2188_v47 = vpop.f32.mrb[76].mxu0 }
 0x26f   :  { %v1449_v48 = vpop.f32.mrb[77].mxu0 }
 0x270   :  { %v2189_v52 = vpop.f32.mrb[78].mxu0 }
 0x271   :  { %v1877_v50 = vpack.c.bf16 %v2189_v52, %v2188_v47  ;;  %v1452_v51 = vpop.f32.mrb[79].mxu0 }
 0x272   :  { %v1872_v57 = vpack.c.bf16 %v1452_v51, %v1449_v48 }
 0x273   :  { %1893 = vst [vmem:[%s2831_s4 + $0x78] sm:$0xff] %v1877_v50  }
 0x274   :  { %1892 = vst [vmem:[%s2831_s4 + $0x70] sm:$0xff] %v1872_v57  }

</bundles_post_ra>
